<compile_context>
chip_gen: v7x
topology: tpu7x:2x2x1
jax: 0.10.0
libtpu: 0.0.40
codegen_flags: <defaults>
</compile_context>

<pallas_src>
import functools

import jax
import jax.numpy as jnp
import numpy as np
from jax.experimental import pallas as pl
from jax.experimental.pallas import tpu as pltpu


def _leaky(v):
    # leaky_relu(v, 0.2) == max(v, 0.2*v)
    return jnp.maximum(v, 0.2 * v)


def _pick_rows_per_block(H, W, cmax, budget_bytes=2 << 20):
    """Largest divisor of H whose (TH*W, 9*cmax) bf16 im2col slab fits the budget."""
    max_rows = max(1, budget_bytes // max(1, W * 9 * cmax * 2))
    th = 1
    for d in range(1, H + 1):
        if H % d == 0 and d <= max_rows:
            th = d
    return th


def _make_kernel(H, W, TH, fin, fhidden, fout, learned_shortcut, is_bias, cdtype):
    n_blocks = H // TH

    def kernel(*refs):
        idx = 0
        x_ref = refs[idx]; idx += 1          # (1, H, W, fin) bf16 (pre-activation input)
        w0_ref = refs[idx]; idx += 1         # (9*fin, fhidden) bf16, dx-major taps
        b0_ref = refs[idx]; idx += 1         # (1, fhidden) f32
        w1_ref = refs[idx]; idx += 1         # (9*fhidden, fout) bf16
        b1_ref = None
        if is_bias:
            b1_ref = refs[idx]; idx += 1     # (1, fout) f32
        ws_ref = None
        if learned_shortcut:
            ws_ref = refs[idx]; idx += 1     # (fin, fout) bf16
        o_ref = refs[idx]; idx += 1          # (1, H, W, fout) f32
        xpad_ref = refs[idx]; idx += 1       # VMEM (H+2, W+2, fin) bf16
        mid_ref = refs[idx]; idx += 1        # VMEM (H+2, W+2, fhidden) bf16

        # Only the top/bottom halo rows need explicit zeroing (full-width,
        # contiguous).  The left/right halo columns are written as part of every
        # interior band store below, so they never need separate strided stores.
        xpad_ref[0:1, :, :] = jnp.zeros((1, W + 2, fin), cdtype)
        xpad_ref[H + 1:H + 2, :, :] = jnp.zeros((1, W + 2, fin), cdtype)
        mid_ref[0:1, :, :] = jnp.zeros((1, W + 2, fhidden), cdtype)
        mid_ref[H + 1:H + 2, :, :] = jnp.zeros((1, W + 2, fhidden), cdtype)

        zc_in = jnp.zeros((TH, 1, fin), cdtype)
        zc_mid = jnp.zeros((TH, 1, fhidden), cdtype)

        def for_each_block(body):
            if n_blocks == 1:
                body(0)                      # static indices when a single band covers H
            else:
                pl.loop(0, n_blocks)(body)

        def im2col(band, c):
            # band: (TH+2, W+2, c) bf16.  3 dx (sublane) shifts computed once and
            # reused for the 3 dy (major-dim) shifts.  Column order (dx, dy, ci)
            # matches the weight reshape in the wrapper.  Stays bf16 throughout.
            cols = []
            for dx in range(3):
                sx = band[:, dx:dx + W, :]
                for dy in range(3):
                    cols.append(sx[dy:dy + TH])
            return jnp.concatenate(cols, axis=-1).reshape(TH * W, 9 * c)

        # ---- pass 1: on-chip zero-padded leaky(x), written band-by-band ----
        def fill_xpad(b):
            r0 = b * TH
            x_rows = x_ref[0, pl.ds(r0, TH), :, :]               # (TH, W, fin) bf16
            band = jnp.concatenate([zc_in, _leaky(x_rows), zc_in], axis=1)
            xpad_ref[pl.ds(r0 + 1, TH), :, :] = band             # full-width store

        # ---- pass 2: conv_0, one MXU matmul per band (K = 9*fin) ----
        def conv0_block(b):
            r0 = b * TH
            band = xpad_ref[pl.ds(r0, TH + 2), :, :]             # (TH+2, W+2, fin)
            h = jnp.dot(im2col(band, fin), w0_ref[...],
                        preferred_element_type=jnp.float32)
            h = h + b0_ref[...]                                  # f32 bias
            core = _leaky(h).astype(cdtype).reshape(TH, W, fhidden)
            mid_ref[pl.ds(r0 + 1, TH), :, :] = jnp.concatenate(
                [zc_mid, core, zc_mid], axis=1)

        # ---- pass 3: conv_1 (K = 9*fhidden) + shortcut + residual write ----
        def conv1_block(b):
            r0 = b * TH
            band = mid_ref[pl.ds(r0, TH + 2), :, :]              # (TH+2, W+2, fhidden)
            acc = jnp.dot(im2col(band, fhidden), w1_ref[...],
                          preferred_element_type=jnp.float32)
            if is_bias:
                acc = acc + b1_ref[...]
            x_rows = x_ref[0, pl.ds(r0, TH), :, :].reshape(TH * W, fin)
            if learned_shortcut:
                xs = jnp.dot(x_rows, ws_ref[...],
                             preferred_element_type=jnp.float32)
            else:
                xs = x_rows.astype(jnp.float32)
            out = (xs + 0.1 * acc).reshape(TH, W, fout).astype(o_ref.dtype)
            o_ref[0, pl.ds(r0, TH), :, :] = out

        for_each_block(fill_xpad)
        for_each_block(conv0_block)
        for_each_block(conv1_block)

    return kernel


def resnet_block_forward(x_nchw, params, *, is_bias=True, compute_dtype=jnp.bfloat16):
    """Pallas forward. x_nchw: (N, fin, H, W) float32. Returns (N, fout, H, W)."""
    w0, b0, w1, b1 = params["w0"], params["b0"], params["w1"], params["b1"]
    ws = params.get("ws")
    fin, fhidden = w0.shape[2], w0.shape[3]
    fout = w1.shape[3]
    learned_shortcut = ws is not None
    N, _, H, W = x_nchw.shape

    # NCHW -> NHWC, cast to compute dtype (halves input DMA bytes; the kernel
    # feeds the MXU in bf16 anyway).
    x_nhwc = jnp.transpose(x_nchw, (0, 2, 3, 1)).astype(compute_dtype)

    # HWIO (dy, dx, ci, co) -> (dx, dy, ci, co) -> (9*ci, co): matches im2col column order.
    w0_k = jnp.transpose(w0, (1, 0, 2, 3)).reshape(9 * fin, fhidden).astype(compute_dtype)
    w1_k = jnp.transpose(w1, (1, 0, 2, 3)).reshape(9 * fhidden, fout).astype(compute_dtype)
    b0_k = b0.reshape(1, fhidden).astype(jnp.float32)

    TH = _pick_rows_per_block(H, W, max(fin, fhidden))

    in_specs = [
        pl.BlockSpec((1, H, W, fin), lambda n: (n, 0, 0, 0)),
        pl.BlockSpec((9 * fin, fhidden), lambda n: (0, 0)),
        pl.BlockSpec((1, fhidden), lambda n: (0, 0)),
        pl.BlockSpec((9 * fhidden, fout), lambda n: (0, 0)),
    ]
    args = [x_nhwc, w0_k, b0_k, w1_k]
    if is_bias:
        in_specs.append(pl.BlockSpec((1, fout), lambda n: (0, 0)))
        args.append(b1.reshape(1, fout).astype(jnp.float32))
    if learned_shortcut:
        in_specs.append(pl.BlockSpec((fin, fout), lambda n: (0, 0)))
        args.append(ws.astype(compute_dtype))

    kernel = _make_kernel(H, W, TH, fin, fhidden, fout, learned_shortcut, is_bias,
                          compute_dtype)

    # --- explicit VMEM budget: scratches + im2col slab + double-buffered I/O ---
    bpe = 2  # compute dtype bytes
    scratch_bytes = (H + 2) * (W + 2) * (fin + fhidden) * bpe
    io_bytes = 2 * H * W * fin * bpe + 2 * H * W * fout * 4
    wgt_bytes = 2 * (9 * fin * fhidden + 9 * fhidden * fout
                     + (fin * fout if learned_shortcut else 0)) * bpe
    slab_bytes = 4 * TH * W * 9 * max(fin, fhidden) * bpe   # slab + matmul temps
    needed = scratch_bytes + io_bytes + wgt_bytes + slab_bytes + (fhidden + fout) * 8
    vmem_limit = int(min(max(needed * 2, 16 << 20), 64 << 20))

    flops = N * (2 * H * W * 9 * (fin * fhidden + fhidden * fout)
                 + (2 * H * W * fin * fout if learned_shortcut else 0))
    bytes_accessed = (N * H * W * fin * bpe + N * H * W * fout * 4
                      + (9 * fin * fhidden + 9 * fhidden * fout) * bpe)
    cost = pl.CostEstimate(flops=flops, transcendentals=0,
                           bytes_accessed=bytes_accessed)

    out_nhwc = pl.pallas_call(
        kernel,
        out_shape=jax.ShapeDtypeStruct((N, H, W, fout), jnp.float32),
        grid_spec=pltpu.PrefetchScalarGridSpec(
            num_scalar_prefetch=0,
            grid=(N,),
            in_specs=in_specs,
            out_specs=pl.BlockSpec((1, H, W, fout), lambda n: (n, 0, 0, 0)),
            scratch_shapes=[
                pltpu.VMEM((H + 2, W + 2, fin), compute_dtype),     # padded leaky(x)
                pltpu.VMEM((H + 2, W + 2, fhidden), compute_dtype), # padded leaky(conv0)
            ],
        ),
        compiler_params=pltpu.CompilerParams(
            dimension_semantics=("parallel",),
            vmem_limit_bytes=vmem_limit,
        ),
        cost_estimate=cost,
    )(*args)

    return jnp.transpose(out_nhwc, (0, 3, 1, 2)).astype(x_nchw.dtype)


def resnet_block_reference(x_nchw, params, *, is_bias=True):
    """Pure-JAX f32 reference (lax.conv) mirroring the PyTorch forward."""
    w0, b0, w1, b1, ws = params["w0"], params["b0"], params["w1"], params["b1"], params.get("ws")
    dn = ("NHWC", "HWIO", "NHWC")
    x = jnp.transpose(x_nchw, (0, 2, 3, 1))
    conv = functools.partial(jax.lax.conv_general_dilated, window_strides=(1, 1),
                             padding="SAME", dimension_numbers=dn, precision="highest")
    act = lambda v: jnp.where(v > 0, v, 0.2 * v)
    dx = conv(act(x), w0) + b0
    dx = conv(act(dx), w1)
    if is_bias:
        dx = dx + b1
    if ws is not None:
        xs = conv(x, ws.reshape(1, 1, *ws.shape))
    else:
        xs = x
    return jnp.transpose(xs + 0.1 * dx, (0, 3, 1, 2))


def init_params(key, fin, fout, fhidden=None):
    if fhidden is None:
        fhidden = min(fin, fout)
    ks = jax.random.split(key, 5)
    params = {
        "w0": 0.1 * jax.random.normal(ks[0], (3, 3, fin, fhidden), jnp.float32),  # HWIO
        "b0": 0.1 * jax.random.normal(ks[1], (fhidden,), jnp.float32),
        "w1": 0.1 * jax.random.normal(ks[2], (3, 3, fhidden, fout), jnp.float32),
        "b1": 0.1 * jax.random.normal(ks[3], (fout,), jnp.float32),
    }
    if fin != fout:  # learned_shortcut: 1x1 conv, no bias
        params["ws"] = 0.1 * jax.random.normal(ks[4], (fin, fout), jnp.float32)
    return params


if __name__ == "__main__":
    key = jax.random.PRNGKey(0)
    kx1, kp1, kx2, kp2 = jax.random.split(key, 4)
    # Tolerance covers bf16 inputs / bf16 MXU (f32 accumulation) vs. the f32 reference.
    TOL = 1e-2

    # Config 1: fin != fout -> learned 1x1 shortcut, conv_1 with bias.
    N, fin, fout, H, W = 2, 4, 8, 16, 16
    x1 = jax.random.normal(kx1, (N, fin, H, W), jnp.float32)
    p1 = init_params(kp1, fin, fout)
    out1 = jax.block_until_ready(resnet_block_forward(x1, p1, is_bias=True))
    ref1 = resnet_block_reference(x1, p1, is_bias=True)
    np.testing.assert_allclose(np.asarray(out1), np.asarray(ref1), rtol=TOL, atol=TOL)

    # Config 2: fin == fout -> identity shortcut, conv_1 without bias.
    fin2 = fout2 = 8
    x2 = jax.random.normal(kx2, (N, fin2, H, W), jnp.float32)
    p2 = init_params(kp2, fin2, fout2)
    out2 = jax.block_until_ready(resnet_block_forward(x2, p2, is_bias=False))
    ref2 = resnet_block_reference(x2, p2, is_bias=False)
    np.testing.assert_allclose(np.asarray(out2), np.asarray(ref2), rtol=TOL, atol=TOL)

    print("KERNEL_OK")
</pallas_src>

<mosaic_0001>
module attributes {stable_mosaic.version = 11 : i64} {
  func.func @kernel(%arg0: i32, %arg1: memref<1x16x16x4xbf16, #tpu.memory_space<vmem>>, %arg2: memref<36x4xbf16, #tpu.memory_space<vmem>>, %arg3: memref<1x4xf32, #tpu.memory_space<vmem>>, %arg4: memref<36x8xbf16, #tpu.memory_space<vmem>>, %arg5: memref<1x8xf32, #tpu.memory_space<vmem>>, %arg6: memref<4x8xbf16, #tpu.memory_space<vmem>>, %arg7: memref<1x16x16x8xf32, #tpu.memory_space<vmem>>, %arg8: memref<18x18x4xbf16, #tpu.memory_space<vmem>>, %arg9: memref<18x18x4xbf16, #tpu.memory_space<vmem>>) attributes {dimension_semantics = [#tpu.dimension_semantics<parallel>], iteration_bounds = array<i64: 2>, scalar_prefetch = 0 : i64, scratch_operands = 2 : i64, tpu.core_type = #tpu.core_type<tc>, window_params = [{transform_indices = @transform_0, window_bounds = array<i64: 1, 16, 16, 4>}, {pipeline_mode = #tpu.pipeline_mode<synchronous>, transform_indices = @transform_1, window_bounds = array<i64: 36, 4>}, {pipeline_mode = #tpu.pipeline_mode<synchronous>, transform_indices = @transform_2, window_bounds = array<i64: 1, 4>}, {pipeline_mode = #tpu.pipeline_mode<synchronous>, transform_indices = @transform_3, window_bounds = array<i64: 36, 8>}, {pipeline_mode = #tpu.pipeline_mode<synchronous>, transform_indices = @transform_4, window_bounds = array<i64: 1, 8>}, {pipeline_mode = #tpu.pipeline_mode<synchronous>, transform_indices = @transform_5, window_bounds = array<i64: 4, 8>}, {transform_indices = @transform_6, window_bounds = array<i64: 1, 16, 16, 8>}]} {
    %cst = arith.constant 0.000000e+00 : bf16
    %0 = vector.broadcast %cst : bf16 to vector<1x18x4xbf16>
    %c0 = arith.constant 0 : index
    %c0_0 = arith.constant 0 : index
    %c0_1 = arith.constant 0 : index
    %1 = vector.load %arg8[%c0, %c0_0, %c0_1] : memref<18x18x4xbf16, #tpu.memory_space<vmem>>, vector<1x18x4xbf16>
    tpu.vector_store %arg8[%c0, %c0_0, %c0_1], %0 {strides = array<i32>} : memref<18x18x4xbf16, #tpu.memory_space<vmem>>, vector<1x18x4xbf16>,
    %cst_2 = arith.constant 0.000000e+00 : bf16
    %2 = vector.broadcast %cst_2 : bf16 to vector<1x18x4xbf16>
    %c17 = arith.constant 17 : index
    %c0_3 = arith.constant 0 : index
    %c0_4 = arith.constant 0 : index
    %3 = vector.load %arg8[%c17, %c0_3, %c0_4] : memref<18x18x4xbf16, #tpu.memory_space<vmem>>, vector<1x18x4xbf16>
    tpu.vector_store %arg8[%c17, %c0_3, %c0_4], %2 {strides = array<i32>} : memref<18x18x4xbf16, #tpu.memory_space<vmem>>, vector<1x18x4xbf16>,
    %cst_5 = arith.constant 0.000000e+00 : bf16
    %4 = vector.broadcast %cst_5 : bf16 to vector<1x18x4xbf16>
    %c0_6 = arith.constant 0 : index
    %c0_7 = arith.constant 0 : index
    %c0_8 = arith.constant 0 : index
    %5 = vector.load %arg9[%c0_6, %c0_7, %c0_8] : memref<18x18x4xbf16, #tpu.memory_space<vmem>>, vector<1x18x4xbf16>
    tpu.vector_store %arg9[%c0_6, %c0_7, %c0_8], %4 {strides = array<i32>} : memref<18x18x4xbf16, #tpu.memory_space<vmem>>, vector<1x18x4xbf16>,
    %cst_9 = arith.constant 0.000000e+00 : bf16
    %6 = vector.broadcast %cst_9 : bf16 to vector<1x18x4xbf16>
    %c17_10 = arith.constant 17 : index
    %c0_11 = arith.constant 0 : index
    %c0_12 = arith.constant 0 : index
    %7 = vector.load %arg9[%c17_10, %c0_11, %c0_12] : memref<18x18x4xbf16, #tpu.memory_space<vmem>>, vector<1x18x4xbf16>
    tpu.vector_store %arg9[%c17_10, %c0_11, %c0_12], %6 {strides = array<i32>} : memref<18x18x4xbf16, #tpu.memory_space<vmem>>, vector<1x18x4xbf16>,
    %cst_13 = arith.constant 0.000000e+00 : bf16
    %8 = vector.broadcast %cst_13 : bf16 to vector<16x1x4xbf16>
    %cst_14 = arith.constant 0.000000e+00 : bf16
    %9 = vector.broadcast %cst_14 : bf16 to vector<16x1x4xbf16>
    %c0_15 = arith.constant 0 : index
    %c0_16 = arith.constant 0 : index
    %c0_17 = arith.constant 0 : index
    %c0_18 = arith.constant 0 : index
    %10 = vector.load %arg1[%c0_15, %c0_16, %c0_17, %c0_18] : memref<1x16x16x4xbf16, #tpu.memory_space<vmem>>, vector<1x16x16x4xbf16>
    %11 = vector.shape_cast %10 : vector<1x16x16x4xbf16> to vector<16x16x4xbf16>
    %cst_19 = arith.constant 2.001950e-01 : bf16
    %12 = vector.broadcast %cst_19 : bf16 to vector<16x16x4xbf16>
    %13 = arith.mulf %12, %11 : vector<16x16x4xbf16>
    %14 = arith.maximumf %11, %13 : vector<16x16x4xbf16>
    %15 = tpu.concatenate %8, %14, %8 in 1 : vector<16x1x4xbf16>, vector<16x16x4xbf16>, vector<16x1x4xbf16> -> vector<16x18x4xbf16>
    %c1 = arith.constant 1 : index
    %c0_20 = arith.constant 0 : index
    %c0_21 = arith.constant 0 : index
    %16 = vector.load %arg8[%c1, %c0_20, %c0_21] : memref<18x18x4xbf16, #tpu.memory_space<vmem>>, vector<16x18x4xbf16>
    tpu.vector_store %arg8[%c1, %c0_20, %c0_21], %15 {strides = array<i32>} : memref<18x18x4xbf16, #tpu.memory_space<vmem>>, vector<16x18x4xbf16>,
    %c0_22 = arith.constant 0 : index
    %c0_23 = arith.constant 0 : index
    %c0_24 = arith.constant 0 : index
    %17 = vector.load %arg8[%c0_22, %c0_23, %c0_24] : memref<18x18x4xbf16, #tpu.memory_space<vmem>>, vector<18x18x4xbf16>
    %18 = vector.extract_strided_slice %17 {offsets = [0, 0, 0], sizes = [18, 16, 4], strides = [1, 1, 1]} : vector<18x18x4xbf16> to vector<18x16x4xbf16>
    %19 = vector.extract_strided_slice %18 {offsets = [0, 0, 0], sizes = [16, 16, 4], strides = [1, 1, 1]} : vector<18x16x4xbf16> to vector<16x16x4xbf16>
    %20 = vector.extract_strided_slice %18 {offsets = [1, 0, 0], sizes = [16, 16, 4], strides = [1, 1, 1]} : vector<18x16x4xbf16> to vector<16x16x4xbf16>
    %21 = vector.extract_strided_slice %18 {offsets = [2, 0, 0], sizes = [16, 16, 4], strides = [1, 1, 1]} : vector<18x16x4xbf16> to vector<16x16x4xbf16>
    %22 = vector.extract_strided_slice %17 {offsets = [0, 1, 0], sizes = [18, 16, 4], strides = [1, 1, 1]} : vector<18x18x4xbf16> to vector<18x16x4xbf16>
    %23 = vector.extract_strided_slice %22 {offsets = [0, 0, 0], sizes = [16, 16, 4], strides = [1, 1, 1]} : vector<18x16x4xbf16> to vector<16x16x4xbf16>
    %24 = vector.extract_strided_slice %22 {offsets = [1, 0, 0], sizes = [16, 16, 4], strides = [1, 1, 1]} : vector<18x16x4xbf16> to vector<16x16x4xbf16>
    %25 = vector.extract_strided_slice %22 {offsets = [2, 0, 0], sizes = [16, 16, 4], strides = [1, 1, 1]} : vector<18x16x4xbf16> to vector<16x16x4xbf16>
    %26 = vector.extract_strided_slice %17 {offsets = [0, 2, 0], sizes = [18, 16, 4], strides = [1, 1, 1]} : vector<18x18x4xbf16> to vector<18x16x4xbf16>
    %27 = vector.extract_strided_slice %26 {offsets = [0, 0, 0], sizes = [16, 16, 4], strides = [1, 1, 1]} : vector<18x16x4xbf16> to vector<16x16x4xbf16>
    %28 = vector.extract_strided_slice %26 {offsets = [1, 0, 0], sizes = [16, 16, 4], strides = [1, 1, 1]} : vector<18x16x4xbf16> to vector<16x16x4xbf16>
    %29 = vector.extract_strided_slice %26 {offsets = [2, 0, 0], sizes = [16, 16, 4], strides = [1, 1, 1]} : vector<18x16x4xbf16> to vector<16x16x4xbf16>
    %30 = tpu.concatenate %19, %20, %21, %23, %24, %25, %27, %28, %29 in 2 : vector<16x16x4xbf16>, vector<16x16x4xbf16>, vector<16x16x4xbf16>, vector<16x16x4xbf16>, vector<16x16x4xbf16>, vector<16x16x4xbf16>, vector<16x16x4xbf16>, vector<16x16x4xbf16>, vector<16x16x4xbf16> -> vector<16x16x36xbf16>
    %31 = vector.shape_cast %30 : vector<16x16x36xbf16> to vector<256x36xbf16>
    %c0_25 = arith.constant 0 : index
    %c0_26 = arith.constant 0 : index
    %32 = vector.load %arg2[%c0_25, %c0_26] : memref<36x4xbf16, #tpu.memory_space<vmem>>, vector<36x4xbf16>
    %cst_27 = arith.constant dense<0.000000e+00> : vector<256x4xf32>
    %33 = tpu.matmul %31, %32, %cst_27 {dimension_numbers = #tpu.dot_dimension_numbers<[1], [0], [0], [1], [0, 0, 1, 1], [], []>} : vector<256x36xbf16>, vector<36x4xbf16>, vector<256x4xf32> -> vector<256x4xf32>
    %c0_28 = arith.constant 0 : index
    %c0_29 = arith.constant 0 : index
    %34 = vector.load %arg3[%c0_28, %c0_29] : memref<1x4xf32, #tpu.memory_space<vmem>>, vector<1x4xf32>
    %35 = vector.broadcast %34 : vector<1x4xf32> to vector<256x4xf32>
    %36 = arith.addf %33, %35 : vector<256x4xf32>
    %cst_30 = arith.constant 2.000000e-01 : f32
    %37 = vector.broadcast %cst_30 : f32 to vector<256x4xf32>
    %38 = arith.mulf %37, %36 : vector<256x4xf32>
    %39 = arith.maximumf %36, %38 : vector<256x4xf32>
    %40 = arith.truncf %39 : vector<256x4xf32> to vector<256x4xbf16>
    %41 = vector.shape_cast %40 : vector<256x4xbf16> to vector<16x16x4xbf16>
    %42 = tpu.concatenate %9, %41, %9 in 1 : vector<16x1x4xbf16>, vector<16x16x4xbf16>, vector<16x1x4xbf16> -> vector<16x18x4xbf16>
    %c1_31 = arith.constant 1 : index
    %c0_32 = arith.constant 0 : index
    %c0_33 = arith.constant 0 : index
    %43 = vector.load %arg9[%c1_31, %c0_32, %c0_33] : memref<18x18x4xbf16, #tpu.memory_space<vmem>>, vector<16x18x4xbf16>
    tpu.vector_store %arg9[%c1_31, %c0_32, %c0_33], %42 {strides = array<i32>} : memref<18x18x4xbf16, #tpu.memory_space<vmem>>, vector<16x18x4xbf16>,
    %c0_34 = arith.constant 0 : index
    %c0_35 = arith.constant 0 : index
    %c0_36 = arith.constant 0 : index
    %44 = vector.load %arg9[%c0_34, %c0_35, %c0_36] : memref<18x18x4xbf16, #tpu.memory_space<vmem>>, vector<18x18x4xbf16>
    %45 = vector.extract_strided_slice %44 {offsets = [0, 0, 0], sizes = [18, 16, 4], strides = [1, 1, 1]} : vector<18x18x4xbf16> to vector<18x16x4xbf16>
    %46 = vector.extract_strided_slice %45 {offsets = [0, 0, 0], sizes = [16, 16, 4], strides = [1, 1, 1]} : vector<18x16x4xbf16> to vector<16x16x4xbf16>
    %47 = vector.extract_strided_slice %45 {offsets = [1, 0, 0], sizes = [16, 16, 4], strides = [1, 1, 1]} : vector<18x16x4xbf16> to vector<16x16x4xbf16>
    %48 = vector.extract_strided_slice %45 {offsets = [2, 0, 0], sizes = [16, 16, 4], strides = [1, 1, 1]} : vector<18x16x4xbf16> to vector<16x16x4xbf16>
    %49 = vector.extract_strided_slice %44 {offsets = [0, 1, 0], sizes = [18, 16, 4], strides = [1, 1, 1]} : vector<18x18x4xbf16> to vector<18x16x4xbf16>
    %50 = vector.extract_strided_slice %49 {offsets = [0, 0, 0], sizes = [16, 16, 4], strides = [1, 1, 1]} : vector<18x16x4xbf16> to vector<16x16x4xbf16>
    %51 = vector.extract_strided_slice %49 {offsets = [1, 0, 0], sizes = [16, 16, 4], strides = [1, 1, 1]} : vector<18x16x4xbf16> to vector<16x16x4xbf16>
    %52 = vector.extract_strided_slice %49 {offsets = [2, 0, 0], sizes = [16, 16, 4], strides = [1, 1, 1]} : vector<18x16x4xbf16> to vector<16x16x4xbf16>
    %53 = vector.extract_strided_slice %44 {offsets = [0, 2, 0], sizes = [18, 16, 4], strides = [1, 1, 1]} : vector<18x18x4xbf16> to vector<18x16x4xbf16>
    %54 = vector.extract_strided_slice %53 {offsets = [0, 0, 0], sizes = [16, 16, 4], strides = [1, 1, 1]} : vector<18x16x4xbf16> to vector<16x16x4xbf16>
    %55 = vector.extract_strided_slice %53 {offsets = [1, 0, 0], sizes = [16, 16, 4], strides = [1, 1, 1]} : vector<18x16x4xbf16> to vector<16x16x4xbf16>
    %56 = vector.extract_strided_slice %53 {offsets = [2, 0, 0], sizes = [16, 16, 4], strides = [1, 1, 1]} : vector<18x16x4xbf16> to vector<16x16x4xbf16>
    %57 = tpu.concatenate %46, %47, %48, %50, %51, %52, %54, %55, %56 in 2 : vector<16x16x4xbf16>, vector<16x16x4xbf16>, vector<16x16x4xbf16>, vector<16x16x4xbf16>, vector<16x16x4xbf16>, vector<16x16x4xbf16>, vector<16x16x4xbf16>, vector<16x16x4xbf16>, vector<16x16x4xbf16> -> vector<16x16x36xbf16>
    %58 = vector.shape_cast %57 : vector<16x16x36xbf16> to vector<256x36xbf16>
    %c0_37 = arith.constant 0 : index
    %c0_38 = arith.constant 0 : index
    %59 = vector.load %arg4[%c0_37, %c0_38] : memref<36x8xbf16, #tpu.memory_space<vmem>>, vector<36x8xbf16>
    %cst_39 = arith.constant dense<0.000000e+00> : vector<256x8xf32>
    %60 = tpu.matmul %58, %59, %cst_39 {dimension_numbers = #tpu.dot_dimension_numbers<[1], [0], [0], [1], [0, 0, 1, 1], [], []>} : vector<256x36xbf16>, vector<36x8xbf16>, vector<256x8xf32> -> vector<256x8xf32>
    %c0_40 = arith.constant 0 : index
    %c0_41 = arith.constant 0 : index
    %61 = vector.load %arg5[%c0_40, %c0_41] : memref<1x8xf32, #tpu.memory_space<vmem>>, vector<1x8xf32>
    %62 = vector.broadcast %61 : vector<1x8xf32> to vector<256x8xf32>
    %63 = arith.addf %60, %62 : vector<256x8xf32>
    %c0_42 = arith.constant 0 : index
    %c0_43 = arith.constant 0 : index
    %c0_44 = arith.constant 0 : index
    %c0_45 = arith.constant 0 : index
    %64 = vector.load %arg1[%c0_42, %c0_43, %c0_44, %c0_45] : memref<1x16x16x4xbf16, #tpu.memory_space<vmem>>, vector<1x16x16x4xbf16>
    %65 = vector.shape_cast %64 : vector<1x16x16x4xbf16> to vector<16x16x4xbf16>
    %66 = vector.shape_cast %65 : vector<16x16x4xbf16> to vector<256x4xbf16>
    %c0_46 = arith.constant 0 : index
    %c0_47 = arith.constant 0 : index
    %67 = vector.load %arg6[%c0_46, %c0_47] : memref<4x8xbf16, #tpu.memory_space<vmem>>, vector<4x8xbf16>
    %cst_48 = arith.constant dense<0.000000e+00> : vector<256x8xf32>
    %68 = tpu.matmul %66, %67, %cst_48 {dimension_numbers = #tpu.dot_dimension_numbers<[1], [0], [0], [1], [0, 0, 1, 1], [], []>} : vector<256x4xbf16>, vector<4x8xbf16>, vector<256x8xf32> -> vector<256x8xf32>
    %cst_49 = arith.constant 1.000000e-01 : f32
    %69 = vector.broadcast %cst_49 : f32 to vector<256x8xf32>
    %70 = arith.mulf %69, %63 : vector<256x8xf32>
    %71 = arith.addf %68, %70 : vector<256x8xf32>
    %72 = vector.shape_cast %71 : vector<256x8xf32> to vector<16x16x8xf32>
    %c0_50 = arith.constant 0 : index
    %c0_51 = arith.constant 0 : index
    %c0_52 = arith.constant 0 : index
    %c0_53 = arith.constant 0 : index
    %73 = vector.load %arg7[%c0_50, %c0_51, %c0_52, %c0_53] : memref<1x16x16x8xf32, #tpu.memory_space<vmem>>, vector<1x16x16x8xf32>
    %74 = vector.shape_cast %73 : vector<1x16x16x8xf32> to vector<16x16x8xf32>
    %75 = vector.shape_cast %72 : vector<16x16x8xf32> to vector<1x16x16x8xf32>
    tpu.vector_store %arg7[%c0_50, %c0_51, %c0_52, %c0_53], %75 {strides = array<i32>} : memref<1x16x16x8xf32, #tpu.memory_space<vmem>>, vector<1x16x16x8xf32>,
    return
  }
  func.func @transform_0(%arg0: i32) -> (i32, i32, i32, i32) {
    %c0_i32 = arith.constant 0 : i32
    %c0_i32_0 = arith.constant 0 : i32
    %c0_i32_1 = arith.constant 0 : i32
    %c0_i32_2 = arith.constant 0 : i32
    return %arg0, %c0_i32, %c0_i32_0, %c0_i32_1 : i32, i32, i32, i32
  }
  func.func @transform_1(%arg0: i32) -> (i32, i32) {
    %c0_i32 = arith.constant 0 : i32
    %c0_i32_0 = arith.constant 0 : i32
    %c0_i32_1 = arith.constant 0 : i32
    return %c0_i32, %c0_i32_0 : i32, i32
  }
  func.func @transform_2(%arg0: i32) -> (i32, i32) {
    %c0_i32 = arith.constant 0 : i32
    %c0_i32_0 = arith.constant 0 : i32
    %c0_i32_1 = arith.constant 0 : i32
    return %c0_i32, %c0_i32_0 : i32, i32
  }
  func.func @transform_3(%arg0: i32) -> (i32, i32) {
    %c0_i32 = arith.constant 0 : i32
    %c0_i32_0 = arith.constant 0 : i32
    %c0_i32_1 = arith.constant 0 : i32
    return %c0_i32, %c0_i32_0 : i32, i32
  }
  func.func @transform_4(%arg0: i32) -> (i32, i32) {
    %c0_i32 = arith.constant 0 : i32
    %c0_i32_0 = arith.constant 0 : i32
    %c0_i32_1 = arith.constant 0 : i32
    return %c0_i32, %c0_i32_0 : i32, i32
  }
  func.func @transform_5(%arg0: i32) -> (i32, i32) {
    %c0_i32 = arith.constant 0 : i32
    %c0_i32_0 = arith.constant 0 : i32
    %c0_i32_1 = arith.constant 0 : i32
    return %c0_i32, %c0_i32_0 : i32, i32
  }
  func.func @transform_6(%arg0: i32) -> (i32, i32, i32, i32) {
    %c0_i32 = arith.constant 0 : i32
    %c0_i32_0 = arith.constant 0 : i32
    %c0_i32_1 = arith.constant 0 : i32
    %c0_i32_2 = arith.constant 0 : i32
    return %arg0, %c0_i32, %c0_i32_0, %c0_i32_1 : i32, i32, i32, i32
  }
}

</mosaic_0001>

<bundles_post_ra>
// kernel: tpu_custom_call.1
= control target key start
LH: loop header
LB: loop body
LE: loop exit
PB: predicated region body
PF: predicated region fallthrough
CT: control target
= control target key end

     0   :  { %s4811_s21 = smov 0   ;;  %s6671_s0 = inlined_call_operand.vmem [shape: bf16[2,16,16,4], index: 0, kind: input, shape index: {}]   ;;  %s6672_s1 = inlined_call_operand.vmem [shape: bf16[36,4], index: 1, kind: input, shape index: {}]   ;;  %s6673_s2 = inlined_call_operand.vmem [shape: f32[1,4], index: 2, kind: input, shape index: {}]   ;;  %s6674_s3 = inlined_call_operand.vmem [shape: bf16[36,8], index: 3, kind: input, shape index: {}]   ;;  %s6675_s4 = inlined_call_operand.vmem [shape: f32[1,8], index: 4, kind: input, shape index: {}]   ;;  %s6676_s5 = inlined_call_operand.vmem [shape: bf16[4,8], index: 5, kind: input, shape index: {}]   ;;  %s6677_s6 = inlined_call_operand.vmem [shape: f32[2,16,16,8], index: 6, kind: output, shape index: {}]  }
   0x1 LB: > { %s4193_s22 = sadd.s32 4294967295, %s4765_s21   ;;  %p4197_p0 = scmp.ge.s32.totalorder %s4765_s21, 1  ;;  %s4765_s21 = sphi %s4811_s21, %s16_s21  }
   0x2   : > { %p212_p1 = scmp.lt.s32.totalorder %s4765_s21, 3 }
   0x4   : > { %p213_p2 = pnand %p4197_p0, %p212_p1 }
   0x5   : > { %vm254_vm0 = vcmask (!%p213_p2), 27648   ;;  %vm257_vm1 = vcmask (!%p213_p2), 24576   ;;  %v4767_v0 = vmov (!%p213_p2), 0   ;;  %p242_p3 = scmp.lt.s32.totalorder (!%p213_p2), %s4193_s22, 1  ;;  %vm1425_vm2 = vcmask (!%p213_p2), 1046528   ;;  %s4768_s27 = smov (!%p213_p2), 24  }
   0x6   : > { %216 = sbr.rel (%p213_p2) target bundleno = 1135 (0x46f), region = 44  ;;  %255 = vst.msk [vmem:[#allocation2] sm:$0xf] (!%p213_p2), %vm254_vm0, %v4767_v0  ;;  %256 = vst.msk [vmem:[#allocation2 + $0x4] sm:$0xf] (!%p213_p2), %vm254_vm0, %v4767_v0  ;;  %vm590_vm4 = vcmask (!%p213_p2), 1040384  }
   0x7   : > { %258 = vst.msk [vmem:[#allocation2 + $0x8] sm:$0x1] (!%p213_p2), %vm257_vm1, %v4767_v0  ;;  %262 = vst.msk [vmem:[#allocation2 + $0xd4] sm:$0x1] (!%p213_p2), %vm257_vm1, %v4767_v0  ;;  %vm1106_vm3 = vsmask.f32 (!%p213_p2), 7424 }
   0x8   : > { %260 = vst.msk [vmem:[#allocation2 + $0xcc] sm:$0xf] (!%p213_p2), %vm254_vm0, %v4767_v0  ;;  %261 = vst.msk [vmem:[#allocation2 + $0xd0] sm:$0xf] (!%p213_p2), %vm254_vm0, %v4767_v0  ;;  %vm591_vm5 = vsmask.f32 (!%p213_p2), 256 }
   0x9   : > { %263 = vst.msk [vmem:[#allocation3] sm:$0xf] (!%p213_p2), %vm254_vm0, %v4767_v0  ;;  %264 = vst.msk [vmem:[#allocation3 + $0x4] sm:$0xf] (!%p213_p2), %vm254_vm0, %v4767_v0  ;;  %s4769_s28 = smov (!%p213_p2), 12   ;;  %s4770_s29 = smov (!%p213_p2), 8  }
   0xa   : > { %265 = vst.msk [vmem:[#allocation3 + $0x8] sm:$0x1] (!%p213_p2), %vm257_vm1, %v4767_v0  ;;  %269 = vst.msk [vmem:[#allocation3 + $0xd4] sm:$0x1] (!%p213_p2), %vm257_vm1, %v4767_v0  ;;  %s4771_s30 = smov (!%p213_p2), 4   ;;  %s4772_s7 = smov (!%p213_p2), 28  }
   0xb   : > { %267 = vst.msk [vmem:[#allocation3 + $0xcc] sm:$0xf] (!%p213_p2), %vm254_vm0, %v4767_v0  ;;  %268 = vst.msk [vmem:[#allocation3 + $0xd0] sm:$0xf] (!%p213_p2), %vm254_vm0, %v4767_v0  ;;  %s4773_s10 = smov (!%p213_p2), 32   ;;  %s4774_s13 = smov (!%p213_p2), 16  }
   0xc   : > { %vm4855_vm6 = vmand (!%p213_p2), %vm590_vm4, %vm591_vm5  ;;  %s4775_s14 = smov (!%p213_p2), 20   ;;  %vm1900_vm7 = vcmask (!%p213_p2), 1041408   ;;  %vm1576_vm8 = vcmask (!%p213_p2), 31744   ;;  %vm1609_vm9 = vcmask (!%p213_p2), 64512   ;;  %vm1642_vm10 = vcmask (!%p213_p2), 97280  }
   0xd   : > { %s6681_s22 = smov (!%p242_p3, %s4193_s22), 1  ;;  %v4654_v4 = vld [vmem:[#allocation2] sm:$0xff]   ;;  %vm1675_vm11 = vcmask 130048   ;;  %vm1708_vm12 = vcmask 162816   ;;  %vm1741_vm13 = vcmask 195584   ;;  %vm1774_vm14 = vcmask 228352  }
   0xe   : > { %s4460_s23 = sshll.u32 %s6681_s22, 7  ;;  %v4655_v5 = vld [vmem:[#allocation2 + $0x8] ss:$0 sps:$4 sm:$0x11]   ;;  %v1426_v10 = vrot.slane %v4654_v4, 1  ;;  %v1108_v12 = vshrl.u32 %v4654_v4, 16 }
   0xf   : > { %s4837_s26 = scalar_lea.vmem %s6671_s0, %s4460_s23  ;;  %v1427_v11 = vrot.slane %v4655_v5, 1  ;;  %v1110_v13 = vshll.u32 %v4654_v4, 16  ;;  %v1115_v15 = vshll.u32 %v4655_v5, 16  ;;  %vm1807_vm15 = vcmask 261120  }
  0x10   : > { %v272_v1 = vld [vmem:[%s4837_s26 + $0x8] sm:$0xf]  ;;  %v273_v2 = vld [vmem:[%s4837_s26 + $0xc] sm:$0xf]  ;;  %v270_v3 = vld [vmem:[%s4837_s26] sm:$0xf] }
  0x11   : > { %v304_v6 = vmul.bf16 1045249613, %v272_v1  ;;  %v305_v7 = vmul.bf16 1045249613, %v273_v2  ;;  %v271_v8 = vld [vmem:[%s4837_s26 + $0x4] sm:$0xf]  ;;  %v1428_v20 = vsel %vm1425_vm2, %v1426_v10, %v1427_v11 }
  0x12   : > { %v302_v9 = vmul.bf16 1045249613, %v270_v3  ;;  %v274_v14 = vld [vmem:[%s4837_s26 + $0x10] sm:$0xf]  ;;  %v303_v18 = vmul.bf16 1045249613, %v271_v8  ;;  %1474 = vrot.lane.b32.xlu0 %v1428_v20, %s4768_s27 }
  0x13   : > { %v336_v16 = vmax.bf16 %v304_v6, %v272_v1  ;;  %v337_v17 = vmax.bf16 %v305_v7, %v273_v2  ;;  %v275_v19 = vld [vmem:[%s4837_s26 + $0x14] sm:$0xf]  ;;  %v1112_v21 = vrot.slane %v1110_v13, 1  ;;  %v306_v23 = vmul.bf16 1045249613, %v274_v14 }
  0x14   : > { %v334_v22 = vmax.bf16 %v302_v9, %v270_v3  ;;  %v276_v24 = vld [vmem:[%s4837_s26 + $0x18] sm:$0xf]  ;;  %v1117_v25 = vrot.slane %v1115_v15, 1  ;;  %v335_v27 = vmax.bf16 %v303_v18, %v271_v8  ;;  %v307_v28 = vmul.bf16 1045249613, %v275_v19 }
  0x15   : > { %v4203_v26 = vcombine.low %v336_v16, %v337_v17  ;;  %v277_v29 = vld [vmem:[%s4837_s26 + $0x1c] sm:$0xf]  ;;  %v1113_v30 = vor.u32 %v1112_v21, %v1108_v12  ;;  %v338_v31 = vmax.bf16 %v306_v23, %v274_v14  ;;  %v308_v32 = vmul.bf16 1045249613, %v276_v24  ;;  %v278_v34 = vld [vmem:[%s4837_s26 + $0x20] sm:$0xf] }
  0x16   : > { %v309_v33 = vmul.bf16 1045249613, %v277_v29  ;;  %v4202_v37 = vcombine.low %v334_v22, %v335_v27  ;;  %v339_v38 = vmax.bf16 %v307_v28, %v275_v19  ;;  %v279_v39 = vld [vmem:[%s4837_s26 + $0x24] sm:$0xf]  ;;  %v310_v43 = vmul.bf16 1045249613, %v278_v34 }
  0x17   : > { %v454_v35 = vshrl.u32 %v4203_v26, 16  ;;  %v457_v36 = vshll.u32 %v4203_v26, 16  ;;  %v1118_v40 = vsel %vm1106_vm3, %v1113_v30, %v1117_v25  ;;  %v340_v41 = vmax.bf16 %v308_v32, %v276_v24  ;;  %v280_v26 = vld [vmem:[%s4837_s26 + $0x28] sm:$0xf]  ;;  %v281_v30 = vld [vmem:[%s4837_s26 + $0x2c] sm:$0xf] }
  0x18   : > { %v341_v42 = vmax.bf16 %v309_v33, %v277_v29  ;;  %1299 = vrot.lane.b32.xlu0 %v1118_v40, %s4769_s28  ;;  %v447_v45 = vshrl.u32 %v4202_v37, 16  ;;  %v450_v46 = vshll.u32 %v4202_v37, 16  ;;  %v4204_v47 = vcombine.low %v338_v31, %v339_v38  ;;  %v284_v37 = vld [vmem:[%s4837_s26 + $0x38] sm:$0xf]  ;;  %v285_v38 = vld [vmem:[%s4837_s26 + $0x3c] sm:$0xf] }
  0x19   : > { %v456_v44 = vrot.slane %v454_v35, 7  ;;  %v311_v50 = vmul.bf16 1045249613, %v279_v39  ;;  %v342_v51 = vmax.bf16 %v310_v43, %v278_v34  ;;  %v312_v33 = vmul.bf16 1045249613, %v280_v26 }
  0x1a   : > { %v4205_v49 = vcombine.low %v340_v41, %v341_v42  ;;  %v449_v53 = vrot.slane %v447_v45, 7  ;;  %v461_v54 = vshrl.u32 %v4204_v47, 16  ;;  %v464_v55 = vshll.u32 %v4204_v47, 16  ;;  %v282_v34 = vld [vmem:[%s4837_s26 + $0x30] sm:$0xf] }
  0x1b   : > { %v459_v52 = vor.u32 %v457_v36, %v456_v44  ;;  %v343_v58 = vmax.bf16 %v311_v50, %v279_v39  ;;  %v610_v59 = vsel %vm4855_vm6, %v456_v44, 0  ;;  %v283_v35 = vld [vmem:[%s4837_s26 + $0x34] sm:$0xf]  ;;  %v313_v41 = vmul.bf16 1045249613, %v281_v30 }
  0x1c   : > { %v468_v56 = vshrl.u32 %v4205_v49, 16  ;;  %v471_v57 = vshll.u32 %v4205_v49, 16  ;;  %v452_v61 = vor.u32 %v450_v46, %v449_v53  ;;  %v463_v62 = vrot.slane %v461_v54, 7 }
  0x1d   : > { %v594_v60 = vsel %vm4855_vm6, 0, %v459_v52  ;;  %v609_v63 = vsel %vm4855_vm6, %v449_v53, 0  ;;  %v4206_v6 = vcombine.low %v342_v51, %v343_v58  ;;  %v4223_v7 = vcombine.low %v610_v59, %v610_v59 }
  0x1e   : > { %v4221_v0 = vcombine.low %v594_v60, %v594_v60  ;;  %v4222_v1 = vcombine.high %v594_v60, %v594_v60  ;;  %v470_v2 = vrot.slane %v468_v56, 7  ;;  %v4220_v3 = vcombine.low %v609_v63, %v609_v63 }
  0x1f   : > { %v593_v4 = vsel %vm4855_vm6, 0, %v452_v61  ;;  %v466_v5 = vor.u32 %v464_v55, %v463_v62  ;;  %v611_v11 = vsel %vm4855_vm6, %v463_v62, 0  ;;  %v475_v13 = vshrl.u32 %v4206_v6, 16  ;;  %807 = vst.msk [vmem:[#allocation2 + $0x20] sm:$0x1] %vm257_vm1, %v4223_v7 }
  0x20   : > { %805 = vst.msk [vmem:[#allocation2 + $0x18] sm:$0xf] %vm254_vm0, %v4221_v0  ;;  %806 = vst.msk [vmem:[#allocation2 + $0x1c] sm:$0xf] %vm254_vm0, %v4222_v1  ;;  %v4218_v8 = vcombine.low %v593_v4, %v593_v4  ;;  %v4219_v9 = vcombine.high %v593_v4, %v593_v4  ;;  %v473_v10 = vor.u32 %v471_v57, %v470_v2  ;;  %v478_v14 = vshll.u32 %v4206_v6, 16 }
  0x21   : > { %804 = vst.msk [vmem:[#allocation2 + $0x14] sm:$0x1] %vm257_vm1, %v4220_v3  ;;  %v595_v12 = vsel %vm4855_vm6, 0, %v466_v5  ;;  %v4226_v15 = vcombine.low %v611_v11, %v611_v11  ;;  %v612_v19 = vsel %vm4855_vm6, %v470_v2, 0  ;;  %v477_v22 = vrot.slane %v475_v13, 7 }
  0x22   : > { %802 = vst.msk [vmem:[#allocation2 + $0xc] sm:$0xf] %vm254_vm0, %v4218_v8  ;;  %803 = vst.msk [vmem:[#allocation2 + $0x10] sm:$0xf] %vm254_vm0, %v4219_v9  ;;  %v4224_v16 = vcombine.low %v595_v12, %v595_v12  ;;  %v4225_v17 = vcombine.high %v595_v12, %v595_v12  ;;  %v596_v18 = vsel %vm4855_vm6, 0, %v473_v10  ;;  %v4229_v23 = vcombine.low %v612_v19, %v612_v19  ;;  %v4677_v19 = vld [vmem:[%s6672_s1] sm:$0xff]  }
  0x23   : > { %v4227_v20 = vcombine.low %v596_v18, %v596_v18  ;;  %v4228_v21 = vcombine.high %v596_v18, %v596_v18  ;;  %810 = vst.msk [vmem:[#allocation2 + $0x2c] sm:$0x1] %vm257_vm1, %v4226_v15  ;;  %v480_v24 = vor.u32 %v478_v14, %v477_v22  ;;  %v613_v25 = vsel %vm4855_vm6, %v477_v22, 0  ;;  %v286_v13 = vld [vmem:[%s4837_s26 + $0x40] sm:$0xf]  ;;  %4517 = vmatprep.subr.bf16.mxu0 %v4677_v19 }
  0x24   : > { %808 = vst.msk [vmem:[#allocation2 + $0x24] sm:$0xf] %vm254_vm0, %v4224_v16  ;;  %809 = vst.msk [vmem:[#allocation2 + $0x28] sm:$0xf] %vm254_vm0, %v4225_v17  ;;  %v4232_v27 = vcombine.low %v613_v25, %v613_v25  ;;  %v314_v42 = vmul.bf16 1045249613, %v282_v34  ;;  %v344_v49 = vmax.bf16 %v312_v33, %v280_v26  ;;  %v345_v54 = vmax.bf16 %v313_v41, %v281_v30 }
  0x25   : > { %811 = vst.msk [vmem:[#allocation2 + $0x30] sm:$0xf] %vm254_vm0, %v4227_v20  ;;  %812 = vst.msk [vmem:[#allocation2 + $0x34] sm:$0xf] %vm254_vm0, %v4228_v21  ;;  %v597_v29 = vsel %vm4855_vm6, 0, %v480_v24  ;;  %4627 = vmatprep.subr.bf16.mxu1 %v4677_v19  ;;  %4518 = vmatpush3.bf16.msra.mxu0 %v4677_v19  ;;  %vm1867_vm4 = vcmask 293888  }
  0x26   : > { %813 = vst.msk [vmem:[#allocation2 + $0x38] sm:$0x1] %vm257_vm1, %v4229_v23  ;;  %v4230_v31 = vcombine.low %v597_v29, %v597_v29  ;;  %v4231_v32 = vcombine.high %v597_v29, %v597_v29  ;;  %816 = vst.msk [vmem:[#allocation2 + $0x44] sm:$0x1] %vm257_vm1, %v4232_v27  ;;  %v315_v43 = vmul.bf16 1045249613, %v283_v35  ;;  %v346_v55 = vmax.bf16 %v314_v42, %v282_v34 }
  0x27   : > { %v4890_v28 = vld [vmem:[#allocation2 + $0x18] sm:$0xff]   ;;  %v316_v44 = vmul.bf16 1045249613, %v284_v37  ;;  %v317_v45 = vmul.bf16 1045249613, %v285_v38  ;;  %v4207_v2 = vcombine.low %v344_v49, %v345_v54  ;;  %4630 = vmatpush3.bf16.msra.mxu1 %v4677_v19 }
  0x28   : > { %1026 = vrot.lane.b32.xlu1 %v4890_v28, %s4770_s29  ;;  %v4660_v39 = vld [vmem:[#allocation2 + $0x14] ss:$0 sps:$4 sm:$0x11]   ;;  %814 = vst.msk [vmem:[#allocation2 + $0x3c] sm:$0xf] %vm254_vm0, %v4230_v31  ;;  %v347_v56 = vmax.bf16 %v315_v43, %v283_v35  ;;  %v1432_v59 = vrot.slane %v4890_v28, 1 }
  0x29   : > { %v4657_v36 = vld [vmem:[#allocation2 + $0xc] sm:$0xff]   ;;  %815 = vst.msk [vmem:[#allocation2 + $0x40] sm:$0xf] %vm254_vm0, %v4231_v32  ;;  %v4662_v47 = vld [vmem:[#allocation2 + $0x20] ss:$0 sps:$4 sm:$0x11]   ;;  %v348_v57 = vmax.bf16 %v316_v44, %v284_v37  ;;  %v349_v58 = vmax.bf16 %v317_v45, %v285_v38 }
  0x2a   : > { %989 = vrot.lane.b32.xlu0 %v4657_v36, %s4771_s30  ;;  %v1429_v50 = vrot.slane %v4657_v36, 1  ;;  %v1430_v51 = vrot.slane %v4660_v39, 1  ;;  %v4913_v52 = vld [vmem:[#allocation2 + $0x2c] ss:$0 sps:$4 sm:$0x11]   ;;  %v1122_v53 = vshll.u32 %v4657_v36, 16  ;;  %v4208_v6 = vcombine.low %v346_v55, %v347_v56 }
  0x2b   : > { %v4905_v40 = vld [vmem:[#allocation2 + $0x24] sm:$0xff]   ;;  %v1433_v60 = vrot.slane %v4662_v47, 1  ;;  %v1127_v61 = vshll.u32 %v4660_v39, 16  ;;  %v1134_v62 = vshll.u32 %v4890_v28, 16  ;;  %v1120_v0 = vshrl.u32 %v4657_v36, 16 }
  0x2c   : > { %1028 = vrot.lane.b32.xlu1 %v4905_v40, %s4770_s29  ;;  %v4911_v46 = vld [vmem:[#allocation2 + $0x30] sm:$0xff]   ;;  %v1431_v63 = vsel %vm1425_vm2, %v1429_v50, %v1430_v51  ;;  %v1124_v1 = vrot.slane %v1122_v53, 1  ;;  %v1435_v4 = vrot.slane %v4905_v40, 1  ;;  %v1436_v5 = vrot.slane %v4913_v52, 1  ;;  %v287_v18 = vld [vmem:[%s4837_s26 + $0x44] sm:$0xf] }
  0x2d   : > { %v1139_v7 = vshll.u32 %v4662_v47, 16  ;;  %v4209_v8 = vcombine.low %v348_v57, %v349_v58  ;;  %v4930_v9 = vsel %vm1425_vm2, %v1432_v59, %v1433_v60  ;;  %v1129_v10 = vrot.slane %v1127_v61, 1  ;;  %v4679_v35 = vld [vmem:[%s6672_s1 + $0x8] sm:$0xff]  }
  0x2e   : > { %991 = vrot.lane.b32.xlu0 %v4890_v28, %s4771_s30  ;;  %v1132_v11 = vshrl.u32 %v4890_v28, 16  ;;  %v1136_v12 = vrot.slane %v1134_v62, 1  ;;  %v1125_v14 = vor.u32 %v1124_v1, %v1120_v0  ;;  %v1146_v15 = vshll.u32 %v4905_v40, 16  ;;  %4519 = vmatprep.subr.bf16.mxu0 %v4679_v35  ;;  %v288_v56 = vld [vmem:[%s4837_s26 + $0x48] sm:$0xf] }
  0x2f   : > { %v482_v16 = vshrl.u32 %v4207_v2, 16  ;;  %v485_v17 = vshll.u32 %v4207_v2, 16  ;;  %v4942_v20 = vsel %vm1425_vm2, %v1435_v4, %v1436_v5  ;;  %v489_v21 = vshrl.u32 %v4208_v6, 16  ;;  %4628 = vmatprep.subr.bf16.mxu1 %v4679_v35  ;;  %4520 = vmatpush3.bf16.msra.mxu0 %v4679_v35  ;;  %v289_v60 = vld [vmem:[%s4837_s26 + $0x4c] sm:$0xf] }
  0x30   : > { %993 = vrot.lane.b32.xlu1 %v4905_v40, %s4771_s30  ;;  %v4924_v3 = vld [vmem:[#allocation2 + $0x3c] sm:$0xff]   ;;  %v492_v22 = vshll.u32 %v4208_v6, 16  ;;  %v4944_v23 = vrot.slane %v1139_v7, 1  ;;  %v496_v25 = vshrl.u32 %v4209_v8, 16  ;;  %v499_v26 = vshll.u32 %v4209_v8, 16  ;;  %4631 = vmatpush3.bf16.msra.mxu1 %v4679_v35 }
  0x31   : > { %v484_v24 = vrot.slane %v482_v16, 7  ;;  %v1137_v27 = vor.u32 %v1136_v12, %v1132_v11  ;;  %v491_v28 = vrot.slane %v489_v21, 7  ;;  %v318_v29 = vmul.bf16 1045249613, %v286_v13  ;;  %v290_v1 = vld [vmem:[%s4837_s26 + $0x50] sm:$0xf] }
  0x32   : > { %1030 = vrot.lane.b32.xlu0 %v4911_v46, %s4770_s29  ;;  %v319_v30 = vmul.bf16 1045249613, %v287_v18  ;;  %v1130_v31 = vsel %vm1106_vm3, %v1125_v14, %v1129_v10  ;;  %v498_v34 = vrot.slane %v496_v25, 7  ;;  %v1144_v61 = vshrl.u32 %v4905_v40, 16  ;;  %v291_v2 = vld [vmem:[%s4837_s26 + $0x54] sm:$0xf] }
  0x33   : > { %v487_v32 = vor.u32 %v485_v17, %v484_v24  ;;  %v614_v33 = vsel %vm4855_vm6, %v484_v24, 0  ;;  %v494_v36 = vor.u32 %v492_v22, %v491_v28  ;;  %v615_v38 = vsel %vm4855_vm6, %v491_v28, 0  ;;  %v4982_v4 = vld [vmem:[#allocation2 + $0x38] ss:$0 sps:$4 sm:$0x11]  }
  0x34   : > { %995 = vrot.lane.b32.xlu1 %v4911_v46, %s4771_s30  ;;  %v4235_v37 = vcombine.low %v614_v33, %v614_v33  ;;  %v350_v39 = vmax.bf16 %v318_v29, %v286_v13  ;;  %v4238_v42 = vcombine.low %v615_v38, %v615_v38  ;;  %v501_v43 = vor.u32 %v499_v26, %v498_v34  ;;  %v4999_v24 = vld [vmem:[#allocation2 + $0x44] ss:$0 sps:$4 sm:$0x11]   ;;  %v292_v38 = vld [vmem:[%s4837_s26 + $0x58] sm:$0xf] }
  0x35   : > { %v598_v41 = vsel %vm4855_vm6, 0, %v487_v32  ;;  %v351_v44 = vmax.bf16 %v319_v30, %v287_v18  ;;  %v599_v49 = vsel %vm4855_vm6, 0, %v494_v36  ;;  %v616_v50 = vsel %vm4855_vm6, %v498_v34, 0 }
  0x36   : > { %1509 = vrot.lane.b32.xlu0 %v1431_v63, %s4772_s7  ;;  %v4233_v45 = vcombine.low %v598_v41, %v598_v41  ;;  %v4234_v47 = vcombine.high %v598_v41, %v598_v41  ;;  %819 = vst.msk [vmem:[#allocation2 + $0x50] sm:$0x1] %vm257_vm1, %v4235_v37  ;;  %v4236_v51 = vcombine.low %v599_v49, %v599_v49  ;;  %822 = vst.msk [vmem:[#allocation2 + $0x5c] sm:$0x1] %vm257_vm1, %v4238_v42 }
  0x37   : > { %v4237_v53 = vcombine.high %v599_v49, %v599_v49  ;;  %v600_v54 = vsel %vm4855_vm6, 0, %v501_v43  ;;  %v4210_v55 = vcombine.low %v350_v39, %v351_v44  ;;  %v4241_v59 = vcombine.low %v616_v50, %v616_v50  ;;  %v4680_v41 = vld [vmem:[%s6672_s1 + $0x10] ss:$0 sps:$4 sm:$0x33]  }
  0x38   : > { %1032 = vrot.lane.b32.xlu1 %v4924_v3, %s4770_s29  ;;  %817 = vst.msk [vmem:[#allocation2 + $0x48] sm:$0xf] %vm254_vm0, %v4233_v45  ;;  %818 = vst.msk [vmem:[#allocation2 + $0x4c] sm:$0xf] %vm254_vm0, %v4234_v47  ;;  %v4239_v57 = vcombine.low %v600_v54, %v600_v54  ;;  %v4240_v58 = vcombine.high %v600_v54, %v600_v54  ;;  %v1148_v62 = vrot.slane %v1146_v15, 1  ;;  %v1158_v5 = vshll.u32 %v4911_v46, 16 }
  0x39   : > { %820 = vst.msk [vmem:[#allocation2 + $0x54] sm:$0xf] %vm254_vm0, %v4236_v51  ;;  %821 = vst.msk [vmem:[#allocation2 + $0x58] sm:$0xf] %vm254_vm0, %v4237_v53  ;;  %v503_v0 = vshrl.u32 %v4210_v55, 16  ;;  %v506_v7 = vshll.u32 %v4210_v55, 16  ;;  %4633 = vmatprep.subr.msk.bf16.mxu0 %vm1900_vm7, %v4680_v41  ;;  %4634 = vmatprep.subr.msk.bf16.mxu1 %vm1900_vm7, %v4680_v41 }
  0x3a   : > { %1544 = vrot.lane.b32.xlu0 %v4930_v9, %s4773_s10  ;;  %823 = vst.msk [vmem:[#allocation2 + $0x60] sm:$0xf] %vm254_vm0, %v4239_v57  ;;  %824 = vst.msk [vmem:[#allocation2 + $0x64] sm:$0xf] %vm254_vm0, %v4240_v58  ;;  %v320_v40 = vmul.bf16 1045249613, %v288_v56  ;;  %v1149_v10 = vor.u32 %v1148_v62, %v1144_v61 }
  0x3b   : > { %825 = vst.msk [vmem:[#allocation2 + $0x68] sm:$0x1] %vm257_vm1, %v4241_v59  ;;  %v505_v6 = vrot.slane %v503_v0, 7  ;;  %v321_v8 = vmul.bf16 1045249613, %v289_v60  ;;  %v1156_v12 = vshrl.u32 %v4911_v46, 16 }
  0x3c   : > { %1476 = vrot.lane.b32.xlu1 %v1431_v63, %s4768_s27  ;;  %v1151_v63 = vshll.u32 %v4913_v52, 16  ;;  %v1142_v52 = vsel %vm1106_vm3, %v1137_v27, %v4944_v23  ;;  %v322_v15 = vmul.bf16 1045249613, %v290_v1  ;;  %v323_v16 = vmul.bf16 1045249613, %v291_v2 }
  0x3d   : > { %v617_v13 = vsel %vm4855_vm6, %v505_v6, 0  ;;  %v1160_v17 = vrot.slane %v1158_v5, 1  ;;  %v1163_v18 = vshll.u32 %v4982_v4, 16  ;;  %v508_v19 = vor.u32 %v506_v7, %v505_v6  ;;  %v293_v47 = vld [vmem:[%s4837_s26 + $0x5c] sm:$0xf] }
  0x3e   : > { %1546 = vrot.lane.b32.xlu0 %v4942_v20, %s4773_s10  ;;  %v1153_v11 = vrot.slane %v1151_v63, 1  ;;  %v4244_v14 = vcombine.low %v617_v13, %v617_v13  ;;  %v352_v21 = vmax.bf16 %v320_v40, %v288_v56  ;;  %v353_v22 = vmax.bf16 %v321_v8, %v289_v60  ;;  %v295_v5 = vld [vmem:[%s4837_s26 + $0x64] sm:$0xf] }
  0x3f   : > { %v1170_v25 = vshll.u32 %v4924_v3, 16  ;;  %v354_v26 = vmax.bf16 %v322_v15, %v290_v1  ;;  %v355_v27 = vmax.bf16 %v323_v16, %v291_v2  ;;  %v1161_v28 = vor.u32 %v1160_v17, %v1156_v12 }
  0x40   : > { %1511 = vrot.lane.b32.xlu1 %v4930_v9, %s4772_s7  ;;  %828 = vst.msk [vmem:[#allocation2 + $0x74] sm:$0x1] %vm257_vm1, %v4244_v14  ;;  %v1154_v23 = vsel %vm1106_vm3, %v1149_v10, %v1153_v11  ;;  %v1165_v29 = vrot.slane %v1163_v18, 1  ;;  %v601_v30 = vsel %vm4855_vm6, 0, %v508_v19  ;;  %v4211_v34 = vcombine.low %v352_v21, %v353_v22 }
  0x41   : > { %v4242_v32 = vcombine.low %v601_v30, %v601_v30  ;;  %v4243_v33 = vcombine.high %v601_v30, %v601_v30  ;;  %v1172_v35 = vrot.slane %v1170_v25, 1  ;;  %v1175_v36 = vshll.u32 %v4999_v24, 16  ;;  %v5070_v25 = vld [vmem:[#allocation2 + $0x50] ss:$0 sps:$4 sm:$0x11]  }
  0x42   : > { %1346 = vrot.lane.b32.xlu0 %v1130_v31, %s4774_s13  ;;  %v4212_v37 = vcombine.low %v354_v26, %v355_v27  ;;  %v5013_v39 = vsel %vm1106_vm3, %v1161_v28, %v1165_v29  ;;  %v510_v42 = vshrl.u32 %v4211_v34, 16  ;;  %v513_v45 = vshll.u32 %v4211_v34, 16 }
  0x43   : > { %826 = vst.msk [vmem:[#allocation2 + $0x6c] sm:$0xf] %vm254_vm0, %v4242_v32  ;;  %827 = vst.msk [vmem:[#allocation2 + $0x70] sm:$0xf] %vm254_vm0, %v4243_v33  ;;  %v1177_v44 = vrot.slane %v1175_v36, 1  ;;  %v1438_v53 = vrot.slane %v4911_v46, 1 }
  0x44   : > { %1301 = vrot.lane.b32.xlu1 %v1130_v31, %s4769_s28  ;;  %v1168_v31 = vshrl.u32 %v4924_v3, 16  ;;  %v512_v49 = vrot.slane %v510_v42, 7  ;;  %v517_v50 = vshrl.u32 %v4212_v37, 16  ;;  %v520_v51 = vshll.u32 %v4212_v37, 16  ;;  %v296_v36 = vld [vmem:[%s4837_s26 + $0x68] sm:$0xf] }
  0x45   : > { %v324_v54 = vmul.bf16 1045249613, %v292_v38  ;;  %v1902_v58 = vsel %vm1900_vm7, %v4680_v41, 0  ;;  %v1439_v46 = vrot.slane %v4982_v4, 1  ;;  %v325_v1 = vmul.bf16 1045249613, %v293_v47 }
  0x46   : > { %1393 = vrot.lane.b32.xlu0 %v1142_v52, %s4775_s14  ;;  %v1173_v43 = vor.u32 %v1172_v35, %v1168_v31  ;;  %v515_v55 = vor.u32 %v513_v45, %v512_v49  ;;  %v519_v56 = vrot.slane %v517_v50, 7  ;;  %v618_v57 = vsel %vm4855_vm6, %v512_v49, 0  ;;  %4522 = vmatpush3.bf16.msra.mxu0 %v1902_v58  ;;  %v294_v4 = vld [vmem:[%s4837_s26 + $0x60] sm:$0xf]  ;;  %v297_v37 = vld [vmem:[%s4837_s26 + $0x6c] sm:$0xf] }
  0x47   : > { %v4247_v60 = vcombine.low %v618_v57, %v618_v57  ;;  %v356_v61 = vmax.bf16 %v324_v54, %v292_v38  ;;  %4632 = vmatpush3.bf16.msra.mxu1 %v1902_v58  ;;  %v357_v6 = vmax.bf16 %v325_v1, %v293_v47  ;;  %v326_v11 = vmul.bf16 1045249613, %v294_v4  ;;  %v5085_v38 = vld [vmem:[#allocation2 + $0x54] sm:$0xff]   ;;  %v5091_v41 = vld [vmem:[#allocation2 + $0x5c] ss:$0 sps:$4 sm:$0x11]  }
  0x48   : > { %1348 = vrot.lane.b32.xlu1 %v1142_v52, %s4774_s13  ;;  %v5030_v59 = vsel %vm1106_vm3, %v1173_v43, %v1177_v44  ;;  %v602_v62 = vsel %vm4855_vm6, 0, %v515_v55  ;;  %v522_v63 = vor.u32 %v520_v51, %v519_v56  ;;  %v619_v0 = vsel %vm4855_vm6, %v519_v56, 0 }
  0x49   : > { %v4245_v2 = vcombine.low %v602_v62, %v602_v62  ;;  %831 = vst.msk [vmem:[#allocation2 + $0x80] sm:$0x1] %vm257_vm1, %v4247_v60  ;;  %v4246_v40 = vcombine.high %v602_v62, %v602_v62  ;;  %v4213_v10 = vcombine.low %v356_v61, %v357_v6  ;;  %v327_v12 = vmul.bf16 1045249613, %v295_v5  ;;  %v298_v62 = vld [vmem:[%s4837_s26 + $0x70] sm:$0xf] }
  0x4a   : > { %1303 = vrot.lane.b32.xlu0 %v1142_v52, %s4769_s28  ;;  %v4250_v52 = vcombine.low %v619_v0, %v619_v0  ;;  %v5053_v13 = vsel %vm1425_vm2, %v1438_v53, %v1439_v46  ;;  %v1441_v14 = vrot.slane %v4924_v3, 1  ;;  %v1442_v15 = vrot.slane %v4999_v24, 1  ;;  %v5068_v24 = vld [vmem:[#allocation2 + $0x48] sm:$0xff]  }
  0x4b   : > { %829 = vst.msk [vmem:[#allocation2 + $0x78] sm:$0xf] %vm254_vm0, %v4245_v2  ;;  %830 = vst.msk [vmem:[#allocation2 + $0x7c] sm:$0xf] %vm254_vm0, %v4246_v40  ;;  %v524_v16 = vshrl.u32 %v4213_v10, 16  ;;  %v527_v17 = vshll.u32 %v4213_v10, 16  ;;  %v358_v18 = vmax.bf16 %v326_v11, %v294_v4  ;;  %v359_v19 = vmax.bf16 %v327_v12, %v295_v5 }
  0x4c   : > { %1395 = vrot.lane.b32.xlu1 %v1154_v23, %s4775_s14  ;;  %834 = vst.msk [vmem:[#allocation2 + $0x8c] sm:$0x1] %vm257_vm1, %v4250_v52  ;;  %v1182_v26 = vshll.u32 %v5068_v24, 16  ;;  %v1180_v30 = vshrl.u32 %v5068_v24, 16  ;;  %v1187_v31 = vshll.u32 %v5070_v25, 16  ;;  %v1194_v45 = vshll.u32 %v5085_v38, 16 }
  0x4d   : > { %v526_v21 = vrot.slane %v524_v16, 7  ;;  %v4214_v22 = vcombine.low %v358_v18, %v359_v19  ;;  %v328_v49 = vmul.bf16 1045249613, %v296_v36  ;;  %v329_v50 = vmul.bf16 1045249613, %v297_v37 }
  0x4e   : > { %1350 = vrot.lane.b32.xlu0 %v1154_v23, %s4774_s13  ;;  %v1184_v32 = vrot.slane %v1182_v26, 1  ;;  %v1189_v53 = vrot.slane %v1187_v31, 1  ;;  %v1192_v46 = vshrl.u32 %v5085_v38, 16  ;;  %v1196_v60 = vrot.slane %v1194_v45, 1 }
  0x4f   : > { %v531_v27 = vshrl.u32 %v4214_v22, 16  ;;  %v534_v29 = vshll.u32 %v4214_v22, 16  ;;  %v360_v57 = vmax.bf16 %v328_v49, %v296_v36  ;;  %v361_v58 = vmax.bf16 %v329_v50, %v297_v37  ;;  %v5158_v37 = vld [vmem:[#allocation2 + $0x6c] sm:$0xff]  }
  0x50   : > { %1305 = vrot.lane.b32.xlu1 %v1154_v23, %s4769_s28  ;;  %v5064_v23 = vsel %vm1425_vm2, %v1441_v14, %v1442_v15  ;;  %v1185_v51 = vor.u32 %v1184_v32, %v1180_v30  ;;  %v330_v0 = vmul.bf16 1045249613, %v298_v62  ;;  %v1444_v11 = vrot.slane %v5068_v24, 1  ;;  %v4672_v32 = vld [vmem:[#allocation2 + $0x68] ss:$0 sps:$4 sm:$0x11]  }
  0x51   : > { %v533_v35 = vrot.slane %v531_v27, 7  ;;  %v4215_v61 = vcombine.low %v360_v57, %v361_v58  ;;  %v1447_v18 = vrot.slane %v5085_v38, 1  ;;  %v1211_v36 = vshll.u32 %v4672_v32, 16 }
  0x52   : > { %1397 = vrot.lane.b32.xlu0 %v5013_v39, %s4775_s14  ;;  %v1190_v2 = vsel %vm1106_vm3, %v1185_v51, %v1189_v53  ;;  %v362_v5 = vmax.bf16 %v330_v0, %v298_v62  ;;  %v1216_v45 = vshrl.u32 %v5158_v37, 16  ;;  %v1451_v58 = vrot.slane %v4672_v32, 1 }
  0x53   : > { %v536_v42 = vor.u32 %v534_v29, %v533_v35  ;;  %v621_v44 = vsel %vm4855_vm6, %v533_v35, 0  ;;  %v538_v4 = vshrl.u32 %v4215_v61, 16 }
  0x54   : > { %1352 = vrot.lane.b32.xlu1 %v5013_v39, %s4774_s13  ;;  %v4256_v47 = vcombine.low %v621_v44, %v621_v44  ;;  %v1213_v44 = vrot.slane %v1211_v36, 1 }
  0x55   : > { %v605_v54 = vsel %vm4855_vm6, 0, %v536_v42  ;;  %v540_v6 = vrot.slane %v538_v4, 7  ;;  %v1218_v42 = vshll.u32 %v5158_v37, 16 }
  0x56   : > { %1478 = vrot.lane.b32.xlu0 %v4930_v9, %s4768_s27  ;;  %v603_v9 = vsel %vm4855_vm6, 0, %v522_v63  ;;  %v4254_v55 = vcombine.low %v605_v54, %v605_v54  ;;  %v4255_v56 = vcombine.high %v605_v54, %v605_v54  ;;  %840 = vst.msk [vmem:[#allocation2 + $0xa4] sm:$0x1] %vm257_vm1, %v4256_v47  ;;  %v299_v63 = vld [vmem:[%s4837_s26 + $0x74] sm:$0xf] }
  0x57   : > { %v4248_v7 = vcombine.low %v603_v9, %v603_v9  ;;  %v4249_v8 = vcombine.high %v603_v9, %v603_v9  ;;  %v331_v1 = vmul.bf16 1045249613, %v299_v63  ;;  %v1197_v9 = vor.u32 %v1196_v60, %v1192_v46 }
  0x58   : > { %1399 = vrot.lane.b32.xlu1 %v5030_v59, %s4775_s14  ;;  %838 = vst.msk [vmem:[#allocation2 + $0x9c] sm:$0xf] %vm254_vm0, %v4254_v55  ;;  %839 = vst.msk [vmem:[#allocation2 + $0xa0] sm:$0xf] %vm254_vm0, %v4255_v56  ;;  %v1220_v47 = vrot.slane %v1218_v42, 1  ;;  %v1453_v60 = vrot.slane %v5158_v37, 1 }
  0x59   : > { %832 = vst.msk [vmem:[#allocation2 + $0x84] sm:$0xf] %vm254_vm0, %v4248_v7  ;;  %833 = vst.msk [vmem:[#allocation2 + $0x88] sm:$0xf] %vm254_vm0, %v4249_v8  ;;  %v363_v40 = vmax.bf16 %v331_v1, %v299_v63  ;;  %v541_v7 = vshll.u32 %v4215_v61, 16 }
  0x5a   : > { %1513 = vrot.lane.b32.xlu0 %v4942_v20, %s4772_s7  ;;  %v1221_v53 = vor.u32 %v1220_v47, %v1216_v45 }
  0x5b   : > { %v4216_v8 = vcombine.low %v362_v5, %v363_v40  ;;  %v543_v12 = vor.u32 %v541_v7, %v540_v6  ;;  %v5203_v5 = vld [vmem:[#allocation2 + $0x80] ss:$0 sps:$4 sm:$0x11]  }
  0x5c   : > { %1480 = vrot.lane.b32.xlu1 %v4942_v20, %s4768_s27  ;;  %v529_v20 = vor.u32 %v527_v17, %v526_v21 }
  0x5d   : > { %v545_v14 = vshrl.u32 %v4216_v8, 16  ;;  %v548_v15 = vshll.u32 %v4216_v8, 16  ;;  %v606_v16 = vsel %vm4855_vm6, 0, %v543_v12 }
  0x5e   : > { %1548 = vrot.lane.b32.xlu0 %v5053_v13, %s4773_s10  ;;  %v604_v28 = vsel %vm4855_vm6, 0, %v529_v20  ;;  %v4257_v19 = vcombine.low %v606_v16, %v606_v16 }
  0x5f   : > { %v4251_v33 = vcombine.low %v604_v28, %v604_v28  ;;  %v4252_v34 = vcombine.high %v604_v28, %v604_v28  ;;  %v547_v17 = vrot.slane %v545_v14, 7 }
  0x60   : > { %1515 = vrot.lane.b32.xlu1 %v5053_v13, %s4772_s7  ;;  %841 = vst.msk [vmem:[#allocation2 + $0xa8] sm:$0xf] %vm254_vm0, %v4257_v19 }
  0x61   : > { %835 = vst.msk [vmem:[#allocation2 + $0x90] sm:$0xf] %vm254_vm0, %v4251_v33  ;;  %836 = vst.msk [vmem:[#allocation2 + $0x94] sm:$0xf] %vm254_vm0, %v4252_v34  ;;  %v550_v20 = vor.u32 %v548_v15, %v547_v17  ;;  %v623_v31 = vsel %vm4855_vm6, %v547_v17, 0 }
  0x62   : > { %1550 = vrot.lane.b32.xlu0 %v5064_v23, %s4773_s10  ;;  %v4262_v33 = vcombine.low %v623_v31, %v623_v31 }
  0x63   : > { %v607_v27 = vsel %vm4855_vm6, 0, %v550_v20  ;;  %v301_v20 = vld [vmem:[%s4837_s26 + $0x7c] sm:$0xf] }
  0x64   : > { %997 = vrot.lane.b32.xlu1 %v4924_v3, %s4771_s30  ;;  %v620_v3 = vsel %vm4855_vm6, %v526_v21, 0  ;;  %v622_v21 = vsel %vm4855_vm6, %v540_v6, 0  ;;  %v4260_v28 = vcombine.low %v607_v27, %v607_v27  ;;  %v4261_v29 = vcombine.high %v607_v27, %v607_v27  ;;  %846 = vst.msk [vmem:[#allocation2 + $0xbc] sm:$0x1] %vm257_vm1, %v4262_v33  ;;  %v5214_v6 = vld [vmem:[#allocation2 + $0x84] sm:$0xff]  }
  0x65   : > { %v4253_v43 = vcombine.low %v620_v3, %v620_v3  ;;  %v4259_v26 = vcombine.low %v622_v21, %v622_v21  ;;  %v1242_v12 = vshll.u32 %v5214_v6, 16 }
  0x66   : > { %1034 = vrot.lane.b32.xlu0 %v5068_v24, %s4770_s29  ;;  %844 = vst.msk [vmem:[#allocation2 + $0xb4] sm:$0xf] %vm254_vm0, %v4260_v28  ;;  %845 = vst.msk [vmem:[#allocation2 + $0xb8] sm:$0xf] %vm254_vm0, %v4261_v29  ;;  %v333_v28 = vmul.bf16 1045249613, %v301_v20 }
  0x67   : > { %837 = vst.msk [vmem:[#allocation2 + $0x98] sm:$0x1] %vm257_vm1, %v4253_v43  ;;  %843 = vst.msk [vmem:[#allocation2 + $0xb0] sm:$0x1] %vm257_vm1, %v4259_v26  ;;  %v1244_v19 = vrot.slane %v1242_v12, 1  ;;  %v4748_v29 = vld [vmem:[#allocation2] sm:$0xff]  }
  0x68   : > { %999 = vrot.lane.b32.xlu1 %v5068_v24, %s4771_s30 }
  0x6a   : > { %1307 = vrot.lane.b32.xlu0 %v5013_v39, %s4769_s28  ;;  %v1199_v39 = vshll.u32 %v5091_v41, 16 }
  0x6c   : > { %1036 = vrot.lane.b32.xlu1 %v5085_v38, %s4770_s29  ;;  %v1201_v52 = vrot.slane %v1199_v39, 1 }
  0x6e   : > { %1354 = vrot.lane.b32.xlu0 %v5030_v59, %s4774_s13  ;;  %v1202_v10 = vsel %vm1106_vm3, %v1197_v9, %v1201_v52 }
  0x70   : > { %1309 = vrot.lane.b32.xlu1 %v5030_v59, %s4769_s28  ;;  %v1445_v59 = vrot.slane %v5070_v25, 1  ;;  %v1448_v25 = vrot.slane %v5091_v41, 1  ;;  %v4673_v41 = vld [vmem:[#allocation2 + $0x74] ss:$0 sps:$4 sm:$0x11]  }
  0x71   : > { %v1223_v49 = vshll.u32 %v4673_v41, 16  ;;  %v1454_v61 = vrot.slane %v4673_v41, 1 }
  0x72   : > { %1401 = vrot.lane.b32.xlu0 %v1190_v2, %s4775_s14  ;;  %v1446_v22 = vsel %vm1425_vm2, %v1444_v11, %v1445_v59  ;;  %v1449_v30 = vsel %vm1425_vm2, %v1447_v18, %v1448_v25  ;;  %v5222_v59 = vld [vmem:[#allocation2 + $0x8c] ss:$0 sps:$4 sm:$0x11]   ;;  %v1240_v18 = vshrl.u32 %v5214_v6, 16  ;;  %v300_v25 = vld [vmem:[%s4837_s26 + $0x78] sm:$0xf] }
  0x73   : > { %v1225_v54 = vrot.slane %v1223_v49, 1  ;;  %v5191_v0 = vsel %vm1425_vm2, %v1453_v60, %v1454_v61  ;;  %v332_v27 = vmul.bf16 1045249613, %v300_v25  ;;  %v1457_v49 = vrot.slane %v5203_v5, 1 }
  0x74   : > { %1356 = vrot.lane.b32.xlu1 %v1190_v2, %s4774_s13  ;;  %v1245_v31 = vor.u32 %v1244_v19, %v1240_v18  ;;  %v5298_v19 = vld [vmem:[#allocation2 + $0x90] sm:$0xff]  }
  0x75   : > { %v1226_v55 = vsel %vm1106_vm3, %v1221_v53, %v1225_v54 }
  0x76   : > { %1482 = vrot.lane.b32.xlu0 %v5053_v13, %s4768_s27  ;;  %v4258_v13 = vcombine.high %v606_v16, %v606_v16 }
  0x78   : > { %1403 = vrot.lane.b32.xlu1 %v1202_v10, %s4775_s14  ;;  %842 = vst.msk [vmem:[#allocation2 + $0xac] sm:$0xf] %vm254_vm0, %v4258_v13  ;;  %v1247_v13 = vshll.u32 %v5222_v59, 16 }
  0x7a   : > { %1517 = vrot.lane.b32.xlu0 %v5064_v23, %s4772_s7  ;;  %v1249_v32 = vrot.slane %v1247_v13, 1 }
  0x7c   : > { %1484 = vrot.lane.b32.xlu1 %v5064_v23, %s4768_s27  ;;  %v5146_v23 = vld [vmem:[#allocation2 + $0x60] sm:$0xff]   ;;  %v5250_v42 = vsel %vm1106_vm3, %v1245_v31, %v1249_v32  ;;  %v1252_v31 = vshrl.u32 %v5298_v19, 16 }
  0x7d   : > { %v1206_v34 = vshll.u32 %v5146_v23, 16  ;;  %v1204_v35 = vshrl.u32 %v5146_v23, 16  ;;  %v1450_v57 = vrot.slane %v5146_v23, 1 }
  0x7e   : > { %1552 = vrot.lane.b32.xlu0 %v1446_v22, %s4773_s10 }
  0x7f   : > { %v1208_v3 = vrot.slane %v1206_v34, 1  ;;  %v5182_v46 = vsel %vm1425_vm2, %v1450_v57, %v1451_v58  ;;  %v364_v34 = vmax.bf16 %v332_v27, %v300_v25  ;;  %v4749_v57 = vld [vmem:[#allocation2 + $0xc] sm:$0xff]  }
  0x80   : > { %1519 = vrot.lane.b32.xlu1 %v1446_v22, %s4772_s7 }
  0x81   : > { %v1209_v43 = vor.u32 %v1208_v3, %v1204_v35  ;;  %v365_v35 = vmax.bf16 %v333_v28, %v301_v20  ;;  %v5305_v20 = vld [vmem:[#allocation2 + $0x98] ss:$0 sps:$4 sm:$0x11]  }
  0x82   : > { %1554 = vrot.lane.b32.xlu0 %v1449_v30, %s4773_s10 }
  0x83   : > { %v1214_v50 = vsel %vm1106_vm3, %v1209_v43, %v1213_v44  ;;  %v4217_v41 = vcombine.low %v364_v34, %v365_v35  ;;  %v4750_v34 = vld [vmem:[#allocation2 + $0x18] sm:$0xff]  }
  0x84   : > { %1001 = vrot.lane.b32.xlu1 %v5085_v38, %s4771_s30  ;;  %v5170_v51 = vpop.permute.xlu0 %1474 }
  0x85   : > { %v552_v44 = vshrl.u32 %v4217_v41, 16 }
  0x86   : > { %1038 = vrot.lane.b32.xlu0 %v5146_v23, %s4770_s29 }
  0x87   : > { %v554_v54 = vrot.slane %v552_v44, 7 }
  0x88   : > { %1003 = vrot.lane.b32.xlu1 %v5146_v23, %s4771_s30 }
  0x89   : > { %v624_v27 = vsel %vm4855_vm6, %v554_v54, 0 }
  0x8a   : > { %1311 = vrot.lane.b32.xlu0 %v1190_v2, %s4769_s28  ;;  %v5176_v56 = vpop.permute.xlu0 %1299  ;;  %v5197_v2 = vld [vmem:[#allocation2 + $0x78] sm:$0xff]  }
  0x8b   : > { %v1230_v40 = vshll.u32 %v5197_v2, 16  ;;  %v1228_v7 = vshrl.u32 %v5197_v2, 16  ;;  %v1456_v47 = vrot.slane %v5197_v2, 1 }
  0x8c   : > { %1040 = vrot.lane.b32.xlu1 %v5158_v37, %s4770_s29 }
  0x8d   : > { %v1232_v8 = vrot.slane %v1230_v40, 1 }
  0x8e   : > { %1358 = vrot.lane.b32.xlu0 %v1202_v10, %s4774_s13 }
  0x8f   : > { %v1233_v15 = vor.u32 %v1232_v8, %v1228_v7 }
  0x90   : > { %1313 = vrot.lane.b32.xlu1 %v1202_v10, %s4769_s28  ;;  %v1235_v10 = vshll.u32 %v5203_v5, 16  ;;  %v1460_v5 = vrot.slane %v5222_v59, 1 }
  0x92   : > { %1405 = vrot.lane.b32.xlu0 %v1214_v50, %s4775_s14  ;;  %v1237_v16 = vrot.slane %v1235_v10, 1 }
  0x94   : > { %1360 = vrot.lane.b32.xlu1 %v1214_v50, %s4774_s13 }
  0x96   : > { %1486 = vrot.lane.b32.xlu0 %v1446_v22, %s4768_s27  ;;  %v5236_v22 = vsel %vm1106_vm3, %v1233_v15, %v1237_v16 }
  0x98   : > { %1407 = vrot.lane.b32.xlu1 %v1226_v55, %s4775_s14 }
  0x9a   : > { %1521 = vrot.lane.b32.xlu0 %v1449_v30, %s4772_s7  ;;  %v1027_v39 = vpop.permute.xlu1 %1026 }
  0x9c   : > { %v990_v62 = vpop.permute.xlu0 %989  ;;  %1488 = vrot.lane.b32.xlu1 %v1449_v30, %s4768_s27 }
  0x9d   : > { %v1578_v30 = vsel %vm1576_vm8, %v4748_v29, %v990_v62  ;;  %v5271_v62 = vsel %vm1425_vm2, %v1456_v47, %v1457_v49  ;;  %v4265_v29 = vcombine.low %v624_v27, %v624_v27 }
  0x9e   : > { %1556 = vrot.lane.b32.xlu0 %v5182_v46, %s4773_s10  ;;  %v5188_v63 = vpop.permute.xlu1 %1028  ;;  %v1611_v36 = vsel %vm1609_vm9, %v1578_v30, %v1027_v39 }
  0x9f   : > { %v1644_v45 = vsel %vm1642_vm10, %v1611_v36, %v5176_v56  ;;  %849 = vst.msk [vmem:[#allocation2 + $0xc8] sm:$0x1] %vm257_vm1, %v4265_v29 }
  0xa0   : > { %v5193_v1 = vpop.permute.xlu0 %991  ;;  %1523 = vrot.lane.b32.xlu1 %v5182_v46, %s4772_s7 }
  0xa1   : > { %v1580_v58 = vsel %vm1576_vm8, %v4749_v57, %v5193_v1  ;;  %v1459_v1 = vrot.slane %v5214_v6, 1 }
  0xa2   : > { %1558 = vrot.lane.b32.xlu0 %v5191_v0, %s4773_s10  ;;  %v5201_v4 = vpop.permute.xlu1 %993  ;;  %v1613_v40 = vsel %vm1609_vm9, %v1580_v58, %v5188_v63 }
  0xa3   : > { %v5289_v16 = vsel %vm1425_vm2, %v1459_v1, %v1460_v5  ;;  %v1582_v35 = vsel %vm1576_vm8, %v4750_v34, %v5201_v4 }
  0xa4   : > { %v5206_v9 = vpop.permute.xlu0 %1030  ;;  %1005 = vrot.lane.b32.xlu1 %v5158_v37, %s4771_s30 }
  0xa5   : > { %v1615_v44 = vsel %vm1609_vm9, %v1582_v35, %v5206_v9 }
  0xa6   : > { %1042 = vrot.lane.b32.xlu0 %v5197_v2, %s4770_s29  ;;  %v5212_v52 = vpop.permute.xlu1 %995 }
  0xa8   : > { %v5218_v11 = vpop.permute.xlu0 %1509  ;;  %1007 = vrot.lane.b32.xlu1 %v5197_v2, %s4771_s30 }
  0xaa   : > { %1315 = vrot.lane.b32.xlu0 %v1214_v50, %s4769_s28  ;;  %v5226_v14 = vpop.permute.xlu1 %1032 }
  0xac   : > { %v1545_v17 = vpop.permute.xlu0 %1544  ;;  %1044 = vrot.lane.b32.xlu1 %v5214_v6, %s4770_s29 }
  0xae   : > { %1362 = vrot.lane.b32.xlu0 %v1226_v55, %s4774_s13  ;;  %v5233_v21 = vpop.permute.xlu1 %1476 }
  0xb0   : > { %v5240_v26 = vpop.permute.xlu0 %1546  ;;  %1317 = vrot.lane.b32.xlu1 %v1226_v55, %s4769_s28  ;;  %v555_v55 = vshll.u32 %v4217_v41, 16 }
  0xb2   : > { %1409 = vrot.lane.b32.xlu0 %v5236_v22, %s4775_s14  ;;  %v1512_v33 = vpop.permute.xlu1 %1511  ;;  %v557_v60 = vor.u32 %v555_v55, %v554_v54 }
  0xb4   : > { %v1347_v3 = vpop.permute.xlu0 %1346  ;;  %1364 = vrot.lane.b32.xlu1 %v5236_v22, %s4774_s13  ;;  %v608_v8 = vsel %vm4855_vm6, 0, %v557_v60 }
  0xb5   : > { %v1677_v50 = vsel %vm1675_vm11, %v1644_v45, %v1347_v3  ;;  %v4264_v12 = vcombine.high %v608_v8, %v608_v8  ;;  %v4684_v3 = vld [vmem:[#allocation2 + $0xa4] ss:$0 sps:$4 sm:$0x11]  }
  0xb6   : > { %1490 = vrot.lane.b32.xlu0 %v5182_v46, %s4768_s27  ;;  %v1302_v43 = vpop.permute.xlu1 %1301  ;;  %v1271_v4 = vshll.u32 %v4684_v3, 16 }
  0xb7   : > { %v1646_v10 = vsel %vm1642_vm10, %v1613_v40, %v1302_v43  ;;  %848 = vst.msk [vmem:[#allocation2 + $0xc4] sm:$0xf] %vm254_vm0, %v4264_v12 }
  0xb8   : > { %v1394_v53 = vpop.permute.xlu0 %1393  ;;  %1411 = vrot.lane.b32.xlu1 %v5250_v42, %s4775_s14 }
  0xb9   : > { %v1710_v56 = vsel %vm1708_vm12, %v1677_v50, %v1394_v53  ;;  %v4751_v53 = vld [vmem:[#allocation2 + $0x24] sm:$0xff]  }
  0xba   : > { %v1743_v39 = vsel %vm1741_vm13, %v1710_v56, %v5170_v51  ;;  %1525 = vrot.lane.b32.xlu0 %v5191_v0, %s4772_s7  ;;  %v1349_v46 = vpop.permute.xlu1 %1348  ;;  %v1584_v54 = vsel %vm1576_vm8, %v4751_v53, %v5212_v52 }
  0xbb   : > { %v1776_v61 = vsel %vm1774_vm14, %v1743_v39, %v5218_v11  ;;  %v4263_v11 = vcombine.low %v608_v8, %v608_v8  ;;  %v1679_v59 = vsel %vm1675_vm11, %v1646_v10, %v1349_v46  ;;  %v1617_v9 = vsel %vm1609_vm9, %v1584_v54, %v5226_v14 }
  0xbc   : > { %v1304_v51 = vpop.permute.xlu0 %1303  ;;  %v1809_v7 = vsel %vm1807_vm15, %v1776_v61, %v1545_v17  ;;  %1492 = vrot.lane.b32.xlu1 %v5191_v0, %s4768_s27 }
  0xbd   : > { %4523 = vmatprep.mubr.msk.bf16.mxu0 %vm1867_vm4, %v1809_v7  ;;  %847 = vst.msk [vmem:[#allocation2 + $0xc0] sm:$0xf] %vm254_vm0, %v4263_v11  ;;  %v1648_v49 = vsel %vm1642_vm10, %v1615_v44, %v1304_v51  ;;  %v1273_v51 = vrot.slane %v1271_v4, 1  ;;  %v4688_v44 = vld [vmem:[#allocation2 + $0xbc] ss:$0 sps:$4 sm:$0x11]  }
  0xbe   : > { %1560 = vrot.lane.b32.xlu0 %v5271_v62, %s4773_s10  ;;  %v1396_v63 = vpop.permute.xlu1 %1395 }
  0xbf   : > { %v1712_v15 = vsel %vm1708_vm12, %v1679_v59, %v1396_v63  ;;  %v1462_v63 = vrot.slane %v5298_v19, 1 }
  0xc0   : > { %v1351_v0 = vpop.permute.xlu0 %1350  ;;  %v1745_v17 = vsel %vm1741_vm13, %v1712_v15, %v5233_v21  ;;  %1527 = vrot.lane.b32.xlu1 %v5271_v62, %s4772_s7  ;;  %v1254_v21 = vshll.u32 %v5298_v19, 16  ;;  %v1463_v15 = vrot.slane %v5305_v20, 1 }
  0xc1   : > { %v1778_v18 = vsel %vm1774_vm14, %v1745_v17, %v1512_v33  ;;  %v1259_v33 = vshll.u32 %v5305_v20, 16  ;;  %v1681_v55 = vsel %vm1675_vm11, %v1648_v49, %v1351_v0 }
  0xc2   : > { %1562 = vrot.lane.b32.xlu0 %v5289_v16, %s4773_s10  ;;  %v1306_v13 = vpop.permute.xlu1 %1305  ;;  %v1811_v25 = vsel %vm1807_vm15, %v1778_v18, %v5240_v26  ;;  %v5315_v26 = vld [vmem:[#allocation2 + $0x9c] sm:$0xff]   ;;  %v1256_v32 = vrot.slane %v1254_v21, 1  ;;  %v5368_v18 = vsel %vm1425_vm2, %v1462_v63, %v1463_v15 }
  0xc3   : > { %4524 = vmatmul.mubr.msk.bf16.vlgmr.msra.gmra.mrb[0].mxu0 %vm1867_vm4, %v1811_v25  ;;  %v1266_v41 = vshll.u32 %v5315_v26, 16  ;;  %v1261_v47 = vrot.slane %v1259_v33, 1  ;;  %v1650_v39 = vsel %vm1642_vm10, %v1617_v9, %v1306_v13  ;;  %v1465_v13 = vrot.slane %v5315_v26, 1  ;;  %v5391_v33 = vld [vmem:[#allocation2 + $0xb4] sm:$0xff]  }
  0xc4   : > { %v1398_v28 = vpop.permute.xlu0 %1397  ;;  %1009 = vrot.lane.b32.xlu1 %v5214_v6, %s4771_s30  ;;  %v1257_v45 = vor.u32 %v1256_v32, %v1252_v31  ;;  %v1466_v25 = vrot.slane %v4684_v3, 1  ;;  %v4752_v3 = vld [vmem:[#allocation2 + $0x30] sm:$0xff]  }
  0xc5   : > { %v1268_v57 = vrot.slane %v1266_v41, 1  ;;  %v1714_v58 = vsel %vm1708_vm12, %v1681_v55, %v1398_v28  ;;  %v5380_v28 = vld [vmem:[#allocation2 + $0xa8] sm:$0xff]   ;;  %v1288_v55 = vshrl.u32 %v5391_v33, 16 }
  0xc6   : > { %1046 = vrot.lane.b32.xlu0 %v5298_v19, %s4770_s29  ;;  %v1353_v30 = vpop.permute.xlu1 %1352  ;;  %v1262_v52 = vsel %vm1106_vm3, %v1257_v45, %v1261_v47  ;;  %v5376_v21 = vsel %vm1425_vm2, %v1465_v13, %v1466_v25  ;;  %v1276_v34 = vshrl.u32 %v5380_v28, 16  ;;  %v1290_v45 = vshll.u32 %v5391_v33, 16 }
  0xc7   : > { %v1683_v60 = vsel %vm1675_vm11, %v1650_v39, %v1353_v30  ;;  %v5384_v30 = vld [vmem:[#allocation2 + $0xb0] ss:$0 sps:$4 sm:$0x11]  }
  0xc8   : > { %v1479_v36 = vpop.permute.xlu0 %1478  ;;  %1011 = vrot.lane.b32.xlu1 %v5298_v19, %s4771_s30  ;;  %v1469_v13 = vrot.slane %v5384_v30, 1 }
  0xc9   : > { %v1747_v46 = vsel %vm1741_vm13, %v1714_v58, %v1479_v36  ;;  %v1283_v36 = vshll.u32 %v5384_v30, 16  ;;  %v1292_v58 = vrot.slane %v1290_v45, 1 }
  0xca   : > { %1319 = vrot.lane.b32.xlu0 %v5236_v22, %s4769_s28  ;;  %v1400_v43 = vpop.permute.xlu1 %1399  ;;  %v1264_v22 = vshrl.u32 %v5315_v26, 16 }
  0xcb   : > { %v1716_v14 = vsel %vm1708_vm12, %v1683_v60, %v1400_v43  ;;  %v1285_v4 = vrot.slane %v1283_v36, 1 }
  0xcc   : > { %v1514_v50 = vpop.permute.xlu0 %1513  ;;  %1048 = vrot.lane.b32.xlu1 %v5315_v26, %s4770_s29  ;;  %v1269_v40 = vor.u32 %v1268_v57, %v1264_v22  ;;  %v4753_v22 = vld [vmem:[#allocation2 + $0x3c] sm:$0xff]  }
  0xcd   : > { %v1780_v61 = vsel %vm1774_vm14, %v1747_v46, %v1514_v50 }
  0xce   : > { %1366 = vrot.lane.b32.xlu0 %v5250_v42, %s4774_s13  ;;  %v1481_v56 = vpop.permute.xlu1 %1480  ;;  %v5356_v12 = vsel %vm1106_vm3, %v1269_v40, %v1273_v51 }
  0xcf   : > { %v1749_v7 = vsel %vm1741_vm13, %v1716_v14, %v1481_v56  ;;  %v1295_v56 = vshll.u32 %v4688_v44, 16 }
  0xd0   : > { %v1549_v1 = vpop.permute.xlu0 %1548  ;;  %1321 = vrot.lane.b32.xlu1 %v5250_v42, %s4769_s28 }
  0xd1   : > { %v1813_v5 = vsel %vm1807_vm15, %v1780_v61, %v1549_v1 }
  0xd2   : > { %4527 = vmatprep.mubr.msk.bf16.mxu0 %vm1867_vm4, %v1813_v5  ;;  %1413 = vrot.lane.b32.xlu0 %v1262_v52, %s4775_s14  ;;  %v1516_v8 = vpop.permute.xlu1 %1515 }
  0xd3   : > { %v1782_v10 = vsel %vm1774_vm14, %v1749_v7, %v1516_v8  ;;  %v1293_v8 = vor.u32 %v1292_v58, %v1288_v55 }
  0xd4   : > { %v1551_v11 = vpop.permute.xlu0 %1550  ;;  %1368 = vrot.lane.b32.xlu1 %v1262_v52, %s4774_s13 }
  0xd5   : > { %v1815_v42 = vsel %vm1807_vm15, %v1782_v10, %v1551_v11  ;;  %v1297_v10 = vrot.slane %v1295_v56, 1 }
  0xd6   : > { %4528 = vmatmul.mubr.msk.bf16.gmra.mrb[4].mxu0 %vm1867_vm4, %v1815_v42  ;;  %1494 = vrot.lane.b32.xlu0 %v5271_v62, %s4768_s27  ;;  %v998_v59 = vpop.permute.xlu1 %997 }
  0xd7   : > { %v1586_v41 = vsel %vm1576_vm8, %v4752_v3, %v998_v59  ;;  %v1298_v15 = vsel %vm1106_vm3, %v1293_v8, %v1297_v10 }
  0xd8   : > { %v1035_v0 = vpop.permute.xlu0 %1034  ;;  %1415 = vrot.lane.b32.xlu1 %v5356_v12, %s4775_s14 }
  0xd9   : > { %v1619_v49 = vsel %vm1609_vm9, %v1586_v41, %v1035_v0  ;;  %v5459_v41 = vld [vmem:[#allocation2 + $0xcc] sm:$0xff]  }
  0xda   : > { %1529 = vrot.lane.b32.xlu0 %v5289_v16, %s4772_s7  ;;  %v1000_v17 = vpop.permute.xlu1 %999 }
  0xdb   : > { %v1588_v57 = vsel %vm1576_vm8, %v4753_v22, %v1000_v17  ;;  %v1468_v17 = vrot.slane %v5380_v28, 1 }
  0xdc   : > { %v1308_v62 = vpop.permute.xlu0 %1307  ;;  %1496 = vrot.lane.b32.xlu1 %v5289_v16, %s4768_s27  ;;  %v1278_v16 = vshll.u32 %v5380_v28, 16 }
  0xdd   : > { %v1652_v53 = vsel %vm1642_vm10, %v1619_v49, %v1308_v62 }
  0xde   : > { %1564 = vrot.lane.b32.xlu0 %v5368_v18, %s4773_s10  ;;  %v1037_v20 = vpop.permute.xlu1 %1036  ;;  %v1280_v35 = vrot.slane %v1278_v16, 1 }
  0xdf   : > { %v1621_v39 = vsel %vm1609_vm9, %v1588_v57, %v1037_v20  ;;  %v5436_v20 = vsel %vm1425_vm2, %v1468_v17, %v1469_v13 }
  0xe0   : > { %v1355_v27 = vpop.permute.xlu0 %1354  ;;  %1531 = vrot.lane.b32.xlu1 %v5368_v18, %s4772_s7  ;;  %v1281_v50 = vor.u32 %v1280_v35, %v1276_v34  ;;  %v5450_v34 = vld [vmem:[#allocation2 + $0xc0] sm:$0xff]  }
  0xe1   : > { %v1685_v9 = vsel %vm1675_vm11, %v1652_v53, %v1355_v27  ;;  %v1471_v27 = vrot.slane %v5391_v33, 1  ;;  %v1337_v36 = vshll.u32 %v5450_v34, 16  ;;  %v1335_v45 = vshrl.u32 %v5450_v34, 16 }
  0xe2   : > { %1566 = vrot.lane.b32.xlu0 %v5376_v21, %s4773_s10  ;;  %v1310_v29 = vpop.permute.xlu1 %1309  ;;  %v1286_v1 = vsel %vm1106_vm3, %v1281_v50, %v1285_v4  ;;  %v4692_v50 = vld [vmem:[#allocation2 + $0xd4] ss:$0 sps:$4 sm:$0x11]   ;;  %v1384_v4 = vshll.u32 %v5459_v41, 16 }
  0xe3   : > { %v1654_v60 = vsel %vm1642_vm10, %v1621_v39, %v1310_v29  ;;  %v1472_v29 = vrot.slane %v4688_v44, 1 }
  0xe4   : > { %v1402_v31 = vpop.permute.xlu0 %1401  ;;  %1013 = vrot.lane.b32.xlu1 %v5315_v26, %s4771_s30  ;;  %v1386_v39 = vrot.slane %v1384_v4, 1 }
  0xe5   : > { %v1718_v46 = vsel %vm1708_vm12, %v1685_v9, %v1402_v31  ;;  %v5444_v30 = vsel %vm1425_vm2, %v1471_v27, %v1472_v29  ;;  %v1382_v9 = vshrl.u32 %v5459_v41, 16 }
  0xe6   : > { %v1357_v32 = vpop.permute.xlu1 %1356  ;;  %1050 = vrot.lane.b32.xlu0 %v5380_v28, %s4770_s29 }
  0xe7   : > { %v1687_v14 = vsel %vm1675_vm11, %v1654_v60, %v1357_v32  ;;  %v1387_v10 = vor.u32 %v1386_v39, %v1382_v9 }
  0xe8   : > { %v1483_v43 = vpop.permute.xlu0 %1482  ;;  %1015 = vrot.lane.b32.xlu1 %v5380_v28, %s4771_s30 }
  0xe9   : > { %v1751_v61 = vsel %vm1741_vm13, %v1718_v46, %v1483_v43  ;;  %v1389_v46 = vshll.u32 %v4692_v50, 16 }
  0xea   : > { %v1404_v47 = vpop.permute.xlu1 %1403  ;;  %1323 = vrot.lane.b32.xlu0 %v1262_v52, %s4769_s28 }
  0xeb   : > { %v1720_v51 = vsel %vm1708_vm12, %v1687_v14, %v1404_v47  ;;  %v1339_v47 = vrot.slane %v1337_v36, 1  ;;  %v4693_v36 = vld [vmem:[#allocation3] sm:$0xff]  }
  0xec   : > { %v1518_v54 = vpop.permute.xlu0 %1517  ;;  %1052 = vrot.lane.b32.xlu1 %v5391_v33, %s4770_s29  ;;  %v3120_v39 = vrot.slane %v4693_v36, 1 }
  0xed   : > { %v1784_v5 = vsel %vm1774_vm14, %v1751_v61, %v1518_v54  ;;  %v1340_v22 = vor.u32 %v1339_v47, %v1335_v45  ;;  %v2803_v45 = vshrl.u32 %v4693_v36, 16 }
  0xee   : > { %v1485_v52 = vpop.permute.xlu1 %1484  ;;  %1370 = vrot.lane.b32.xlu0 %v5356_v12, %s4774_s13 }
  0xef   : > { %v1753_v11 = vsel %vm1741_vm13, %v1720_v51, %v1485_v52 }
  0xf0   : > { %v1553_v40 = vpop.permute.xlu0 %1552  ;;  %1325 = vrot.lane.b32.xlu1 %v5356_v12, %s4769_s28 }
  0xf1   : > { %v1817_v7 = vsel %vm1807_vm15, %v1784_v5, %v1553_v40 }
  0xf2   : > { %4531 = vmatprep.mubr.msk.bf16.mxu0 %vm1867_vm4, %v1817_v7  ;;  %v1520_v42 = vpop.permute.xlu1 %1519  ;;  %1417 = vrot.lane.b32.xlu0 %v1286_v1, %s4775_s14 }
  0xf3   : > { %v1786_v59 = vsel %vm1774_vm14, %v1753_v11, %v1520_v42  ;;  %v1391_v11 = vrot.slane %v1389_v46, 1 }
  0xf4   : > { %v1555_v63 = vpop.permute.xlu0 %1554  ;;  %1372 = vrot.lane.b32.xlu1 %v1286_v1, %s4774_s13 }
  0xf5   : > { %v1819_v12 = vsel %vm1807_vm15, %v1786_v59, %v1555_v63 }
  0xf6   : > { %4532 = vmatmul.mubr.msk.bf16.gmra.mrb[8].mxu0 %vm1867_vm4, %v1819_v12  ;;  %v1002_v0 = vpop.permute.xlu1 %1001  ;;  %1498 = vrot.lane.b32.xlu0 %v5368_v18, %s4768_s27 }
  0xf7   : > { %v1590_v43 = vsel %vm1576_vm8, %v5068_v24, %v1002_v0  ;;  %v1392_v0 = vsel %vm1106_vm3, %v1387_v10, %v1391_v11 }
  0xf8   : > { %v1039_v25 = vpop.permute.xlu0 %1038  ;;  %1419 = vrot.lane.b32.xlu1 %v1298_v15, %s4775_s14 }
  0xf9   : > { %v1623_v54 = vsel %vm1609_vm9, %v1590_v43, %v1039_v25  ;;  %v1506_v25 = vrot.slane %v5450_v34, 1  ;;  %v2805_v43 = vshll.u32 %v4693_v36, 16 }
  0xfa   : > { %v1004_v62 = vpop.permute.xlu1 %1003  ;;  %1533 = vrot.lane.b32.xlu0 %v5376_v21, %s4772_s7 }
  0xfb   : > { %v1592_v58 = vsel %vm1576_vm8, %v5085_v38, %v1004_v62  ;;  %v2807_v47 = vrot.slane %v2805_v43, 1 }
  0xfc   : > { %v1312_v16 = vpop.permute.xlu0 %1311  ;;  %1500 = vrot.lane.b32.xlu1 %v5376_v21, %s4768_s27  ;;  %v5454_v21 = vld [vmem:[#allocation2 + $0xc8] ss:$0 sps:$4 sm:$0x11]  }
  0xfd   : > { %v1342_v49 = vshll.u32 %v5454_v21, 16  ;;  %v1656_v55 = vsel %vm1642_vm10, %v1623_v54, %v1312_v16  ;;  %v1507_v62 = vrot.slane %v5454_v21, 1  ;;  %v2808_v4 = vor.u32 %v2807_v47, %v2803_v45 }
  0xfe   : > { %v1041_v18 = vpop.permute.xlu1 %1040  ;;  %1568 = vrot.lane.b32.xlu0 %v5436_v20, %s4773_s10 }
  0xff   : > { %v1344_v57 = vrot.slane %v1342_v49, 1  ;;  %v1625_v52 = vsel %vm1609_vm9, %v1592_v58, %v1041_v18  ;;  %v1508_v16 = vsel %vm1425_vm2, %v1506_v25, %v1507_v62  ;;  %v1541_v18 = vrot.slane %v5459_v41, 1 }
 0x100   : > { %v1359_v31 = vpop.permute.xlu0 %1358  ;;  %1535 = vrot.lane.b32.xlu1 %v5436_v20, %s4772_s7 }
 0x101   : > { %v1689_v56 = vsel %vm1675_vm11, %v1656_v55, %v1359_v31  ;;  %v1345_v51 = vsel %vm1106_vm3, %v1340_v22, %v1344_v57 }
 0x102   : > { %v1314_v32 = vpop.permute.xlu1 %1313  ;;  %1570 = vrot.lane.b32.xlu0 %v5444_v30, %s4773_s10 }
 0x104   : > { %v1406_v35 = vpop.permute.xlu0 %1405  ;;  %1017 = vrot.lane.b32.xlu1 %v5391_v33, %s4771_s30 }
 0x105   : > { %v1722_v60 = vsel %vm1708_vm12, %v1689_v56, %v1406_v35 }
 0x106   : > { %v1361_v3 = vpop.permute.xlu1 %1360  ;;  %1054 = vrot.lane.b32.xlu0 %v5450_v34, %s4770_s29 }
 0x108   : > { %v1487_v44 = vpop.permute.xlu0 %1486  ;;  %1019 = vrot.lane.b32.xlu1 %v5450_v34, %s4771_s30 }
 0x109   : > { %v1755_v14 = vsel %vm1741_vm13, %v1722_v60, %v1487_v44 }
 0x10a   : > { %v1408_v53 = vpop.permute.xlu1 %1407  ;;  %1327 = vrot.lane.b32.xlu0 %v1286_v1, %s4769_s28  ;;  %v1658_v1 = vsel %vm1642_vm10, %v1625_v52, %v1314_v32 }
 0x10b   : > { %v1691_v5 = vsel %vm1675_vm11, %v1658_v1, %v1361_v3 }
 0x10c   : > { %v1522_v24 = vpop.permute.xlu0 %1521  ;;  %1056 = vrot.lane.b32.xlu1 %v5459_v41, %s4770_s29  ;;  %v1724_v7 = vsel %vm1708_vm12, %v1691_v5, %v1408_v53 }
 0x10d   : > { %v1788_v40 = vsel %vm1774_vm14, %v1755_v14, %v1522_v24 }
 0x10e   : > { %v1489_v61 = vpop.permute.xlu1 %1488  ;;  %1374 = vrot.lane.b32.xlu0 %v1298_v15, %s4774_s13 }
 0x10f   : > { %v1757_v42 = vsel %vm1741_vm13, %v1724_v7, %v1489_v61 }
 0x110   : > { %v1557_v38 = vpop.permute.xlu0 %1556  ;;  %1329 = vrot.lane.b32.xlu1 %v1298_v15, %s4769_s28 }
 0x111   : > { %v1821_v8 = vsel %vm1807_vm15, %v1788_v40, %v1557_v38 }
 0x112   : > { %4535 = vmatprep.mubr.msk.bf16.mxu0 %vm1867_vm4, %v1821_v8  ;;  %v1524_v59 = vpop.permute.xlu1 %1523  ;;  %1421 = vrot.lane.b32.xlu0 %v1345_v51, %s4775_s14 }
 0x113   : > { %v1790_v63 = vsel %vm1774_vm14, %v1757_v42, %v1524_v59 }
 0x114   : > { %v1559_v12 = vpop.permute.xlu0 %1558  ;;  %1376 = vrot.lane.b32.xlu1 %v1345_v51, %s4774_s13 }
 0x115   : > { %v1823_v15 = vsel %vm1807_vm15, %v1790_v63, %v1559_v12 }
 0x116   : > { %4536 = vmatmul.mubr.msk.bf16.gmra.mrb[12].mxu0 %vm1867_vm4, %v1823_v15  ;;  %v1006_v17 = vpop.permute.xlu1 %1005  ;;  %1502 = vrot.lane.b32.xlu0 %v5436_v20, %s4768_s27  ;;  %v1542_v20 = vrot.slane %v4692_v50, 1 }
 0x117   : > { %v1594_v41 = vsel %vm1576_vm8, %v5146_v23, %v1006_v17 }
 0x118   : > { %v1043_v13 = vpop.permute.xlu0 %1042  ;;  %1423 = vrot.lane.b32.xlu1 %v1392_v0, %s4775_s14  ;;  %v1543_v34 = vsel %vm1425_vm2, %v1541_v18, %v1542_v20 }
 0x119   : > { %v1627_v54 = vsel %vm1609_vm9, %v1594_v41, %v1043_v13 }
 0x11a   : > { %v1008_v27 = vpop.permute.xlu1 %1007  ;;  %1537 = vrot.lane.b32.xlu0 %v5444_v30, %s4772_s7 }
 0x11b   : > { %v1596_v57 = vsel %vm1576_vm8, %v5158_v37, %v1008_v27 }
 0x11c   : > { %v1316_v29 = vpop.permute.xlu0 %1315  ;;  %1504 = vrot.lane.b32.xlu1 %v5444_v30, %s4768_s27  ;;  %v4694_v30 = vld [vmem:[#allocation3 + $0x8] ss:$0 sps:$4 sm:$0x11]  }
 0x11d   : > { %v2810_v49 = vshll.u32 %v4694_v30, 16  ;;  %v1660_v55 = vsel %vm1642_vm10, %v1627_v54, %v1316_v29  ;;  %v3121_v46 = vrot.slane %v4694_v30, 1 }
 0x11e   : > { %v1045_v31 = vpop.permute.xlu1 %1044  ;;  %1572 = vrot.lane.b32.xlu0 %v1508_v16, %s4773_s10 }
 0x11f   : > { %v2812_v53 = vrot.slane %v2810_v49, 1  ;;  %v1629_v23 = vsel %vm1609_vm9, %v1596_v57, %v1045_v31  ;;  %v3122_v14 = vsel %vm1425_vm2, %v3120_v39, %v3121_v46 }
 0x120   : > { %v1363_v32 = vpop.permute.xlu0 %1362  ;;  %1539 = vrot.lane.b32.xlu1 %v1508_v16, %s4772_s7 }
 0x121   : > { %v2813_v22 = vsel %vm1106_vm3, %v2808_v4, %v2812_v53  ;;  %v1693_v9 = vsel %vm1675_vm11, %v1660_v55, %v1363_v32 }
 0x122   : > { %v1318_v35 = vpop.permute.xlu1 %1317  ;;  %2994 = vrot.lane.b32.xlu0 %v2813_v22, %s4769_s28 }
 0x123   : > { %v1662_v52 = vsel %vm1642_vm10, %v1629_v23, %v1318_v35 }
 0x124   : > { %v1410_v21 = vpop.permute.xlu0 %1409  ;;  %1574 = vrot.lane.b32.xlu1 %v1543_v34, %s4773_s10 }
 0x125   : > { %v1726_v58 = vsel %vm1708_vm12, %v1693_v9, %v1410_v21 }
 0x126   : > { %v1365_v3 = vpop.permute.xlu1 %1364  ;;  %3168 = vrot.lane.b32.xlu0 %v3122_v14, %s4768_s27 }
 0x127   : > { %v1695_v61 = vsel %vm1675_vm11, %v1662_v52, %v1365_v3 }
 0x128   : > { %v1491_v44 = vpop.permute.xlu0 %1490 }
 0x129   : > { %v1759_v60 = vsel %vm1741_vm13, %v1726_v58, %v1491_v44 }
 0x12a   : > { %v1412_v50 = vpop.permute.xlu1 %1411 }
 0x12b   : > { %v1728_v5 = vsel %vm1708_vm12, %v1695_v61, %v1412_v50 }
 0x12c   : > { %v1526_v24 = vpop.permute.xlu0 %1525 }
 0x12d   : > { %v1792_v1 = vsel %vm1774_vm14, %v1759_v60, %v1526_v24 }
 0x12e   : > { %v1493_v56 = vpop.permute.xlu1 %1492 }
 0x12f   : > { %v1761_v38 = vsel %vm1741_vm13, %v1728_v5, %v1493_v56 }
 0x130   : > { %v1561_v37 = vpop.permute.xlu0 %1560 }
 0x131   : > { %v1825_v40 = vsel %vm1807_vm15, %v1792_v1, %v1561_v37 }
 0x132   : > { %4539 = vmatprep.mubr.msk.bf16.mxu1 %vm1867_vm4, %v1825_v40  ;;  %v1528_v51 = vpop.permute.xlu1 %1527 }
 0x133   : > { %v1794_v7 = vsel %vm1774_vm14, %v1761_v38, %v1528_v51 }
 0x134   : > { %v1563_v8 = vpop.permute.xlu0 %1562 }
 0x135   : > { %v1827_v10 = vsel %vm1807_vm15, %v1794_v7, %v1563_v8 }
 0x136   : > { %4540 = vmatmul.mubr.msk.bf16.vlgmr.msra.gmra.mrb[0].mxu1 %vm1867_vm4, %v1827_v10  ;;  %v1010_v11 = vpop.permute.xlu1 %1009 }
 0x137   : > { %v1598_v63 = vsel %vm1576_vm8, %v5197_v2, %v1010_v11 }
 0x138   : > { %v1047_v42 = vpop.permute.xlu0 %1046 }
 0x139   : > { %v1631_v0 = vsel %vm1609_vm9, %v1598_v63, %v1047_v42 }
 0x13a   : > { %v1012_v59 = vpop.permute.xlu1 %1011 }
 0x13b   : > { %v1600_v13 = vsel %vm1576_vm8, %v5214_v6, %v1012_v59 }
 0x13c   : > { %v1320_v12 = vpop.permute.xlu0 %1319 }
 0x13d   : > { %v1664_v25 = vsel %vm1642_vm10, %v1631_v0, %v1320_v12 }
 0x13e   : > { %v1049_v15 = vpop.permute.xlu1 %1048 }
 0x13f   : > { %v1633_v27 = vsel %vm1609_vm9, %v1600_v13, %v1049_v15 }
 0x140   : > { %v1367_v17 = vpop.permute.xlu0 %1366 }
 0x141   : > { %v1697_v16 = vsel %vm1675_vm11, %v1664_v25, %v1367_v17 }
 0x142   : > { %v1322_v62 = vpop.permute.xlu1 %1321 }
 0x143   : > { %v1666_v20 = vsel %vm1642_vm10, %v1633_v27, %v1322_v62 }
 0x144   : > { %v1414_v29 = vpop.permute.xlu0 %1413 }
 0x145   : > { %v1730_v2 = vsel %vm1708_vm12, %v1697_v16, %v1414_v29 }
 0x146   : > { %v1369_v18 = vpop.permute.xlu1 %1368 }
 0x147   : > { %v1699_v32 = vsel %vm1675_vm11, %v1666_v20, %v1369_v18 }
 0x148   : > { %v1495_v31 = vpop.permute.xlu0 %1494 }
 0x149   : > { %v1763_v35 = vsel %vm1741_vm13, %v1730_v2, %v1495_v31 }
 0x14a   : > { %v1416_v34 = vpop.permute.xlu1 %1415 }
 0x14b   : > { %v1732_v21 = vsel %vm1708_vm12, %v1699_v32, %v1416_v34 }
 0x14c   : > { %v1530_v6 = vpop.permute.xlu0 %1529 }
 0x14d   : > { %v1796_v36 = vsel %vm1774_vm14, %v1763_v35, %v1530_v6 }
 0x14e   : > { %v1497_v3 = vpop.permute.xlu1 %1496 }
 0x14f   : > { %v1765_v30 = vsel %vm1741_vm13, %v1732_v21, %v1497_v3 }
 0x150   : > { %v1565_v43 = vpop.permute.xlu0 %1564 }
 0x151   : > { %v1829_v41 = vsel %vm1807_vm15, %v1796_v36, %v1565_v43 }
 0x152   : > { %v1532_v44 = vpop.permute.xlu1 %1531  ;;  %4543 = vmatprep.mubr.msk.bf16.mxu1 %vm1867_vm4, %v1829_v41 }
 0x153   : > { %v1798_v45 = vsel %vm1774_vm14, %v1765_v30, %v1532_v44 }
 0x154   : > { %v1567_v47 = vpop.permute.xlu0 %1566 }
 0x155   : > { %v1831_v49 = vsel %vm1807_vm15, %v1798_v45, %v1567_v47  ;;  %v5595_v47 = vld [vmem:[%s6673_s2] ss:$0 sm:$0xff] }
 0x156   : > { %4544 = vmatmul.mubr.msk.bf16.gmra.mrb[4].mxu1 %vm1867_vm4, %v1831_v49  ;;  %v1014_v50 = vpop.permute.xlu1 %1013 }
 0x157   : > { %v1602_v54 = vsel %vm1576_vm8, %v5298_v19, %v1014_v50 }
 0x158   : > { %v1051_v4 = vpop.permute.xlu0 %1050 }
 0x159   : > { %v1635_v22 = vsel %vm1609_vm9, %v1602_v54, %v1051_v4 }
 0x15a   : > { %v1016_v53 = vpop.permute.xlu1 %1015 }
 0x15b   : > { %v1604_v9 = vsel %vm1576_vm8, %v5315_v26, %v1016_v53 }
 0x15c   : > { %v1324_v55 = vpop.permute.xlu0 %1323 }
 0x15d   : > { %v1668_v23 = vsel %vm1642_vm10, %v1635_v22, %v1324_v55 }
 0x15e   : > { %v1053_v24 = vpop.permute.xlu1 %1052 }
 0x15f   : > { %v1637_v56 = vsel %vm1609_vm9, %v1604_v9, %v1053_v24 }
 0x160   : > { %v1371_v57 = vpop.permute.xlu0 %1370 }
 0x161   : > { %v1701_v46 = vsel %vm1675_vm11, %v1668_v23, %v1371_v57 }
 0x162   : > { %v1326_v58 = vpop.permute.xlu1 %1325 }
 0x163   : > { %v1670_v60 = vsel %vm1642_vm10, %v1637_v56, %v1326_v58 }
 0x164   : > { %v1418_v39 = vpop.permute.xlu0 %1417 }
 0x165   : > { %v1734_v19 = vsel %vm1708_vm12, %v1701_v46, %v1418_v39 }
 0x166   : > { %v1373_v52 = vpop.permute.xlu1 %1372 }
 0x167   : > { %v1703_v1 = vsel %vm1675_vm11, %v1670_v60, %v1373_v52 }
 0x168   : > { %v1499_v61 = vpop.permute.xlu0 %1498 }
 0x169   : > { %v1767_v14 = vsel %vm1741_vm13, %v1734_v19, %v1499_v61 }
 0x16a   : > { %v1420_v37 = vpop.permute.xlu1 %1419 }
 0x16b   : > { %v1736_v5 = vsel %vm1708_vm12, %v1703_v1, %v1420_v37 }
 0x16c   : > { %v1534_v26 = vpop.permute.xlu0 %1533 }
 0x16d   : > { %v1800_v40 = vsel %vm1774_vm14, %v1767_v14, %v1534_v26 }
 0x16e   : > { %v1501_v38 = vpop.permute.xlu1 %1500 }
 0x16f   : > { %v1769_v51 = vsel %vm1741_vm13, %v1736_v5, %v1501_v38 }
 0x170   : > { %v1569_v7 = vpop.permute.xlu0 %1568 }
 0x171   : > { %v1833_v8 = vsel %vm1807_vm15, %v1800_v40, %v1569_v7 }
 0x172   : > { %v1536_v10 = vpop.permute.xlu1 %1535  ;;  %4547 = vmatprep.mubr.msk.bf16.mxu1 %vm1867_vm4, %v1833_v8 }
 0x173   : > { %v1802_v11 = vsel %vm1774_vm14, %v1769_v51, %v1536_v10 }
 0x174   : > { %v1571_v42 = vpop.permute.xlu0 %1570 }
 0x175   : > { %v1835_v59 = vsel %vm1807_vm15, %v1802_v11, %v1571_v42 }
 0x176   : > { %4548 = vmatmul.mubr.msk.bf16.gmra.mrb[8].mxu1 %vm1867_vm4, %v1835_v59  ;;  %v1018_v63 = vpop.permute.xlu1 %1017 }
 0x177   : > { %v1606_v0 = vsel %vm1576_vm8, %v5380_v28, %v1018_v63 }
 0x178   : > { %v1055_v12 = vpop.permute.xlu0 %1054 }
 0x179   : > { %v1639_v25 = vsel %vm1609_vm9, %v1606_v0, %v1055_v12 }
 0x17a   : > { %v1020_v15 = vpop.permute.xlu1 %1019 }
 0x17b   : > { %v1608_v27 = vsel %vm1576_vm8, %v5391_v33, %v1020_v15 }
 0x17c   : > { %v1328_v17 = vpop.permute.xlu0 %1327 }
 0x17d   : > { %v1672_v29 = vsel %vm1642_vm10, %v1639_v25, %v1328_v17 }
 0x17e   : > { %v1057_v13 = vpop.permute.xlu1 %1056 }
 0x17f   : > { %v1641_v20 = vsel %vm1609_vm9, %v1608_v27, %v1057_v13 }
 0x180   : > { %v1375_v62 = vpop.permute.xlu0 %1374 }
 0x181   : > { %v1705_v2 = vsel %vm1675_vm11, %v1672_v29, %v1375_v62 }
 0x182   : > { %v1330_v16 = vpop.permute.xlu1 %1329 }
 0x183   : > { %v1674_v32 = vsel %vm1642_vm10, %v1641_v20, %v1330_v16 }
 0x184   : > { %v1422_v18 = vpop.permute.xlu0 %1421 }
 0x185   : > { %v1738_v28 = vsel %vm1708_vm12, %v1705_v2, %v1422_v18 }
 0x186   : > { %v1377_v31 = vpop.permute.xlu1 %1376 }
 0x187   : > { %v1707_v6 = vsel %vm1675_vm11, %v1674_v32, %v1377_v31 }
 0x188   : > { %v1503_v34 = vpop.permute.xlu0 %1502 }
 0x189   : > { %v1771_v21 = vsel %vm1741_vm13, %v1738_v28, %v1503_v34 }
 0x18a   : > { %v1424_v35 = vpop.permute.xlu1 %1423 }
 0x18b   : > { %v1740_v36 = vsel %vm1708_vm12, %v1707_v6, %v1424_v35 }
 0x18c   : > { %v1538_v33 = vpop.permute.xlu0 %1537 }
 0x18d   : > { %v1804_v30 = vsel %vm1774_vm14, %v1771_v21, %v1538_v33 }
 0x18e   : > { %v1505_v3 = vpop.permute.xlu1 %1504 }
 0x18f   : > { %v1773_v41 = vsel %vm1741_vm13, %v1740_v36, %v1505_v3 }
 0x190   : > { %v1573_v43 = vpop.permute.xlu0 %1572 }
 0x191   : > { %v1837_v44 = vsel %vm1807_vm15, %v1804_v30, %v1573_v43 }
 0x192   : > { %v1540_v45 = vpop.permute.xlu1 %1539  ;;  %4551 = vmatprep.mubr.msk.bf16.mxu1 %vm1867_vm4, %v1837_v44 }
 0x193   : > { %v1806_v49 = vsel %vm1774_vm14, %v1773_v41, %v1540_v45 }
 0x196   : > { %v4525_v50 = vpop.f32.mrb[0].mxu0  ;;  %v1575_v4 = vpop.permute.xlu1 %1574 }
 0x197   : > { %v1947_v53 = vadd.f32 %v4525_v50, %v5595_v47  ;;  %v1938_v54 = vpop.f32.mrb[1].mxu0  ;;  %v1839_v55 = vsel %vm1807_vm15, %v1806_v49, %v1575_v4 }
 0x198   : > { %v1939_v24 = vadd.f32 %v5595_v47, %v1938_v54  ;;  %v4526_v22 = vpop.f32.mrb[2].mxu0  ;;  %4552 = vmatmul.mubr.msk.bf16.gmra.mrb[12].mxu1 %vm1867_vm4, %v1839_v55 }
 0x199   : > { %v2067_v57 = vmul.f32 0.2, %v1947_v53  ;;  %v1950_v9 = vadd.f32 %v4526_v22, %v5595_v47  ;;  %v1941_v23 = vpop.f32.mrb[3].mxu0 }
 0x19a   : > { %v2065_v58 = vmul.f32 0.2, %v1939_v24  ;;  %v1942_v56 = vadd.f32 %v5595_v47, %v1941_v23 }
 0x19b   : > { %v2068_v39 = vmul.f32 0.2, %v1950_v9  ;;  %v2099_v52 = vmax.f32 %v1947_v53, %v2067_v57 }
 0x19c   : > { %v2066_v46 = vmul.f32 0.2, %v1942_v56  ;;  %v2097_v19 = vmax.f32 %v1939_v24, %v2065_v58 }
 0x19d   : > { %v2100_v60 = vmax.f32 %v1950_v9, %v2068_v39 }
 0x19e   : > { %v2098_v61 = vmax.f32 %v1942_v56, %v2066_v46 }
 0x19f   : > { %v2130_v1 = vpack.c.bf16 %v2100_v60, %v2099_v52 }
 0x1a0   : > { %v2129_v37 = vpack.c.bf16 %v2098_v61, %v2097_v19 }
 0x1a1   : > { %v2153_v14 = vshrl.u32 %v2130_v1, 16  ;;  %v2156_v40 = vshll.u32 %v2130_v1, 16 }
 0x1a2   : > { %v2146_v26 = vshrl.u32 %v2129_v37, 16  ;;  %v2149_v51 = vshll.u32 %v2129_v37, 16 }
 0x1a3   : > { %v2155_v5 = vrot.slane %v2153_v14, 7 }
 0x1a4   : > { %v2148_v38 = vrot.slane %v2146_v26, 7 }
 0x1a5   : > { %v2158_v7 = vor.u32 %v2156_v40, %v2155_v5  ;;  %v2306_v8 = vsel %vm4855_vm6, %v2155_v5, 0 }
 0x1a6   : > { %v4327_v10 = vcombine.low %v2306_v8, %v2306_v8  ;;  %v2151_v11 = vor.u32 %v2149_v51, %v2148_v38  ;;  %v2305_v42 = vsel %vm4855_vm6, %v2148_v38, 0 }
 0x1a7   : > { %v2290_v59 = vsel %vm4855_vm6, 0, %v2158_v7  ;;  %v4324_v63 = vcombine.low %v2305_v42, %v2305_v42 }
 0x1a8   : > { %v4325_v12 = vcombine.low %v2290_v59, %v2290_v59  ;;  %v4326_v15 = vcombine.high %v2290_v59, %v2290_v59  ;;  %2503 = vst.msk [vmem:[#allocation3 + $0x20] sm:$0x1] %vm257_vm1, %v4327_v10  ;;  %v2289_v0 = vsel %vm4855_vm6, 0, %v2151_v11 }
 0x1a9   : > { %v4322_v17 = vcombine.low %v2289_v0, %v2289_v0  ;;  %v4323_v13 = vcombine.high %v2289_v0, %v2289_v0  ;;  %2500 = vst.msk [vmem:[#allocation3 + $0x14] sm:$0x1] %vm257_vm1, %v4324_v63  ;;  %v4529_v25 = vpop.f32.mrb[4].mxu0 }
 0x1aa   : > { %2501 = vst.msk [vmem:[#allocation3 + $0x18] sm:$0xf] %vm254_vm0, %v4325_v12  ;;  %2502 = vst.msk [vmem:[#allocation3 + $0x1c] sm:$0xf] %vm254_vm0, %v4326_v15  ;;  %v1963_v62 = vadd.f32 %v4529_v25, %v5595_v47  ;;  %v1954_v27 = vpop.f32.mrb[5].mxu0 }
 0x1ab   : > { %2498 = vst.msk [vmem:[#allocation3 + $0xc] sm:$0xf] %vm254_vm0, %v4322_v17  ;;  %2499 = vst.msk [vmem:[#allocation3 + $0x10] sm:$0xf] %vm254_vm0, %v4323_v13  ;;  %v1955_v29 = vadd.f32 %v5595_v47, %v1954_v27  ;;  %v4530_v16 = vpop.f32.mrb[6].mxu0 }
 0x1ac   : > { %v2071_v18 = vmul.f32 0.2, %v1963_v62  ;;  %v1966_v20 = vadd.f32 %v4530_v16, %v5595_v47  ;;  %v1957_v2 = vpop.f32.mrb[7].mxu0 }
 0x1ad   : > { %v2069_v31 = vmul.f32 0.2, %v1955_v29  ;;  %v1958_v32 = vadd.f32 %v5595_v47, %v1957_v2 }
 0x1ae   : > { %v2072_v28 = vmul.f32 0.2, %v1966_v20  ;;  %v2103_v35 = vmax.f32 %v1963_v62, %v2071_v18 }
 0x1af   : > { %v2070_v34 = vmul.f32 0.2, %v1958_v32  ;;  %v2101_v21 = vmax.f32 %v1955_v29, %v2069_v31 }
 0x1b0   : > { %v2104_v6 = vmax.f32 %v1966_v20, %v2072_v28 }
 0x1b1   : > { %v2102_v33 = vmax.f32 %v1958_v32, %v2070_v34  ;;  %v5622_v36 = vld [vmem:[#allocation3 + $0x18] sm:$0xff]  }
 0x1b2   : > { %v2132_v3 = vpack.c.bf16 %v2104_v6, %v2103_v35  ;;  %2722 = vrot.lane.b32.xlu0 %v5622_v36, %s4770_s29  ;;  %2687 = vrot.lane.b32.xlu1 %v5622_v36, %s4771_s30  ;;  %v5628_v44 = vld [vmem:[#allocation3 + $0xc] sm:$0xff]  }
 0x1b3   : > { %v2131_v30 = vpack.c.bf16 %v2102_v33, %v2101_v21 }
 0x1b4   : > { %v2167_v43 = vshrl.u32 %v2132_v3, 16  ;;  %v2170_v49 = vshll.u32 %v2132_v3, 16 }
 0x1b5   : > { %v2160_v41 = vshrl.u32 %v2131_v30, 16  ;;  %v2163_v4 = vshll.u32 %v2131_v30, 16 }
 0x1b6   : > { %v2169_v45 = vrot.slane %v2167_v43, 7  ;;  %2685 = vrot.lane.b32.xlu0 %v5628_v44, %s4771_s30 }
 0x1b7   : > { %v2162_v50 = vrot.slane %v2160_v41, 7 }
 0x1b8   : > { %v2172_v53 = vor.u32 %v2170_v49, %v2169_v45  ;;  %v2308_v54 = vsel %vm4855_vm6, %v2169_v45, 0 }
 0x1b9   : > { %v4333_v55 = vcombine.low %v2308_v54, %v2308_v54  ;;  %v2165_v24 = vor.u32 %v2163_v4, %v2162_v50  ;;  %v2307_v22 = vsel %vm4855_vm6, %v2162_v50, 0 }
 0x1ba   : > { %v2292_v57 = vsel %vm4855_vm6, 0, %v2172_v53  ;;  %v4330_v9 = vcombine.low %v2307_v22, %v2307_v22 }
 0x1bb   : > { %v4331_v23 = vcombine.low %v2292_v57, %v2292_v57  ;;  %v4332_v58 = vcombine.high %v2292_v57, %v2292_v57  ;;  %2509 = vst.msk [vmem:[#allocation3 + $0x38] sm:$0x1] %vm257_vm1, %v4333_v55  ;;  %v2291_v56 = vsel %vm4855_vm6, 0, %v2165_v24 }
 0x1bc   : > { %v4328_v39 = vcombine.low %v2291_v56, %v2291_v56  ;;  %v4329_v46 = vcombine.high %v2291_v56, %v2291_v56  ;;  %2506 = vst.msk [vmem:[#allocation3 + $0x2c] sm:$0x1] %vm257_vm1, %v4330_v9 }
 0x1bd   : > { %2507 = vst.msk [vmem:[#allocation3 + $0x30] sm:$0xf] %vm254_vm0, %v4331_v23  ;;  %2508 = vst.msk [vmem:[#allocation3 + $0x34] sm:$0xf] %vm254_vm0, %v4332_v58 }
 0x1be   : > { %2504 = vst.msk [vmem:[#allocation3 + $0x24] sm:$0xf] %vm254_vm0, %v4328_v39  ;;  %2505 = vst.msk [vmem:[#allocation3 + $0x28] sm:$0xf] %vm254_vm0, %v4329_v46 }
 0x1c9   : > { %v4533_v52 = vpop.f32.mrb[8].mxu0 }
 0x1ca   : > { %v1979_v60 = vadd.f32 %v4533_v52, %v5595_v47  ;;  %v1970_v19 = vpop.f32.mrb[9].mxu0 }
 0x1cb   : > { %v1971_v61 = vadd.f32 %v5595_v47, %v1970_v19  ;;  %v4534_v1 = vpop.f32.mrb[10].mxu0 }
 0x1cc   : > { %v2075_v37 = vmul.f32 0.2, %v1979_v60  ;;  %v1982_v14 = vadd.f32 %v4534_v1, %v5595_v47  ;;  %v1973_v26 = vpop.f32.mrb[11].mxu0 }
 0x1cd   : > { %v2073_v5 = vmul.f32 0.2, %v1971_v61  ;;  %v1974_v40 = vadd.f32 %v5595_v47, %v1973_v26 }
 0x1ce   : > { %v2076_v38 = vmul.f32 0.2, %v1982_v14  ;;  %v2107_v7 = vmax.f32 %v1979_v60, %v2075_v37 }
 0x1cf   : > { %v2074_v51 = vmul.f32 0.2, %v1974_v40  ;;  %v2105_v10 = vmax.f32 %v1971_v61, %v2073_v5 }
 0x1d0   : > { %v2108_v8 = vmax.f32 %v1982_v14, %v2076_v38 }
 0x1d1   : > { %v2106_v11 = vmax.f32 %v1974_v40, %v2074_v51 }
 0x1d2   : > { %v2134_v42 = vpack.c.bf16 %v2108_v8, %v2107_v7 }
 0x1d3   : > { %v2133_v59 = vpack.c.bf16 %v2106_v11, %v2105_v10 }
 0x1d4   : > { %v2181_v63 = vshrl.u32 %v2134_v42, 16  ;;  %v2184_v0 = vshll.u32 %v2134_v42, 16 }
 0x1d5   : > { %v2174_v12 = vshrl.u32 %v2133_v59, 16  ;;  %v2177_v13 = vshll.u32 %v2133_v59, 16 }
 0x1d6   : > { %v2183_v15 = vrot.slane %v2181_v63, 7 }
 0x1d7   : > { %v2176_v17 = vrot.slane %v2174_v12, 7 }
 0x1d8   : > { %v2186_v25 = vor.u32 %v2184_v0, %v2183_v15  ;;  %v2310_v62 = vsel %vm4855_vm6, %v2183_v15, 0 }
 0x1d9   : > { %v4339_v27 = vcombine.low %v2310_v62, %v2310_v62  ;;  %v2179_v29 = vor.u32 %v2177_v13, %v2176_v17  ;;  %v2309_v16 = vsel %vm4855_vm6, %v2176_v17, 0 }
 0x1da   : > { %v2294_v18 = vsel %vm4855_vm6, 0, %v2186_v25  ;;  %v4336_v20 = vcombine.low %v2309_v16, %v2309_v16 }
 0x1db   : > { %v4337_v2 = vcombine.low %v2294_v18, %v2294_v18  ;;  %v4338_v31 = vcombine.high %v2294_v18, %v2294_v18  ;;  %2515 = vst.msk [vmem:[#allocation3 + $0x50] sm:$0x1] %vm257_vm1, %v4339_v27  ;;  %v2293_v32 = vsel %vm4855_vm6, 0, %v2179_v29 }
 0x1dc   : > { %v4334_v28 = vcombine.low %v2293_v32, %v2293_v32  ;;  %v4335_v34 = vcombine.high %v2293_v32, %v2293_v32  ;;  %2512 = vst.msk [vmem:[#allocation3 + $0x44] sm:$0x1] %vm257_vm1, %v4336_v20 }
 0x1dd   : > { %2513 = vst.msk [vmem:[#allocation3 + $0x48] sm:$0xf] %vm254_vm0, %v4337_v2  ;;  %2514 = vst.msk [vmem:[#allocation3 + $0x4c] sm:$0xf] %vm254_vm0, %v4338_v31 }
 0x1de   : > { %2510 = vst.msk [vmem:[#allocation3 + $0x3c] sm:$0xf] %vm254_vm0, %v4334_v28  ;;  %2511 = vst.msk [vmem:[#allocation3 + $0x40] sm:$0xf] %vm254_vm0, %v4335_v34 }
 0x1e9   : > { %v4537_v35 = vpop.f32.mrb[12].mxu0 }
 0x1ea   : > { %v1995_v6 = vadd.f32 %v4537_v35, %v5595_v47  ;;  %v1986_v21 = vpop.f32.mrb[13].mxu0 }
 0x1eb   : > { %v1987_v33 = vadd.f32 %v5595_v47, %v1986_v21  ;;  %v4538_v3 = vpop.f32.mrb[14].mxu0 }
 0x1ec   : > { %v2079_v30 = vmul.f32 0.2, %v1995_v6  ;;  %v1998_v43 = vadd.f32 %v4538_v3, %v5595_v47  ;;  %v1989_v41 = vpop.f32.mrb[15].mxu0 }
 0x1ed   : > { %v2077_v45 = vmul.f32 0.2, %v1987_v33  ;;  %v1990_v49 = vadd.f32 %v5595_v47, %v1989_v41 }
 0x1ee   : > { %v2080_v50 = vmul.f32 0.2, %v1998_v43  ;;  %v2111_v53 = vmax.f32 %v1995_v6, %v2079_v30 }
 0x1ef   : > { %v2078_v4 = vmul.f32 0.2, %v1990_v49  ;;  %v2109_v55 = vmax.f32 %v1987_v33, %v2077_v45 }
 0x1f0   : > { %v2112_v54 = vmax.f32 %v1998_v43, %v2080_v50 }
 0x1f1   : > { %v2110_v24 = vmax.f32 %v1990_v49, %v2078_v4 }
 0x1f2   : > { %v2136_v22 = vpack.c.bf16 %v2112_v54, %v2111_v53  ;;  %v5700_v53 = vld [vmem:[#allocation3 + $0x20] ss:$0 sps:$4 sm:$0x11]  }
 0x1f3   : > { %v2135_v57 = vpack.c.bf16 %v2110_v24, %v2109_v55  ;;  %v3126_v55 = vrot.slane %v5622_v36, 1  ;;  %v3127_v24 = vrot.slane %v5700_v53, 1 }
 0x1f4   : > { %v2195_v9 = vshrl.u32 %v2136_v22, 16  ;;  %v2198_v56 = vshll.u32 %v2136_v22, 16 }
 0x1f5   : > { %v2188_v23 = vshrl.u32 %v2135_v57, 16  ;;  %v2191_v46 = vshll.u32 %v2135_v57, 16 }
 0x1f6   : > { %v2197_v58 = vrot.slane %v2195_v9, 7  ;;  %v3128_v9 = vsel %vm1425_vm2, %v3126_v55, %v3127_v24 }
 0x1f7   : > { %v2190_v39 = vrot.slane %v2188_v23, 7 }
 0x1f8   : > { %v2200_v52 = vor.u32 %v2198_v56, %v2197_v58  ;;  %v2312_v60 = vsel %vm4855_vm6, %v2197_v58, 0 }
 0x1f9   : > { %v4345_v19 = vcombine.low %v2312_v60, %v2312_v60  ;;  %v2193_v61 = vor.u32 %v2191_v46, %v2190_v39  ;;  %v2311_v1 = vsel %vm4855_vm6, %v2190_v39, 0  ;;  %v5718_v46 = vld [vmem:[#allocation3 + $0x14] ss:$0 sps:$4 sm:$0x11]  }
 0x1fa   : > { %v2296_v37 = vsel %vm4855_vm6, 0, %v2200_v52  ;;  %v4342_v14 = vcombine.low %v2311_v1, %v2311_v1  ;;  %v2822_v24 = vshll.u32 %v5718_v46, 16 }
 0x1fb   : > { %v4343_v26 = vcombine.low %v2296_v37, %v2296_v37  ;;  %v4344_v5 = vcombine.high %v2296_v37, %v2296_v37  ;;  %2521 = vst.msk [vmem:[#allocation3 + $0x68] sm:$0x1] %vm257_vm1, %v4345_v19  ;;  %v2295_v40 = vsel %vm4855_vm6, 0, %v2193_v61  ;;  %v3123_v37 = vrot.slane %v5628_v44, 1 }
 0x1fc   : > { %v4340_v38 = vcombine.low %v2295_v40, %v2295_v40  ;;  %v4341_v51 = vcombine.high %v2295_v40, %v2295_v40  ;;  %2518 = vst.msk [vmem:[#allocation3 + $0x5c] sm:$0x1] %vm257_vm1, %v4342_v14 }
 0x1fd   : > { %2519 = vst.msk [vmem:[#allocation3 + $0x60] sm:$0xf] %vm254_vm0, %v4343_v26  ;;  %2520 = vst.msk [vmem:[#allocation3 + $0x64] sm:$0xf] %vm254_vm0, %v4344_v5 }
 0x1fe   : > { %2516 = vst.msk [vmem:[#allocation3 + $0x54] sm:$0xf] %vm254_vm0, %v4340_v38  ;;  %2517 = vst.msk [vmem:[#allocation3 + $0x58] sm:$0xf] %vm254_vm0, %v4341_v51  ;;  %v3124_v38 = vrot.slane %v5718_v46, 1 }
 0x209   : > { %v4541_v7 = vpop.f32.mrb[0].mxu1 }
 0x20a   : > { %v2011_v8 = vadd.f32 %v4541_v7, %v5595_v47  ;;  %v2002_v10 = vpop.f32.mrb[1].mxu1 }
 0x20b   : > { %v2003_v11 = vadd.f32 %v5595_v47, %v2002_v10  ;;  %v4542_v42 = vpop.f32.mrb[2].mxu1  ;;  %v3125_v10 = vsel %vm1425_vm2, %v3123_v37, %v3124_v38 }
 0x20c   : > { %v2083_v59 = vmul.f32 0.2, %v2011_v8  ;;  %v2014_v63 = vadd.f32 %v4542_v42, %v5595_v47  ;;  %v2005_v12 = vpop.f32.mrb[3].mxu1 }
 0x20d   : > { %v2081_v15 = vmul.f32 0.2, %v2003_v11  ;;  %v2006_v0 = vadd.f32 %v5595_v47, %v2005_v12 }
 0x20e   : > { %v2084_v17 = vmul.f32 0.2, %v2014_v63  ;;  %v2115_v25 = vmax.f32 %v2011_v8, %v2083_v59 }
 0x20f   : > { %v2082_v13 = vmul.f32 0.2, %v2006_v0  ;;  %v2113_v27 = vmax.f32 %v2003_v11, %v2081_v15 }
 0x210   : > { %v2116_v62 = vmax.f32 %v2014_v63, %v2084_v17  ;;  %v2829_v17 = vshll.u32 %v5622_v36, 16 }
 0x211   : > { %v2114_v29 = vmax.f32 %v2006_v0, %v2082_v13 }
 0x212   : > { %v2138_v16 = vpack.c.bf16 %v2116_v62, %v2115_v25 }
 0x213   : > { %v2137_v18 = vpack.c.bf16 %v2114_v29, %v2113_v27 }
 0x214   : > { %v2209_v20 = vshrl.u32 %v2138_v16, 16  ;;  %v2212_v32 = vshll.u32 %v2138_v16, 16 }
 0x215   : > { %v2202_v2 = vshrl.u32 %v2137_v18, 16  ;;  %v2205_v34 = vshll.u32 %v2137_v18, 16 }
 0x216   : > { %v2211_v31 = vrot.slane %v2209_v20, 7 }
 0x217   : > { %v2204_v28 = vrot.slane %v2202_v2, 7 }
 0x218   : > { %v2214_v35 = vor.u32 %v2212_v32, %v2211_v31  ;;  %v2314_v6 = vsel %vm4855_vm6, %v2211_v31, 0  ;;  %v2831_v31 = vrot.slane %v2829_v17, 1  ;;  %v2817_v32 = vshll.u32 %v5628_v44, 16 }
 0x219   : > { %v4351_v21 = vcombine.low %v2314_v6, %v2314_v6  ;;  %v2207_v33 = vor.u32 %v2205_v34, %v2204_v28  ;;  %v2313_v3 = vsel %vm4855_vm6, %v2204_v28, 0 }
 0x21a   : > { %v2298_v30 = vsel %vm4855_vm6, 0, %v2214_v35  ;;  %v4348_v43 = vcombine.low %v2313_v3, %v2313_v3  ;;  %v2827_v3 = vshrl.u32 %v5622_v36, 16  ;;  %v2819_v55 = vrot.slane %v2817_v32, 1 }
 0x21b   : > { %v4349_v41 = vcombine.low %v2298_v30, %v2298_v30  ;;  %v4350_v45 = vcombine.high %v2298_v30, %v2298_v30  ;;  %2527 = vst.msk [vmem:[#allocation3 + $0x80] sm:$0x1] %vm257_vm1, %v4351_v21  ;;  %v2297_v49 = vsel %vm4855_vm6, 0, %v2207_v33 }
 0x21c   : > { %v4346_v50 = vcombine.low %v2297_v49, %v2297_v49  ;;  %v4347_v4 = vcombine.high %v2297_v49, %v2297_v49  ;;  %2524 = vst.msk [vmem:[#allocation3 + $0x74] sm:$0x1] %vm257_vm1, %v4348_v43 }
 0x21d   : > { %2525 = vst.msk [vmem:[#allocation3 + $0x78] sm:$0xf] %vm254_vm0, %v4349_v41  ;;  %2526 = vst.msk [vmem:[#allocation3 + $0x7c] sm:$0xf] %vm254_vm0, %v4350_v45  ;;  %v2834_v45 = vshll.u32 %v5700_v53, 16  ;;  %v2815_v53 = vshrl.u32 %v5628_v44, 16 }
 0x21e   : > { %2522 = vst.msk [vmem:[#allocation3 + $0x6c] sm:$0xf] %vm254_vm0, %v4346_v50  ;;  %2523 = vst.msk [vmem:[#allocation3 + $0x70] sm:$0xf] %vm254_vm0, %v4347_v4  ;;  %v2832_v4 = vor.u32 %v2831_v31, %v2827_v3 }
 0x21f   : > { %v2836_v36 = vrot.slane %v2834_v45, 1  ;;  %v5812_v45 = vld [vmem:[#allocation3 + $0x38] ss:$0 sps:$4 sm:$0x11]  }
 0x222   : > { %v5727_v51 = vld [vmem:[#allocation3 + $0x80] ss:$0 sps:$4 sm:$0x11]  }
 0x223   : > { %v3151_v63 = vrot.slane %v5727_v51, 1  ;;  %v5734_v12 = vld [vmem:[#allocation3 + $0x74] ss:$0 sps:$4 sm:$0x11]   ;;  %v2930_v46 = vshll.u32 %v5727_v51, 16 }
 0x224   : > { %v5702_v54 = vld [vmem:[#allocation3 + $0x78] sm:$0xff]   ;;  %v3148_v18 = vrot.slane %v5734_v12, 1 }
 0x225   : > { %2738 = vrot.lane.b32.xlu0 %v5702_v54, %s4770_s29  ;;  %2703 = vrot.lane.b32.xlu1 %v5702_v54, %s4771_s30  ;;  %v5710_v22 = vld [vmem:[#allocation3 + $0x6c] sm:$0xff]   ;;  %v3150_v11 = vrot.slane %v5702_v54, 1  ;;  %v2923_v44 = vshrl.u32 %v5702_v54, 16  ;;  %v2932_v37 = vrot.slane %v2930_v46, 1 }
 0x226   : > { %v3147_v27 = vrot.slane %v5710_v22, 1 }
 0x227   : > { %v5738_v62 = vsel %vm1425_vm2, %v3150_v11, %v3151_v63 }
 0x228   : > { %v3149_v6 = vsel %vm1425_vm2, %v3147_v27, %v3148_v18  ;;  %v2911_v27 = vshrl.u32 %v5710_v22, 16 }
 0x229   : > { %v4545_v57 = vpop.f32.mrb[4].mxu1  ;;  %3238 = vrot.lane.b32.xlu0 %v3128_v9, %s4773_s10  ;;  %2736 = vrot.lane.b32.xlu1 %v5710_v22, %s4770_s29 }
 0x22a   : > { %v2027_v23 = vadd.f32 %v4545_v57, %v5595_v47  ;;  %v2018_v58 = vpop.f32.mrb[5].mxu1  ;;  %v2837_v57 = vsel %vm1106_vm3, %v2832_v4, %v2836_v36 }
 0x22b   : > { %v2019_v56 = vadd.f32 %v5595_v47, %v2018_v58  ;;  %v4546_v39 = vpop.f32.mrb[6].mxu1  ;;  %v2824_v58 = vrot.slane %v2822_v24, 1 }
 0x22c   : > { %v2087_v52 = vmul.f32 0.2, %v2027_v23  ;;  %v2030_v60 = vadd.f32 %v4546_v39, %v5595_v47  ;;  %v2021_v19 = vpop.f32.mrb[7].mxu1 }
 0x22d   : > { %v2085_v61 = vmul.f32 0.2, %v2019_v56  ;;  %v2022_v1 = vadd.f32 %v5595_v47, %v2021_v19  ;;  %3172 = vrot.lane.b32.xlu0 %v3128_v9, %s4768_s27  ;;  %2701 = vrot.lane.b32.xlu1 %v5710_v22, %s4771_s30 }
 0x22e   : > { %v2119_v14 = vmax.f32 %v2027_v23, %v2087_v52  ;;  %v2088_v26 = vmul.f32 0.2, %v2030_v60  ;;  %v2925_v23 = vshll.u32 %v5702_v54, 16  ;;  %v5779_v52 = vld [vmem:[#allocation3 + $0x30] sm:$0xff]  }
 0x22f   : > { %v2117_v5 = vmax.f32 %v2019_v56, %v2085_v61  ;;  %v2086_v40 = vmul.f32 0.2, %v2022_v1  ;;  %v3132_v24 = vrot.slane %v5779_v52, 1  ;;  %v2853_v46 = vshll.u32 %v5779_v52, 16 }
 0x230   : > { %v2120_v7 = vmax.f32 %v2030_v60, %v2088_v26  ;;  %v2927_v39 = vrot.slane %v2925_v23, 1  ;;  %v5833_v23 = vld [vmem:[#allocation3 + $0x2c] ss:$0 sps:$4 sm:$0x11]  }
 0x231   : > { %v2118_v8 = vmax.f32 %v2022_v1, %v2086_v40  ;;  %3203 = vrot.lane.b32.xlu0 %v3125_v10, %s4772_s7  ;;  %3205 = vrot.lane.b32.xlu1 %v3128_v9, %s4772_s7  ;;  %v2820_v9 = vor.u32 %v2819_v55, %v2815_v53 }
 0x232   : > { %v2140_v42 = vpack.c.bf16 %v2120_v7, %v2119_v14  ;;  %v2928_v60 = vor.u32 %v2927_v39, %v2923_v44  ;;  %v2913_v7 = vshll.u32 %v5710_v22, 16  ;;  %v4722_v39 = vld [vmem:[%s6674_s3] sm:$0xff]   ;;  %v3130_v44 = vrot.slane %v5833_v23, 1 }
 0x233   : > { %v2139_v59 = vpack.c.bf16 %v2118_v8, %v2117_v5  ;;  %v2825_v56 = vsel %vm1106_vm3, %v2820_v9, %v2824_v58  ;;  %4555 = vmatprep.subr.bf16.mxu1 %v4722_v39 }
 0x234   : > { %v2223_v15 = vshrl.u32 %v2140_v42, 16  ;;  %v2226_v0 = vshll.u32 %v2140_v42, 16  ;;  %v2933_v51 = vsel %vm1106_vm3, %v2928_v60, %v2932_v37  ;;  %v2915_v17 = vrot.slane %v2913_v7, 1  ;;  %v4725_v60 = vld [vmem:[%s6674_s3 + $0x8] sm:$0xff]   ;;  %4556 = vmatpush3.bf16.msra.mxu1 %v4722_v39 }
 0x235   : > { %v2216_v13 = vshrl.u32 %v2139_v59, 16  ;;  %v2219_v25 = vshll.u32 %v2139_v59, 16  ;;  %3254 = vrot.lane.b32.xlu0 %v5738_v62, %s4773_s10  ;;  %3170 = vrot.lane.b32.xlu1 %v3125_v10, %s4768_s27  ;;  %v2855_v37 = vrot.slane %v2853_v46, 1 }
 0x236   : > { %v2225_v29 = vrot.slane %v2223_v15, 7  ;;  %v5793_v15 = vld [vmem:[#allocation3 + $0x24] sm:$0xff]   ;;  %4557 = vmatprep.subr.bf16.mxu1 %v4725_v60 }
 0x237   : > { %v2218_v16 = vrot.slane %v2216_v13, 7 }
 0x238   : > { %v2228_v20 = vor.u32 %v2226_v0, %v2225_v29  ;;  %v2316_v2 = vsel %vm4855_vm6, %v2225_v29, 0  ;;  %v2918_v29 = vshll.u32 %v5734_v12, 16  ;;  %4558 = vmatpush3.bf16.msra.mxu1 %v4725_v60 }
 0x239   : > { %v4357_v28 = vcombine.low %v2316_v2, %v2316_v2  ;;  %v2221_v34 = vor.u32 %v2219_v25, %v2218_v16  ;;  %v2315_v35 = vsel %vm4855_vm6, %v2218_v16, 0  ;;  %3221 = vrot.lane.b32.xlu1 %v5738_v62, %s4772_s7  ;;  %3252 = vrot.lane.b32.xlu0 %v3149_v6, %s4773_s10  ;;  %v2916_v2 = vor.u32 %v2915_v17, %v2911_v27  ;;  %v4726_v17 = vld [vmem:[%s6674_s3 + $0x10] ss:$0 sps:$4 sm:$0x33]  }
 0x23a   : > { %v2300_v21 = vsel %vm4855_vm6, 0, %v2228_v20  ;;  %v4354_v33 = vcombine.low %v2315_v35, %v2315_v35  ;;  %4635 = vmatprep.subr.msk.bf16.mxu1 %vm1900_vm7, %v4726_v17 }
 0x23b   : > { %v4355_v30 = vcombine.low %v2300_v21, %v2300_v21  ;;  %v4356_v43 = vcombine.high %v2300_v21, %v2300_v21  ;;  %2533 = vst.msk [vmem:[#allocation3 + $0x98] sm:$0x1] %vm257_vm1, %v4357_v28  ;;  %v2299_v41 = vsel %vm4855_vm6, 0, %v2221_v34  ;;  %v2920_v34 = vrot.slane %v2918_v29, 1 }
 0x23c   : > { %v4352_v49 = vcombine.low %v2299_v41, %v2299_v41  ;;  %v4353_v50 = vcombine.high %v2299_v41, %v2299_v41  ;;  %2530 = vst.msk [vmem:[#allocation3 + $0x8c] sm:$0x1] %vm257_vm1, %v4354_v33 }
 0x23d   : > { %2531 = vst.msk [vmem:[#allocation3 + $0x90] sm:$0xf] %vm254_vm0, %v4355_v30  ;;  %2532 = vst.msk [vmem:[#allocation3 + $0x94] sm:$0xf] %vm254_vm0, %v4356_v43  ;;  %3186 = vrot.lane.b32.xlu1 %v3149_v6, %s4768_s27  ;;  %3219 = vrot.lane.b32.xlu0 %v3149_v6, %s4772_s7  ;;  %v2921_v12 = vsel %vm1106_vm3, %v2916_v2, %v2920_v34  ;;  %v3781_v34 = vld [vmem:[%s6676_s5] sm:$0x3] }
 0x23e   : > { %2528 = vst.msk [vmem:[#allocation3 + $0x84] sm:$0xf] %vm254_vm0, %v4352_v49  ;;  %2529 = vst.msk [vmem:[#allocation3 + $0x88] sm:$0xf] %vm254_vm0, %v4353_v50  ;;  %4636 = vmatprep.subr.msk.bf16.mxu0 %vm1900_vm7, %v3781_v34 }
 0x241   : > { %3043 = vrot.lane.b32.xlu1 %v2837_v57, %s4774_s13  ;;  %3088 = vrot.lane.b32.xlu0 %v2837_v57, %s4775_s14 }
 0x244   : > { %v5817_v55 = vld [vmem:[#allocation3 + $0x90] sm:$0xff]  }
 0x245   : > { %2996 = vrot.lane.b32.xlu1 %v2825_v56, %s4769_s28  ;;  %2998 = vrot.lane.b32.xlu0 %v2837_v57, %s4769_s28  ;;  %v3133_v57 = vrot.slane %v5812_v45, 1  ;;  %v5835_v58 = vld [vmem:[#allocation3 + $0x84] sm:$0xff]   ;;  %v2947_v60 = vshrl.u32 %v5817_v55, 16 }
 0x247   : > { %v3134_v9 = vsel %vm1425_vm2, %v3132_v24, %v3133_v57  ;;  %v2949_v24 = vshll.u32 %v5817_v55, 16 }
 0x249   : > { %v4549_v19 = vpop.f32.mrb[8].mxu1  ;;  %2691 = vrot.lane.b32.xlu1 %v5779_v52, %s4771_s30  ;;  %3041 = vrot.lane.b32.xlu0 %v2825_v56, %s4774_s13  ;;  %v3129_v56 = vrot.slane %v5793_v15, 1 }
 0x24a   : > { %v2043_v61 = vadd.f32 %v4549_v19, %v5595_v47  ;;  %v2034_v1 = vpop.f32.mrb[9].mxu1 }
 0x24b   : > { %v2035_v14 = vadd.f32 %v5595_v47, %v2034_v1  ;;  %v4550_v26 = vpop.f32.mrb[10].mxu1  ;;  %v3131_v19 = vsel %vm1425_vm2, %v3129_v56, %v3130_v44 }
 0x24c   : > { %v2091_v5 = vmul.f32 0.2, %v2043_v61  ;;  %v2046_v40 = vadd.f32 %v4550_v26, %v5595_v47  ;;  %v2037_v38 = vpop.f32.mrb[11].mxu1 }
 0x24d   : > { %v2089_v8 = vmul.f32 0.2, %v2035_v14  ;;  %v2038_v10 = vadd.f32 %v5595_v47, %v2037_v38  ;;  %3059 = vrot.lane.b32.xlu1 %v2933_v51, %s4774_s13  ;;  %2726 = vrot.lane.b32.xlu0 %v5779_v52, %s4770_s29 }
 0x24e   : > { %v2123_v11 = vmax.f32 %v2043_v61, %v2091_v5  ;;  %v2092_v42 = vmul.f32 0.2, %v2046_v40  ;;  %v5850_v61 = vld [vmem:[#allocation3 + $0x8c] ss:$0 sps:$4 sm:$0x11]  }
 0x24f   : > { %v2121_v59 = vmax.f32 %v2035_v14, %v2089_v8  ;;  %v2090_v63 = vmul.f32 0.2, %v2038_v10  ;;  %v2841_v14 = vshll.u32 %v5793_v15, 16  ;;  %v3154_v38 = vrot.slane %v5850_v61, 1 }
 0x250   : > { %v2124_v0 = vmax.f32 %v2046_v40, %v2092_v42  ;;  %v3153_v40 = vrot.slane %v5835_v58, 1  ;;  %v2851_v8 = vshrl.u32 %v5779_v52, 16 }
 0x251   : > { %v2122_v13 = vmax.f32 %v2038_v10, %v2090_v63  ;;  %2724 = vrot.lane.b32.xlu1 %v5793_v15, %s4770_s29  ;;  %3104 = vrot.lane.b32.xlu0 %v2933_v51, %s4775_s14 }
 0x252   : > { %v2142_v25 = vpack.c.bf16 %v2124_v0, %v2123_v11  ;;  %v5870_v52 = vsel %vm1425_vm2, %v3153_v40, %v3154_v38 }
 0x253   : > { %v2141_v16 = vpack.c.bf16 %v2122_v13, %v2121_v59  ;;  %v2858_v59 = vshll.u32 %v5812_v45, 16  ;;  %v2856_v13 = vor.u32 %v2855_v37, %v2851_v8 }
 0x254   : > { %v2237_v18 = vshrl.u32 %v2142_v25, 16  ;;  %v2240_v20 = vshll.u32 %v2142_v25, 16  ;;  %v2843_v25 = vrot.slane %v2841_v14, 1  ;;  %v2951_v14 = vrot.slane %v2949_v24, 1 }
 0x255   : > { %v2230_v31 = vshrl.u32 %v2141_v16, 16  ;;  %v2233_v32 = vshll.u32 %v2141_v16, 16  ;;  %2689 = vrot.lane.b32.xlu1 %v5793_v15, %s4771_s30  ;;  %3014 = vrot.lane.b32.xlu0 %v2933_v51, %s4769_s28  ;;  %v2860_v2 = vrot.slane %v2858_v59, 1  ;;  %v5920_v59 = vpop.permute.xlu0 %2994 }
 0x256   : > { %v2239_v28 = vrot.slane %v2237_v18, 7  ;;  %v2952_v48 = vor.u32 %v2951_v14, %v2947_v60  ;;  %v4717_v14 = vld [vmem:[#allocation3 + $0x68] ss:$0 sps:$4 sm:$0x11]  }
 0x257   : > { %v2232_v35 = vrot.slane %v2230_v31, 7  ;;  %v2839_v31 = vshrl.u32 %v5793_v15, 16 }
 0x258   : > { %v2242_v6 = vor.u32 %v2240_v20, %v2239_v28  ;;  %v2318_v21 = vsel %vm4855_vm6, %v2239_v28, 0  ;;  %v3586_v20 = vsel %vm1900_vm7, %v4726_v17, 0 }
 0x259   : > { %v4363_v33 = vcombine.low %v2318_v21, %v2318_v21  ;;  %v2235_v3 = vor.u32 %v2233_v32, %v2232_v35  ;;  %v2317_v30 = vsel %vm4855_vm6, %v2232_v35, 0  ;;  %3057 = vrot.lane.b32.xlu0 %v2921_v12, %s4774_s13  ;;  %3102 = vrot.lane.b32.xlu1 %v2921_v12, %s4775_s14  ;;  %v2846_v32 = vshll.u32 %v5833_v23, 16  ;;  %v4728_v35 = vld [vmem:[%s4837_s26] sm:$0xff]  }
 0x25a   : > { %v2302_v43 = vsel %vm4855_vm6, 0, %v2242_v6  ;;  %v4360_v41 = vcombine.low %v2317_v30, %v2317_v30  ;;  %4560 = vmatpush3.bf16.msra.mxu1 %v3586_v20  ;;  %v3943_v21 = vsel %vm1900_vm7, %v3781_v34, 0  ;;  %4595 = vmatprep.mubr.msk.bf16.mxu0 %vm1576_vm8, %v4728_v35  ;;  %v4729_v30 = vld [vmem:[%s4837_s26 + $0x8] sm:$0xff]  }
 0x25b   : > { %v4361_v49 = vcombine.low %v2302_v43, %v2302_v43  ;;  %v4362_v50 = vcombine.high %v2302_v43, %v2302_v43  ;;  %2539 = vst.msk [vmem:[#allocation3 + $0xb0] sm:$0x1] %vm257_vm1, %v4363_v33  ;;  %v2301_v4 = vsel %vm4855_vm6, 0, %v2235_v3  ;;  %v2844_v33 = vor.u32 %v2843_v25, %v2839_v31  ;;  %4594 = vmatpush3.bf16.msra.mxu0 %v3943_v21  ;;  %v5935_v25 = vld [vmem:[#allocation3 + $0x3c] sm:$0xff]  }
 0x25c   : > { %v4358_v36 = vcombine.low %v2301_v4, %v2301_v4  ;;  %v4359_v53 = vcombine.high %v2301_v4, %v2301_v4  ;;  %2536 = vst.msk [vmem:[#allocation3 + $0xa4] sm:$0x1] %vm257_vm1, %v4360_v41  ;;  %v2848_v45 = vrot.slane %v2846_v32, 1  ;;  %v2863_v24 = vshrl.u32 %v5935_v25, 16 }
 0x25d   : > { %2537 = vst.msk [vmem:[#allocation3 + $0xa8] sm:$0xf] %vm254_vm0, %v4361_v49  ;;  %2538 = vst.msk [vmem:[#allocation3 + $0xac] sm:$0xf] %vm254_vm0, %v4362_v50  ;;  %3012 = vrot.lane.b32.xlu1 %v2921_v12, %s4769_s28  ;;  %2742 = vrot.lane.b32.xlu0 %v5817_v55, %s4770_s29  ;;  %v2861_v12 = vsel %vm1106_vm3, %v2856_v13, %v2860_v2  ;;  %v3135_v2 = vrot.slane %v5935_v25, 1 }
 0x25e   : > { %2534 = vst.msk [vmem:[#allocation3 + $0x9c] sm:$0xf] %vm254_vm0, %v4358_v36  ;;  %2535 = vst.msk [vmem:[#allocation3 + $0xa0] sm:$0xf] %vm254_vm0, %v4359_v53  ;;  %4596 = vmatmul.mubr.msk.bf16.vlgmr.msra.gmra.mrb[16].mxu0 %vm1576_vm8, %v4729_v30  ;;  %v2849_v53 = vsel %vm1106_vm3, %v2844_v33, %v2848_v45 }
 0x25f   : > { %v5890_v49 = vld [vmem:[#allocation3 + $0x98] ss:$0 sps:$4 sm:$0x11]   ;;  %v4713_v13 = vld [vmem:[#allocation3 + $0x50] ss:$0 sps:$4 sm:$0x11]  }
 0x260   : > { %v2954_v56 = vshll.u32 %v5890_v49, 16 }
 0x261   : > { %3242 = vrot.lane.b32.xlu0 %v3134_v9, %s4773_s10  ;;  %2707 = vrot.lane.b32.xlu1 %v5817_v55, %s4771_s30 }
 0x262   : > { %v2956_v8 = vrot.slane %v2954_v56, 1 }
 0x265   : > { %3176 = vrot.lane.b32.xlu0 %v3134_v9, %s4768_s27  ;;  %2740 = vrot.lane.b32.xlu1 %v5835_v58, %s4770_s29  ;;  %v5964_v30 = vld [vmem:[#allocation3 + $0x9c] sm:$0xff]  }
 0x269   : > { %3240 = vrot.lane.b32.xlu0 %v3131_v19, %s4773_s10  ;;  %2705 = vrot.lane.b32.xlu1 %v5835_v58, %s4771_s30 }
 0x26b   : > { %v4553_v1 = vpop.f32.mrb[12].mxu1 }
 0x26c   : > { %v2059_v26 = vadd.f32 %v4553_v1, %v5595_v47  ;;  %v2050_v5 = vpop.f32.mrb[13].mxu1 }
 0x26d   : > { %v2051_v51 = vadd.f32 %v5595_v47, %v2050_v5  ;;  %v4554_v7 = vpop.f32.mrb[14].mxu1  ;;  %3207 = vrot.lane.b32.xlu0 %v3131_v19, %s4772_s7  ;;  %3209 = vrot.lane.b32.xlu1 %v3134_v9, %s4772_s7 }
 0x26e   : > { %v2095_v10 = vmul.f32 0.2, %v2059_v26  ;;  %v2062_v11 = vadd.f32 %v4554_v7, %v5595_v47  ;;  %v2053_v42 = vpop.f32.mrb[15].mxu1  ;;  %v5914_v7 = vld [vmem:[#allocation3 + $0x48] sm:$0xff]  }
 0x26f   : > { %v2093_v63 = vmul.f32 0.2, %v2051_v51  ;;  %v2054_v0 = vadd.f32 %v5595_v47, %v2053_v42  ;;  %v2942_v42 = vshll.u32 %v5850_v61, 16  ;;  %v5933_v61 = vpop.permute.xlu0 %3168  ;;  %v2877_v31 = vshll.u32 %v5914_v7, 16 }
 0x270   : > { %v2127_v27 = vmax.f32 %v2059_v26, %v2095_v10  ;;  %v2096_v29 = vmul.f32 0.2, %v2062_v11  ;;  %v2935_v10 = vshrl.u32 %v5835_v58, 16  ;;  %v2875_v21 = vshrl.u32 %v5914_v7, 16 }
 0x271   : > { %v2125_v16 = vmax.f32 %v2051_v51, %v2093_v63  ;;  %v2094_v18 = vmul.f32 0.2, %v2054_v0  ;;  %3174 = vrot.lane.b32.xlu1 %v3131_v19, %s4768_s27  ;;  %3256 = vrot.lane.b32.xlu0 %v5870_v52, %s4773_s10  ;;  %v2937_v19 = vshll.u32 %v5835_v58, 16  ;;  %v5927_v63 = vsel %vm1106_vm3, %v2952_v48, %v2956_v8 }
 0x272   : > { %v2128_v47 = vmax.f32 %v2062_v11, %v2096_v29  ;;  %v2944_v17 = vrot.slane %v2942_v42, 1  ;;  %v3138_v29 = vrot.slane %v5914_v7, 1 }
 0x273   : > { %v2126_v28 = vmax.f32 %v2054_v0, %v2094_v18  ;;  %v2939_v11 = vrot.slane %v2937_v19, 1  ;;  %v5943_v20 = vpop.permute.xlu0 %2722  ;;  %v5990_v19 = vld [vmem:[#allocation3 + $0x60] sm:$0xff]  }
 0x274   : > { %v2144_v6 = vpack.c.bf16 %v2128_v47, %v2127_v27  ;;  %v4714_v47 = vld [vmem:[#allocation3 + $0x44] ss:$0 sps:$4 sm:$0x11]  }
 0x275   : > { %v2143_v3 = vpack.c.bf16 %v2126_v28, %v2125_v16  ;;  %3047 = vrot.lane.b32.xlu1 %v2861_v12, %s4774_s13  ;;  %3092 = vrot.lane.b32.xlu0 %v2861_v12, %s4775_s14  ;;  %v2940_v0 = vor.u32 %v2939_v11, %v2935_v10  ;;  %v3139_v16 = vrot.slane %v4713_v13, 1  ;;  %v3136_v32 = vrot.slane %v4714_v47, 1  ;;  %v5952_v28 = vpop.permute.xlu1 %2687  ;;  %v6010_v10 = vld [vmem:[#allocation3 + $0x54] sm:$0xff]   ;;  %v4719_v11 = vld [vmem:[#allocation3 + $0x5c] ss:$0 sps:$4 sm:$0x11]  }
 0x276   : > { %v2251_v43 = vshrl.u32 %v2144_v6, 16  ;;  %v2254_v41 = vshll.u32 %v2144_v6, 16  ;;  %v2879_v6 = vrot.slane %v2877_v31, 1 }
 0x277   : > { %v2244_v50 = vshrl.u32 %v2143_v3, 16  ;;  %v2247_v4 = vshll.u32 %v2143_v3, 16  ;;  %v2945_v27 = vsel %vm1106_vm3, %v2940_v0, %v2944_v17  ;;  %v3140_v18 = vsel %vm1425_vm2, %v3138_v29, %v3139_v16  ;;  %v5954_v34 = vpop.permute.xlu0 %2685 }
 0x278   : > { %v2253_v36 = vrot.slane %v2251_v43, 7  ;;  %v3137_v35 = vsel %vm1425_vm2, %v3135_v2, %v3136_v32  ;;  %v2880_v43 = vor.u32 %v2879_v6, %v2875_v21  ;;  %v2901_v17 = vshll.u32 %v5990_v19, 16  ;;  %v4754_v21 = vld [vmem:[#allocation3] sm:$0xff]  }
 0x279   : > { %v2246_v57 = vrot.slane %v2244_v50, 7  ;;  %3090 = vrot.lane.b32.xlu1 %v2849_v53, %s4775_s14  ;;  %3002 = vrot.lane.b32.xlu0 %v2861_v12, %s4769_s28  ;;  %v2882_v12 = vshll.u32 %v4713_v13, 16  ;;  %v3141_v13 = vrot.slane %v6010_v10, 1  ;;  %v2961_v29 = vshll.u32 %v5964_v30, 16 }
 0x27a   : > { %v2256_v9 = vor.u32 %v2254_v41, %v2253_v36  ;;  %v2320_v23 = vsel %vm4855_vm6, %v2253_v36, 0  ;;  %v2865_v41 = vshll.u32 %v5935_v25, 16  ;;  %v3142_v16 = vrot.slane %v4719_v11, 1 }
 0x27b   : > { %v4369_v39 = vcombine.low %v2320_v23, %v2320_v23  ;;  %v2249_v44 = vor.u32 %v2247_v4, %v2246_v57  ;;  %v2319_v46 = vsel %vm4855_vm6, %v2246_v57, 0  ;;  %v2884_v45 = vrot.slane %v2882_v12, 1 }
 0x27c   : > { %v2304_v1 = vsel %vm4855_vm6, 0, %v2256_v9  ;;  %v4366_v37 = vcombine.low %v2319_v46, %v2319_v46  ;;  %v2870_v57 = vshll.u32 %v4714_v47, 16  ;;  %v2903_v2 = vrot.slane %v2901_v17, 1 }
 0x27d   : > { %v4367_v26 = vcombine.low %v2304_v1, %v2304_v1  ;;  %v4368_v5 = vcombine.high %v2304_v1, %v2304_v1  ;;  %2545 = vst.msk [vmem:[#allocation3 + $0xc8] sm:$0x1] %vm257_vm1, %v4369_v39  ;;  %v2303_v40 = vsel %vm4855_vm6, 0, %v2249_v44  ;;  %3000 = vrot.lane.b32.xlu1 %v2849_v53, %s4769_s28  ;;  %3045 = vrot.lane.b32.xlu0 %v2849_v53, %s4774_s13  ;;  %v2867_v53 = vrot.slane %v2865_v41, 1  ;;  %v4734_v39 = vld [vmem:[%s4837_s26 + $0x10] sm:$0xff]  }
 0x27e   : > { %v4364_v38 = vcombine.low %v2303_v40, %v2303_v40  ;;  %v4365_v51 = vcombine.high %v2303_v40, %v2303_v40  ;;  %2542 = vst.msk [vmem:[#allocation3 + $0xbc] sm:$0x1] %vm257_vm1, %v4366_v37  ;;  %v2885_v36 = vsel %vm1106_vm3, %v2880_v43, %v2884_v45  ;;  %v2872_v44 = vrot.slane %v2870_v57, 1  ;;  %4599 = vmatprep.mubr.msk.bf16.mxu0 %vm1576_vm8, %v4734_v39  ;;  %v4735_v37 = vld [vmem:[%s4837_s26 + $0x18] sm:$0xff]  }
 0x27f   : > { %2543 = vst.msk [vmem:[#allocation3 + $0xc0] sm:$0xf] %vm254_vm0, %v4367_v26  ;;  %2544 = vst.msk [vmem:[#allocation3 + $0xc4] sm:$0xf] %vm254_vm0, %v4368_v5  ;;  %v2868_v56 = vor.u32 %v2867_v53, %v2863_v24  ;;  %4600 = vmatmul.mubr.msk.bf16.gmra.mrb[20].mxu0 %vm1576_vm8, %v4735_v37  ;;  %v3144_v40 = vrot.slane %v5990_v19, 1  ;;  %v3143_v31 = vsel %vm1425_vm2, %v3141_v13, %v3142_v16  ;;  %v2959_v32 = vshrl.u32 %v5964_v30, 16 }
 0x280   : > { %2540 = vst.msk [vmem:[#allocation3 + $0xb4] sm:$0xf] %vm254_vm0, %v4364_v38  ;;  %2541 = vst.msk [vmem:[#allocation3 + $0xb8] sm:$0xf] %vm254_vm0, %v4365_v51  ;;  %v3145_v38 = vrot.slane %v4717_v14, 1  ;;  %v3271_v12 = vsel %vm1576_vm8, %v4754_v21, %v5954_v34  ;;  %v2899_v43 = vshrl.u32 %v5990_v19, 16 }
 0x281   : > { %2695 = vrot.lane.b32.xlu1 %v5914_v7, %s4771_s30  ;;  %2730 = vrot.lane.b32.xlu0 %v5914_v7, %s4770_s29  ;;  %v2873_v1 = vsel %vm1106_vm3, %v2868_v56, %v2872_v44  ;;  %v2906_v41 = vshll.u32 %v4717_v14, 16  ;;  %v2889_v53 = vshll.u32 %v6010_v10, 16  ;;  %v3303_v24 = vsel %vm1609_vm9, %v3271_v12, %v5943_v20 }
 0x282   : > { %v3146_v48 = vsel %vm1425_vm2, %v3144_v40, %v3145_v38  ;;  %v2904_v57 = vor.u32 %v2903_v2, %v2899_v43  ;;  %v3335_v44 = vsel %vm1642_vm10, %v3303_v24, %v5920_v59  ;;  %v2887_v13 = vshrl.u32 %v6010_v10, 16  ;;  %v4738_v24 = vld [vmem:[%s4837_s26 + $0x30] sm:$0xff]  }
 0x283   : > { %v2908_v39 = vrot.slane %v2906_v41, 1  ;;  %v2891_v38 = vrot.slane %v2889_v53, 1  ;;  %v3157_v53 = vrot.slane %v5890_v49, 1  ;;  %v4739_v49 = vld [vmem:[%s4837_s26 + $0x38] sm:$0xff]  }
 0x285   : > { %3063 = vrot.lane.b32.xlu1 %v5927_v63, %s4774_s13  ;;  %3108 = vrot.lane.b32.xlu0 %v5927_v63, %s4775_s14  ;;  %v2909_v40 = vsel %vm1106_vm3, %v2904_v57, %v2908_v39 }
 0x289   : > { %2728 = vrot.lane.b32.xlu1 %v5935_v25, %s4770_s29  ;;  %3061 = vrot.lane.b32.xlu0 %v2945_v27, %s4774_s13 }
 0x28d   : > { %2693 = vrot.lane.b32.xlu1 %v5935_v25, %s4771_s30  ;;  %3246 = vrot.lane.b32.xlu0 %v3140_v18, %s4773_s10 }
 0x291   : > { %3180 = vrot.lane.b32.xlu0 %v3140_v18, %s4768_s27  ;;  %3106 = vrot.lane.b32.xlu1 %v2945_v27, %s4775_s14 }
 0x295   : > { %3244 = vrot.lane.b32.xlu0 %v3137_v35, %s4773_s10  ;;  %3016 = vrot.lane.b32.xlu1 %v2945_v27, %s4769_s28  ;;  %v6020_v27 = vld [vmem:[#allocation3 + $0xa4] ss:$0 sps:$4 sm:$0x11]  }
 0x296   : > { %v2966_v6 = vshll.u32 %v6020_v27, 16 }
 0x297   : > { %v5960_v33 = vpop.permute.xlu0 %2738  ;;  %v5962_v3 = vpop.permute.xlu1 %2703 }
 0x298   : > { %v2968_v34 = vrot.slane %v2966_v6, 1 }
 0x299   : > { %3211 = vrot.lane.b32.xlu0 %v3137_v35, %s4772_s7  ;;  %2744 = vrot.lane.b32.xlu1 %v5964_v30, %s4770_s29 }
 0x29b   : > { %v5970_v50 = vpop.permute.xlu0 %3238  ;;  %v5972_v4 = vpop.permute.xlu1 %2736 }
 0x29d   : > { %3096 = vrot.lane.b32.xlu0 %v2885_v36, %s4775_s14  ;;  %3213 = vrot.lane.b32.xlu1 %v3140_v18, %s4772_s7 }
 0x29f   : > { %v5978_v9 = vpop.permute.xlu0 %3172  ;;  %v5980_v23 = vpop.permute.xlu1 %2701 }
 0x2a1   : > { %3006 = vrot.lane.b32.xlu0 %v2885_v36, %s4769_s28  ;;  %3178 = vrot.lane.b32.xlu1 %v3137_v35, %s4768_s27  ;;  %v2963_v35 = vrot.slane %v2961_v29, 1  ;;  %v2894_v29 = vshll.u32 %v4719_v11, 16 }
 0x2a3   : > { %v5985_v46 = vpop.permute.xlu0 %3203  ;;  %v5987_v60 = vpop.permute.xlu1 %3205  ;;  %v2964_v56 = vor.u32 %v2963_v35, %v2959_v32  ;;  %v2892_v35 = vor.u32 %v2891_v38, %v2887_v13  ;;  %v6132_v13 = vld [vmem:[#allocation3 + $0xb0] ss:$0 sps:$4 sm:$0x11]  }
 0x2a5   : > { %3049 = vrot.lane.b32.xlu0 %v2873_v1, %s4774_s13  ;;  %3051 = vrot.lane.b32.xlu1 %v2885_v36, %s4774_s13  ;;  %v6054_v20 = vsel %vm1106_vm3, %v2964_v56, %v2968_v34  ;;  %v3159_v34 = vrot.slane %v5964_v30, 1 }
 0x2a7   : > { %v5997_v26 = vpop.permute.xlu0 %3254  ;;  %v5999_v5 = vpop.permute.xlu1 %3170 }
 0x2a9   : > { %2734 = vrot.lane.b32.xlu0 %v5990_v19, %s4770_s29  ;;  %3094 = vrot.lane.b32.xlu1 %v2873_v1, %s4775_s14 }
 0x2ab   : > { %v6005_v51 = vpop.permute.xlu0 %3252  ;;  %v6007_v8 = vpop.permute.xlu1 %3221 }
 0x2ad   : > { %3250 = vrot.lane.b32.xlu0 %v3146_v48, %s4773_s10  ;;  %3004 = vrot.lane.b32.xlu1 %v2873_v1, %s4769_s28 }
 0x2af   : > { %v6014_v42 = vpop.permute.xlu0 %3219  ;;  %v6016_v0 = vpop.permute.xlu1 %3186 }
 0x2b1   : > { %3184 = vrot.lane.b32.xlu0 %v3146_v48, %s4768_s27  ;;  %2699 = vrot.lane.b32.xlu1 %v5990_v19, %s4771_s30 }
 0x2b3   : > { %v3089_v18 = vpop.permute.xlu0 %3088  ;;  %v6026_v47 = vpop.permute.xlu1 %3043 }
 0x2b5   : > { %3248 = vrot.lane.b32.xlu0 %v3143_v31, %s4773_s10  ;;  %2732 = vrot.lane.b32.xlu1 %v6010_v10, %s4770_s29 }
 0x2b7   : > { %v6037_v45 = vpop.permute.xlu0 %2998  ;;  %v6039_v36 = vpop.permute.xlu1 %2996 }
 0x2b9   : > { %3215 = vrot.lane.b32.xlu0 %v3143_v31, %s4772_s7  ;;  %2697 = vrot.lane.b32.xlu1 %v6010_v10, %s4771_s30 }
 0x2bb   : > { %v3042_v1 = vpop.permute.xlu0 %3041  ;;  %v6049_v37 = vpop.permute.xlu1 %2691 }
 0x2bc   : > { %v3367_v14 = vsel %vm1675_vm11, %v3335_v44, %v3042_v1 }
 0x2bd   : > { %v3399_v17 = vsel %vm1708_vm12, %v3367_v14, %v3089_v18  ;;  %3100 = vrot.lane.b32.xlu0 %v2909_v40, %s4775_s14  ;;  %3110 = vrot.lane.b32.xlu1 %v6054_v20, %s4775_s14  ;;  %v6118_v14 = vld [vmem:[#allocation3 + $0xa8] sm:$0xff]  }
 0x2be   : > { %v3431_v59 = vsel %vm1741_vm13, %v3399_v17, %v5933_v61  ;;  %v2896_v61 = vrot.slane %v2894_v29, 1  ;;  %v2973_v29 = vshll.u32 %v6118_v14, 16 }
 0x2bf   : > { %v6063_v16 = vpop.permute.xlu0 %2726  ;;  %v6065_v2 = vpop.permute.xlu1 %3059  ;;  %v3463_v32 = vsel %vm1774_vm14, %v3431_v59, %v5985_v46 }
 0x2c0   : > { %v3495_v18 = vsel %vm1807_vm15, %v3463_v32, %v5970_v50  ;;  %v2897_v21 = vsel %vm1106_vm3, %v2892_v35, %v2896_v61  ;;  %v4736_v50 = vld [vmem:[%s4837_s26 + $0x20] sm:$0xff]   ;;  %v4741_v32 = vld [vmem:[%s4837_s26 + $0x48] sm:$0xff]   ;;  %v2971_v35 = vshrl.u32 %v6118_v14, 16  ;;  %v2975_v61 = vrot.slane %v2973_v29, 1 }
 0x2c1   : > { %3010 = vrot.lane.b32.xlu0 %v2909_v40, %s4769_s28  ;;  %3217 = vrot.lane.b32.xlu1 %v3146_v48, %s4772_s7  ;;  %v4737_v48 = vld [vmem:[%s4837_s26 + $0x28] sm:$0xff]  }
 0x2c2   : > { %4561 = vmatprep.mubr.msk.bf16.mxu1 %vm1867_vm4, %v3495_v18  ;;  %4603 = vmatprep.mubr.msk.bf16.mxu0 %vm1576_vm8, %v4736_v50  ;;  %v4742_v50 = vld [vmem:[%s4837_s26 + $0x50] sm:$0xff]  }
 0x2c3   : > { %v6074_v11 = vpop.permute.xlu0 %3104  ;;  %v6076_v6 = vpop.permute.xlu1 %2724  ;;  %4604 = vmatmul.mubr.msk.bf16.gmra.mrb[24].mxu0 %vm1576_vm8, %v4737_v48 }
 0x2c4   : > { %4607 = vmatprep.mubr.msk.bf16.mxu0 %vm1576_vm8, %v4738_v24  ;;  %v2976_v24 = vor.u32 %v2975_v61, %v2971_v35  ;;  %v4756_v61 = vld [vmem:[#allocation3 + $0x18] sm:$0xff]  }
 0x2c5   : > { %3053 = vrot.lane.b32.xlu0 %v2897_v21, %s4774_s13  ;;  %3182 = vrot.lane.b32.xlu1 %v3143_v31, %s4768_s27  ;;  %v3156_v31 = vrot.slane %v5817_v55, 1  ;;  %v3160_v55 = vrot.slane %v6020_v27, 1  ;;  %v4740_v27 = vld [vmem:[%s4837_s26 + $0x40] sm:$0xff]  }
 0x2c7   : > { %v3015_v46 = vpop.permute.xlu0 %3014  ;;  %v6082_v12 = vpop.permute.xlu1 %2689  ;;  %v6102_v56 = vsel %vm1425_vm2, %v3156_v31, %v3157_v53  ;;  %v6116_v1 = vsel %vm1425_vm2, %v3159_v34, %v3160_v55  ;;  %v6160_v34 = vld [vmem:[#allocation3 + $0xb4] sm:$0xff]   ;;  %v4743_v55 = vld [vmem:[%s4837_s26 + $0x58] sm:$0xff]  }
 0x2c9   : > { %3188 = vrot.lane.b32.xlu0 %v5738_v62, %s4768_s27  ;;  %3055 = vrot.lane.b32.xlu1 %v2909_v40, %s4774_s13  ;;  %v3289_v40 = vsel %vm1576_vm8, %v5710_v22, %v5962_v3 }
 0x2cb   : > { %v6090_v43 = vpop.permute.xlu0 %3057  ;;  %v6092_v41 = vpop.permute.xlu1 %3102  ;;  %4608 = vmatmul.mubr.msk.bf16.gmra.mrb[28].mxu0 %vm1576_vm8, %v4739_v49 }
 0x2cc   : > { %4611 = vmatprep.mubr.msk.bf16.mxu0 %vm1576_vm8, %v4740_v27 }
 0x2cd   : > { %3223 = vrot.lane.b32.xlu0 %v5870_v52, %s4772_s7  ;;  %3098 = vrot.lane.b32.xlu1 %v2897_v21, %s4775_s14 }
 0x2cf   : > { %v2743_v62 = vpop.permute.xlu0 %2742  ;;  %v3013_v57 = vpop.permute.xlu1 %3012 }
 0x2d1   : > { %3258 = vrot.lane.b32.xlu0 %v6102_v56, %s4773_s10  ;;  %3008 = vrot.lane.b32.xlu1 %v2897_v21, %s4769_s28  ;;  %v2978_v21 = vshll.u32 %v6132_v13, 16 }
 0x2d3   : > { %v6110_v39 = vpop.permute.xlu0 %3242  ;;  %v6112_v44 = vpop.permute.xlu1 %2707  ;;  %4612 = vmatmul.mubr.msk.bf16.gmra.mrb[32].mxu0 %vm1576_vm8, %v4741_v32 }
 0x2d4   : > { %4615 = vmatprep.mubr.msk.bf16.mxu0 %vm1576_vm8, %v4742_v50 }
 0x2d5   : > { %3260 = vrot.lane.b32.xlu0 %v6116_v1, %s4773_s10  ;;  %3190 = vrot.lane.b32.xlu1 %v5870_v52, %s4768_s27 }
 0x2d7   : > { %v6128_v38 = vpop.permute.xlu0 %3176  ;;  %v2741_v17 = vpop.permute.xlu1 %2740 }
 0x2d8   : > { %v3321_v59 = vsel %vm1609_vm9, %v3289_v40, %v2741_v17  ;;  %v4727_v40 = vld [vmem:[#allocation3 + $0xbc] ss:$0 sps:$4 sm:$0x11]   ;;  %v2985_v17 = vshll.u32 %v6160_v34, 16 }
 0x2d9   : > { %v6137_v52 = vsel %vm1642_vm10, %v3321_v59, %v3013_v57  ;;  %2746 = vrot.lane.b32.xlu0 %v6118_v14, %s4770_s29  ;;  %3225 = vrot.lane.b32.xlu1 %v6102_v56, %s4772_s7  ;;  %v2980_v57 = vrot.slane %v2978_v21, 1  ;;  %v2990_v35 = vshll.u32 %v4727_v40, 16 }
 0x2db   : > { %v3241_v22 = vpop.permute.xlu0 %3240  ;;  %v2706_v3 = vpop.permute.xlu1 %2705  ;;  %4616 = vmatmul.mubr.msk.bf16.gmra.mrb[36].mxu0 %vm1576_vm8, %v4743_v55  ;;  %v6175_v27 = vsel %vm1106_vm3, %v2976_v24, %v2980_v57  ;;  %v3163_v24 = vrot.slane %v6132_v13, 1 }
 0x2dc   : > { %v3291_v18 = vsel %vm1576_vm8, %v5702_v54, %v2706_v3  ;;  %v2983_v3 = vshrl.u32 %v6160_v34, 16 }
 0x2dd   : > { %v3323_v48 = vsel %vm1609_vm9, %v3291_v18, %v2743_v62  ;;  %3018 = vrot.lane.b32.xlu0 %v5927_v63, %s4769_s28  ;;  %2709 = vrot.lane.b32.xlu1 %v5964_v30, %s4771_s30  ;;  %v4755_v62 = vld [vmem:[#allocation3 + $0xc] sm:$0xff]   ;;  %v2987_v18 = vrot.slane %v2985_v17, 1 }
 0x2de   : > { %v6155_v31 = vsel %vm1642_vm10, %v3323_v48, %v3015_v46  ;;  %v3273_v49 = vsel %vm1576_vm8, %v4755_v62, %v5952_v28  ;;  %v3162_v48 = vrot.slane %v6118_v14, 1 }
 0x2df   : > { %v3208_v54 = vpop.permute.xlu0 %3207  ;;  %v6158_v53 = vpop.permute.xlu1 %3209  ;;  %v3305_v59 = vsel %vm1609_vm9, %v3273_v49, %v6076_v6  ;;  %v3275_v6 = vsel %vm1576_vm8, %v4756_v61, %v6082_v12  ;;  %v2988_v55 = vor.u32 %v2987_v18, %v2983_v3 }
 0x2e0   : > { %v3337_v28 = vsel %vm1642_vm10, %v3305_v59, %v6039_v36  ;;  %v3307_v57 = vsel %vm1609_vm9, %v3275_v6, %v6063_v16 }
 0x2e1   : > { %3065 = vrot.lane.b32.xlu0 %v6054_v20, %s4774_s13  ;;  %2711 = vrot.lane.b32.xlu1 %v6118_v14, %s4771_s30  ;;  %v3369_v50 = vsel %vm1675_vm11, %v3337_v28, %v6026_v47  ;;  %v3339_v16 = vsel %vm1642_vm10, %v3307_v57, %v6037_v45  ;;  %v3165_v28 = vrot.slane %v6160_v34, 1  ;;  %v4744_v45 = vld [vmem:[%s4837_s26 + $0x60] sm:$0xff]  }
 0x2e2   : > { %4619 = vmatprep.mubr.msk.bf16.mxu0 %vm1576_vm8, %v4744_v45 }
 0x2e3   : > { %v6167_v63 = vpop.permute.xlu0 %3256  ;;  %v6169_v46 = vpop.permute.xlu1 %3174 }
 0x2e5   : > { %3112 = vrot.lane.b32.xlu0 %v6175_v27, %s4775_s14  ;;  %2748 = vrot.lane.b32.xlu1 %v6160_v34, %s4770_s29 }
 0x2e7   : > { %v3093_v29 = vpop.permute.xlu0 %3092  ;;  %v6184_v32 = vpop.permute.xlu1 %3047 }
 0x2e9   : > { %3192 = vrot.lane.b32.xlu0 %v6102_v56, %s4768_s27  ;;  %3020 = vrot.lane.b32.xlu1 %v6054_v20, %s4769_s28  ;;  %v2992_v56 = vrot.slane %v2990_v35, 1 }
 0x2eb   : > { %v6195_v21 = vpop.permute.xlu0 %3002  ;;  %v3091_v36 = vpop.permute.xlu1 %3090  ;;  %v2993_v59 = vsel %vm1106_vm3, %v2988_v55, %v2992_v56 }
 0x2ec   : > { %v3401_v12 = vsel %vm1708_vm12, %v3369_v50, %v3091_v36  ;;  %v6243_v50 = vld [vmem:[#allocation3 + $0xc0] sm:$0xff]   ;;  %v4731_v36 = vld [vmem:[#allocation3 + $0xc8] ss:$0 sps:$4 sm:$0x11]  }
 0x2ed   : > { %v3433_v20 = vsel %vm1741_vm13, %v3401_v12, %v5999_v5  ;;  %3227 = vrot.lane.b32.xlu0 %v6116_v1, %s4772_s7  ;;  %3067 = vrot.lane.b32.xlu1 %v6175_v27, %s4774_s13  ;;  %v6218_v5 = vsel %vm1425_vm2, %v3162_v48, %v3163_v24  ;;  %v3032_v48 = vshll.u32 %v6243_v50, 16  ;;  %v3037_v55 = vshll.u32 %v4731_v36, 16 }
 0x2ee   : > { %v3465_v47 = vsel %vm1774_vm14, %v3433_v20, %v5987_v60  ;;  %v3166_v60 = vrot.slane %v4727_v40, 1 }
 0x2ef   : > { %v3046_v13 = vpop.permute.xlu0 %3045  ;;  %v6214_v62 = vpop.permute.xlu1 %3000  ;;  %v3497_v49 = vsel %vm1807_vm15, %v3465_v47, %v3241_v22  ;;  %v4745_v22 = vld [vmem:[%s4837_s26 + $0x68] sm:$0xff]   ;;  %v3034_v12 = vrot.slane %v3032_v48, 1 }
 0x2f0   : > { %v3371_v17 = vsel %vm1675_vm11, %v3339_v16, %v3046_v13  ;;  %4562 = vmatmul.mubr.msk.bf16.vlgmr.msra.gmra.mrb[16].mxu1 %vm1867_vm4, %v3497_v49  ;;  %v6239_v40 = vsel %vm1425_vm2, %v3165_v28, %v3166_v60  ;;  %4620 = vmatmul.mubr.msk.bf16.gmra.mrb[40].mxu0 %vm1576_vm8, %v4745_v22  ;;  %v3039_v16 = vrot.slane %v3037_v55, 1  ;;  %v6270_v49 = vld [vmem:[#allocation3 + $0xcc] sm:$0xff]   ;;  %v3385_v28 = vsel %vm1675_vm11, %v6137_v52, %v6065_v2 }
 0x2f1   : > { %v3403_v3 = vsel %vm1708_vm12, %v3371_v17, %v3093_v29  ;;  %3262 = vrot.lane.b32.xlu0 %v6218_v5, %s4773_s10  ;;  %3114 = vrot.lane.b32.xlu1 %v2993_v59, %s4775_s14  ;;  %v3201_v55 = vrot.slane %v4731_v36, 1  ;;  %v4746_v36 = vld [vmem:[%s4837_s26 + $0x70] sm:$0xff]  }
 0x2f2   : > { %v3435_v18 = vsel %vm1741_vm13, %v3403_v3, %v5978_v9  ;;  %4623 = vmatprep.mubr.msk.bf16.mxu0 %vm1576_vm8, %v4746_v36 }
 0x2f3   : > { %v6232_v35 = vpop.permute.xlu0 %2730  ;;  %v6234_v61 = vpop.permute.xlu1 %2695  ;;  %v3467_v6 = vsel %vm1774_vm14, %v3435_v18, %v3208_v54  ;;  %v3077_v18 = vshrl.u32 %v6270_v49, 16 }
 0x2f4   : > { %v3499_v29 = vsel %vm1807_vm15, %v3467_v6, %v6110_v39 }
 0x2f5   : > { %3264 = vrot.lane.b32.xlu0 %v6239_v40, %s4773_s10  ;;  %3194 = vrot.lane.b32.xlu1 %v6116_v1, %s4768_s27  ;;  %v3030_v1 = vshrl.u32 %v6243_v50, 16 }
 0x2f6   : > { %4565 = vmatprep.mubr.msk.bf16.mxu1 %vm1867_vm4, %v3499_v29 }
 0x2f7   : > { %v3109_v9 = vpop.permute.xlu0 %3108  ;;  %v3064_v54 = vpop.permute.xlu1 %3063  ;;  %v3035_v13 = vor.u32 %v3034_v12, %v3030_v1 }
 0x2f9   : > { %2750 = vrot.lane.b32.xlu0 %v6243_v50, %s4770_s29  ;;  %3229 = vrot.lane.b32.xlu1 %v6218_v5, %s4772_s7  ;;  %v3040_v45 = vsel %vm1106_vm3, %v3035_v13, %v3039_v16 }
 0x2fb   : > { %v3062_v39 = vpop.permute.xlu0 %3061  ;;  %v6256_v24 = vpop.permute.xlu1 %2728 }
 0x2fc   : > { %v3387_v57 = vsel %vm1675_vm11, %v6155_v31, %v3062_v39  ;;  %v4733_v31 = vld [vmem:[#allocation3 + $0xd4] ss:$0 sps:$4 sm:$0x11]  }
 0x2fd   : > { %3022 = vrot.lane.b32.xlu0 %v6175_v27, %s4769_s28  ;;  %2713 = vrot.lane.b32.xlu1 %v6160_v34, %s4771_s30  ;;  %v6266_v56 = vsel %vm1708_vm12, %v3387_v57, %v3109_v9  ;;  %v3079_v27 = vshll.u32 %v6270_v49, 16  ;;  %v3084_v29 = vshll.u32 %v4733_v31, 16  ;;  %v3293_v57 = vsel %vm1576_vm8, %v5835_v58, %v6112_v44 }
 0x2ff   : > { %v6268_v20 = vpop.permute.xlu0 %3246  ;;  %v2694_v47 = vpop.permute.xlu1 %2693  ;;  %v3081_v6 = vrot.slane %v3079_v27, 1  ;;  %v3086_v39 = vrot.slane %v3084_v29, 1  ;;  %v4757_v27 = vld [vmem:[#allocation3 + $0x30] sm:$0xff]  }
 0x301   : > { %3069 = vrot.lane.b32.xlu0 %v2993_v59, %s4774_s13  ;;  %2715 = vrot.lane.b32.xlu1 %v6243_v50, %s4771_s30 }
 0x303   : > { %v6276_v17 = vpop.permute.xlu0 %3180  ;;  %v3107_v60 = vpop.permute.xlu1 %3106 }
 0x304   : > { %v3417_v3 = vsel %vm1708_vm12, %v3385_v28, %v3107_v60  ;;  %v4747_v28 = vld [vmem:[%s4837_s26 + $0x78] sm:$0xff]  }
 0x305   : > { %v3449_v22 = vsel %vm1741_vm13, %v3417_v3, %v6016_v0  ;;  %3116 = vrot.lane.b32.xlu0 %v3040_v45, %s4775_s14  ;;  %2752 = vrot.lane.b32.xlu1 %v6270_v49, %s4770_s29  ;;  %v3082_v0 = vor.u32 %v3081_v6, %v3077_v18  ;;  %v3236_v18 = vrot.slane %v4733_v31, 1 }
 0x306   : > { %v3481_v2 = vsel %vm1774_vm14, %v3449_v22, %v6007_v8  ;;  %4624 = vmatmul.mubr.msk.bf16.gmra.mrb[44].mxu0 %vm1576_vm8, %v4747_v28  ;;  %v3235_v22 = vrot.slane %v6270_v49, 1  ;;  %v3281_v28 = vsel %vm1576_vm8, %v5935_v25, %v6234_v61 }
 0x307   : > { %v3245_v52 = vpop.permute.xlu0 %3244  ;;  %v3017_v9 = vpop.permute.xlu1 %3016  ;;  %v6293_v48 = vsel %vm1807_vm15, %v3481_v2, %v6167_v63  ;;  %v3200_v63 = vrot.slane %v6243_v50, 1  ;;  %v3279_v50 = vsel %vm1576_vm8, %v4757_v27, %v2694_v47 }
 0x309   : > { %3196 = vrot.lane.b32.xlu0 %v6218_v5, %s4768_s27  ;;  %3024 = vrot.lane.b32.xlu1 %v2993_v59, %s4769_s28  ;;  %v3087_v5 = vsel %vm1106_vm3, %v3082_v0, %v3086_v39  ;;  %v3202_v16 = vsel %vm1425_vm2, %v3200_v63, %v3201_v55  ;;  %s4461_s28 = sshll.u32 %s6681_s22, 8 }
 0x30b   : > { %v3212_v1 = vpop.permute.xlu0 %3211  ;;  %v2745_v12 = vpop.permute.xlu1 %2744 }
 0x30c   : > { %v3325_v8 = vsel %vm1609_vm9, %v3293_v57, %v2745_v12 }
 0x30d   : > { %v3357_v13 = vsel %vm1642_vm10, %v3325_v8, %v3017_v9  ;;  %3231 = vrot.lane.b32.xlu0 %v6239_v40, %s4772_s7  ;;  %3071 = vrot.lane.b32.xlu1 %v3040_v45, %s4774_s13  ;;  %v3311_v45 = vsel %vm1609_vm9, %v3279_v50, %v6232_v35 }
 0x30e   : > { %v6309_v58 = vsel %vm1675_vm11, %v3357_v13, %v3064_v54  ;;  %v3277_v54 = vsel %vm1576_vm8, %v5793_v15, %v6049_v37  ;;  %v3343_v29 = vsel %vm1642_vm10, %v3311_v45, %v6195_v21  ;;  %v3287_v45 = vsel %vm1576_vm8, %v5990_v19, %v5980_v23 }
 0x30f   : > { %v3097_v44 = vpop.permute.xlu0 %3096  ;;  %v6311_v59 = vpop.permute.xlu1 %3213  ;;  %v3309_v47 = vsel %vm1609_vm9, %v3277_v54, %v6256_v24  ;;  %v3237_v24 = vsel %vm1425_vm2, %v3235_v22, %v3236_v18 }
 0x310   : > { %v3341_v15 = vsel %vm1642_vm10, %v3309_v47, %v6214_v62 }
 0x311   : > { %3266 = vrot.lane.b32.xlu0 %v3202_v16, %s4773_s10  ;;  %3118 = vrot.lane.b32.xlu1 %v3087_v5, %s4775_s14  ;;  %v3373_v31 = vsel %vm1675_vm11, %v3341_v15, %v6184_v32 }
 0x313   : > { %v3007_v60 = vpop.permute.xlu0 %3006  ;;  %v6319_v3 = vpop.permute.xlu1 %3178 }
 0x315   : > { %3198 = vrot.lane.b32.xlu1 %v6239_v40, %s4768_s27 }
 0x317   : > { %v3050_v6 = vpop.permute.xlu0 %3049  ;;  %v3052_v2 = vpop.permute.xlu1 %3051 }
 0x318   : > { %v3375_v37 = vsel %vm1675_vm11, %v3343_v29, %v3050_v6 }
 0x319   : > { %v3407_v35 = vsel %vm1708_vm12, %v3375_v37, %v3097_v44  ;;  %3233 = vrot.lane.b32.xlu1 %v3202_v16, %s4772_s7  ;;  %s6526_s7 = scalar_lea.vmem %s6677_s6, %s4461_s28 }
 0x31a   : > { %v3439_v40 = vsel %vm1741_vm13, %v3407_v35, %v6128_v38 }
 0x31b   : > { %v2735_v49 = vpop.permute.xlu0 %2734  ;;  %v3095_v21 = vpop.permute.xlu1 %3094  ;;  %v3471_v0 = vsel %vm1774_vm14, %v3439_v40, %v3212_v1 }
 0x31c   : > { %v3405_v9 = vsel %vm1708_vm12, %v3373_v31, %v3095_v21  ;;  %v3503_v32 = vsel %vm1807_vm15, %v3471_v0, %v6268_v20 }
 0x31d   : > { %v3437_v62 = vsel %vm1741_vm13, %v3405_v9, %v6169_v46  ;;  %3268 = vrot.lane.b32.xlu1 %v3237_v24, %s4773_s10 }
 0x31e   : > { %v3469_v39 = vsel %vm1774_vm14, %v3437_v62, %v6158_v53 }
 0x31f   : > { %v3251_v38 = vpop.permute.xlu0 %3250  ;;  %v3005_v57 = vpop.permute.xlu1 %3004  ;;  %v3501_v12 = vsel %vm1807_vm15, %v3469_v39, %v3245_v52 }
 0x320   : > { %4566 = vmatmul.mubr.msk.bf16.gmra.mrb[20].mxu1 %vm1867_vm4, %v3501_v12 }
 0x321   : > { %4569 = vmatprep.mubr.msk.bf16.mxu1 %vm1867_vm4, %v3503_v32 }
 0x323   : > { %v3185_v8 = vpop.permute.xlu0 %3184  ;;  %v2700_v46 = vpop.permute.xlu1 %2699 }
 0x324   : > { %v3285_v19 = vsel %vm1576_vm8, %v6010_v10, %v2700_v46 }
 0x325   : > { %v3317_v10 = vsel %vm1609_vm9, %v3285_v19, %v5972_v4 }
 0x327   : > { %v3249_v63 = vpop.permute.xlu0 %3248  ;;  %v2733_v55 = vpop.permute.xlu1 %2732 }
 0x32b   : > { %v3216_v13 = vpop.permute.xlu0 %3215  ;;  %v2698_v1 = vpop.permute.xlu1 %2697 }
 0x32c   : > { %v3283_v53 = vsel %vm1576_vm8, %v5914_v7, %v2698_v1  ;;  %v3313_v7 = vsel %vm1609_vm9, %v3281_v28, %v2733_v55 }
 0x32d   : > { %v3315_v27 = vsel %vm1609_vm9, %v3283_v53, %v2735_v49  ;;  %v3345_v6 = vsel %vm1642_vm10, %v3313_v7, %v3005_v57 }
 0x32e   : > { %v3347_v20 = vsel %vm1642_vm10, %v3315_v27, %v3007_v60  ;;  %v3319_v60 = vsel %vm1609_vm9, %v3287_v45, %v5960_v33  ;;  %v3377_v15 = vsel %vm1675_vm11, %v3345_v6, %v3052_v2 }
 0x32f   : > { %v3101_v5 = vpop.permute.xlu0 %3100  ;;  %v6357_v44 = vpop.permute.xlu1 %3110 }
 0x331   : > { %v6406_v57 = vpop.f32.mrb[16].mxu0 }
 0x333   : > { %v3011_v52 = vpop.permute.xlu0 %3010  ;;  %v3218_v16 = vpop.permute.xlu1 %3217 }
 0x334   : > { %v3351_v29 = vsel %vm1642_vm10, %v3319_v60, %v3011_v52 }
 0x335   : > { %v3383_v37 = vsel %vm1675_vm11, %v3351_v29, %v6090_v43 }
 0x336   : > { %v3415_v2 = vsel %vm1708_vm12, %v3383_v37, %v6074_v11 }
 0x337   : > { %v3054_v50 = vpop.permute.xlu0 %3053  ;;  %v3183_v36 = vpop.permute.xlu1 %3182 }
 0x338   : > { %v3379_v54 = vsel %vm1675_vm11, %v3347_v20, %v3054_v50 }
 0x339   : > { %v3411_v47 = vsel %vm1708_vm12, %v3379_v54, %v3101_v5 }
 0x33a   : > { %v3443_v25 = vsel %vm1741_vm13, %v3411_v47, %v6276_v17 }
 0x33b   : > { %v3189_v22 = vpop.permute.xlu0 %3188  ;;  %v3056_v18 = vpop.permute.xlu1 %3055  ;;  %v3475_v40 = vsel %vm1774_vm14, %v3443_v25, %v3216_v13 }
 0x33c   : > { %v3451_v13 = vsel %vm1741_vm13, %v6266_v56, %v3189_v22 }
 0x33f   : > { %v3224_v61 = vpop.permute.xlu0 %3223  ;;  %v3099_v23 = vpop.permute.xlu1 %3098 }
 0x340   : > { %v3409_v35 = vsel %vm1708_vm12, %v3377_v15, %v3099_v23 }
 0x341   : > { %v3441_v33 = vsel %vm1741_vm13, %v3409_v35, %v6319_v3  ;;  %v3507_v3 = vsel %vm1807_vm15, %v3475_v40, %v3251_v38 }
 0x342   : > { %v3473_v17 = vsel %vm1774_vm14, %v3441_v33, %v6311_v59  ;;  %v3447_v59 = vsel %vm1741_vm13, %v3415_v2, %v3185_v8  ;;  %v6413_v8 = vpop.f32.mrb[17].mxu0 }
 0x343   : > { %v3259_v24 = vpop.permute.xlu0 %3258  ;;  %v3009_v49 = vpop.permute.xlu1 %3008  ;;  %v3505_v43 = vsel %vm1807_vm15, %v3473_v17, %v3249_v63  ;;  %v3479_v39 = vsel %vm1774_vm14, %v3447_v59, %v6014_v42 }
 0x344   : > { %v3349_v31 = vsel %vm1642_vm10, %v3317_v10, %v3009_v49  ;;  %4570 = vmatmul.mubr.msk.bf16.gmra.mrb[24].mxu1 %vm1867_vm4, %v3505_v43  ;;  %v6416_v46 = vpop.f32.mrb[18].mxu0 }
 0x345   : > { %v3381_v21 = vsel %vm1675_vm11, %v3349_v31, %v3056_v18  ;;  %4573 = vmatprep.mubr.msk.bf16.mxu1 %vm1867_vm4, %v3507_v3  ;;  %v6418_v63 = vpop.f32.mrb[19].mxu0 }
 0x346   : > { %v3413_v11 = vsel %vm1708_vm12, %v3381_v21, %v6092_v41  ;;  %v3511_v41 = vsel %vm1807_vm15, %v3479_v39, %v5997_v26  ;;  %v3421_v26 = vsel %vm1708_vm12, %v6309_v58, %v6357_v44 }
 0x347   : > { %v3261_v9 = vpop.permute.xlu0 %3260  ;;  %v3191_v4 = vpop.permute.xlu1 %3190  ;;  %v3445_v62 = vsel %vm1741_vm13, %v3413_v11, %v3183_v36 }
 0x348   : > { %v3477_v0 = vsel %vm1774_vm14, %v3445_v62, %v3218_v16  ;;  %v3453_v52 = vsel %vm1741_vm13, %v3421_v26, %v3191_v4  ;;  %v4758_v16 = vld [vmem:[#allocation3 + $0x90] sm:$0xff]  }
 0x349   : > { %v3509_v32 = vsel %vm1807_vm15, %v3477_v0, %v6005_v51  ;;  %v3483_v51 = vsel %vm1774_vm14, %v3451_v13, %v3224_v61 }
 0x34a   : > { %v3515_v53 = vsel %vm1807_vm15, %v3483_v51, %v3259_v24 }
 0x34b   : > { %v2747_v38 = vpop.permute.xlu0 %2746  ;;  %v3226_v12 = vpop.permute.xlu1 %3225 }
 0x34c   : > { %4574 = vmatmul.mubr.msk.bf16.gmra.mrb[28].mxu1 %vm1867_vm4, %v3509_v32  ;;  %v3485_v20 = vsel %vm1774_vm14, %v3453_v52, %v3226_v12 }
 0x34d   : > { %4577 = vmatprep.mubr.msk.bf16.mxu1 %vm1867_vm4, %v3511_v41 }
 0x34f   : > { %v3019_v42 = vpop.permute.xlu0 %3018  ;;  %v2710_v55 = vpop.permute.xlu1 %2709 }
 0x350   : > { %v3295_v56 = vsel %vm1576_vm8, %v4758_v16, %v2710_v55 }
 0x351   : > { %v3327_v36 = vsel %vm1609_vm9, %v3295_v56, %v2747_v38 }
 0x352   : > { %v3359_v45 = vsel %vm1642_vm10, %v3327_v36, %v3019_v42  ;;  %v6455_v11 = vpop.f32.mrb[20].mxu0 }
 0x353   : > { %v3066_v1 = vpop.permute.xlu0 %3065  ;;  %v2712_v5 = vpop.permute.xlu1 %2711 }
 0x354   : > { %4578 = vmatmul.mubr.msk.bf16.gmra.mrb[32].mxu1 %vm1867_vm4, %v6293_v48  ;;  %v3517_v48 = vsel %vm1807_vm15, %v3485_v20, %v3261_v9  ;;  %v3391_v7 = vsel %vm1675_vm11, %v3359_v45, %v3066_v1  ;;  %v3297_v25 = vsel %vm1576_vm8, %v5964_v30, %v2712_v5  ;;  %v6458_v9 = vpop.f32.mrb[21].mxu0 }
 0x355   : > { %4581 = vmatprep.mubr.msk.bf16.mxu1 %vm1867_vm4, %v3515_v53  ;;  %v6460_v0 = vpop.f32.mrb[22].mxu0 }
 0x356   : > { %v6463_v38 = vpop.f32.mrb[23].mxu0 }
 0x357   : > { %v3113_v27 = vpop.permute.xlu0 %3112  ;;  %v2749_v50 = vpop.permute.xlu1 %2748 }
 0x358   : > { %v3423_v47 = vsel %vm1708_vm12, %v3391_v7, %v3113_v27  ;;  %v3329_v61 = vsel %vm1609_vm9, %v3297_v25, %v2749_v50 }
 0x35b   : > { %v3193_v28 = vpop.permute.xlu0 %3192  ;;  %v3021_v54 = vpop.permute.xlu1 %3020 }
 0x35c   : > { %4582 = vmatmul.mubr.msk.bf16.gmra.mrb[36].mxu1 %vm1867_vm4, %v3517_v48  ;;  %v3455_v22 = vsel %vm1741_vm13, %v3423_v47, %v3193_v28  ;;  %v3361_v19 = vsel %vm1642_vm10, %v3329_v61, %v3021_v54 }
 0x35f   : > { %v3228_v58 = vpop.permute.xlu0 %3227  ;;  %v3068_v44 = vpop.permute.xlu1 %3067 }
 0x360   : > { %v3487_v18 = vsel %vm1774_vm14, %v3455_v22, %v3228_v58  ;;  %v3393_v37 = vsel %vm1675_vm11, %v3361_v19, %v3068_v44 }
 0x363   : > { %v3263_v6 = vpop.permute.xlu0 %3262  ;;  %v3115_v60 = vpop.permute.xlu1 %3114 }
 0x364   : > { %v3519_v29 = vsel %vm1807_vm15, %v3487_v18, %v3263_v6  ;;  %v3425_v35 = vsel %vm1708_vm12, %v3393_v37, %v3115_v60 }
 0x365   : > { %4585 = vmatprep.mubr.msk.bf16.mxu1 %vm1867_vm4, %v3519_v29 }
 0x367   : > { %v3265_v15 = vpop.permute.xlu0 %3264  ;;  %v3195_v23 = vpop.permute.xlu1 %3194 }
 0x368   : > { %v3457_v33 = vsel %vm1741_vm13, %v3425_v35, %v3195_v23  ;;  %v6516_v23 = vld [vmem:[%s6675_s4] ss:$0 sm:$0xff] }
 0x36b   : > { %v2751_v40 = vpop.permute.xlu0 %2750  ;;  %v3230_v17 = vpop.permute.xlu1 %3229 }
 0x36c   : > { %v3489_v2 = vsel %vm1774_vm14, %v3457_v33, %v3230_v17 }
 0x36d   : > { %v3521_v24 = vsel %vm1807_vm15, %v3489_v2, %v3265_v15 }
 0x36e   : > { %4586 = vmatmul.mubr.msk.bf16.gmra.mrb[40].mxu1 %vm1867_vm4, %v3521_v24 }
 0x36f   : > { %v3023_v30 = vpop.permute.xlu0 %3022  ;;  %v2714_v10 = vpop.permute.xlu1 %2713 }
 0x370   : > { %v3299_v31 = vsel %vm1576_vm8, %v6118_v14, %v2714_v10 }
 0x371   : > { %v3331_v59 = vsel %vm1609_vm9, %v3299_v31, %v2751_v40 }
 0x372   : > { %v3363_v39 = vsel %vm1642_vm10, %v3331_v59, %v3023_v30 }
 0x373   : > { %v3070_v49 = vpop.permute.xlu0 %3069  ;;  %v2716_v43 = vpop.permute.xlu1 %2715 }
 0x374   : > { %v3395_v14 = vsel %vm1675_vm11, %v3363_v39, %v3070_v49  ;;  %v3301_v53 = vsel %vm1576_vm8, %v6160_v34, %v2716_v43 }
 0x377   : > { %v3117_v3 = vpop.permute.xlu0 %3116  ;;  %v2753_v21 = vpop.permute.xlu1 %2752 }
 0x378   : > { %v3427_v41 = vsel %vm1708_vm12, %v3395_v14, %v3117_v3  ;;  %v3333_v26 = vsel %vm1609_vm9, %v3301_v53, %v2753_v21 }
 0x37b   : > { %v3197_v4 = vpop.permute.xlu0 %3196  ;;  %v3025_v62 = vpop.permute.xlu1 %3024 }
 0x37c   : > { %v3459_v42 = vsel %vm1741_vm13, %v3427_v41, %v3197_v4  ;;  %v3365_v52 = vsel %vm1642_vm10, %v3333_v26, %v3025_v62 }
 0x37f   : > { %v3232_v12 = vpop.permute.xlu0 %3231  ;;  %v3072_v32 = vpop.permute.xlu1 %3071 }
 0x380   : > { %v3491_v55 = vsel %vm1774_vm14, %v3459_v42, %v3232_v12  ;;  %v3397_v56 = vsel %vm1675_vm11, %v3365_v52, %v3072_v32 }
 0x383   : > { %v3267_v13 = vpop.permute.xlu0 %3266  ;;  %v3119_v51 = vpop.permute.xlu1 %3118 }
 0x384   : > { %v3523_v1 = vsel %vm1807_vm15, %v3491_v55, %v3267_v13  ;;  %v3429_v27 = vsel %vm1708_vm12, %v3397_v56, %v3119_v51 }
 0x385   : > { %4589 = vmatprep.mubr.msk.bf16.mxu1 %vm1867_vm4, %v3523_v1 }
 0x387   : > { %v3199_v5 = vpop.permute.xlu1 %3198 }
 0x388   : > { %v3461_v50 = vsel %vm1741_vm13, %v3429_v27, %v3199_v5 }
 0x38b   : > { %v3234_v16 = vpop.permute.xlu1 %3233 }
 0x38c   : > { %v3493_v20 = vsel %vm1774_vm14, %v3461_v50, %v3234_v16 }
 0x38f   : > { %v3269_v36 = vpop.permute.xlu1 %3268 }
 0x390   : > { %v3525_v28 = vsel %vm1807_vm15, %v3493_v20, %v3269_v36 }
 0x391   : > { %4590 = vmatmul.mubr.msk.bf16.gmra.mrb[44].mxu1 %vm1867_vm4, %v3525_v28 }
 0x396   : > { %v6481_v54 = vpop.f32.mrb[24].mxu0 }
 0x397   : > { %v6483_v34 = vpop.f32.mrb[25].mxu0 }
 0x398   : > { %v6485_v48 = vpop.f32.mrb[26].mxu0 }
 0x399   : > { %v6487_v45 = vpop.f32.mrb[27].mxu0 }
 0x39e   : > { %v6489_v58 = vpop.f32.mrb[28].mxu0 }
 0x39f   : > { %v6491_v44 = vpop.f32.mrb[29].mxu0 }
 0x3a0   : > { %v6493_v7 = vpop.f32.mrb[30].mxu0 }
 0x3a1   : > { %v6495_v47 = vpop.f32.mrb[31].mxu0 }
 0x3a6   : > { %v6497_v22 = vpop.f32.mrb[32].mxu0 }
 0x3a7   : > { %v6499_v18 = vpop.f32.mrb[33].mxu0 }
 0x3a8   : > { %v6501_v6 = vpop.f32.mrb[34].mxu0 }
 0x3a9   : > { %v6503_v60 = vpop.f32.mrb[35].mxu0 }
 0x3ae   : > { %v6505_v29 = vpop.f32.mrb[36].mxu0 }
 0x3af   : > { %v6507_v25 = vpop.f32.mrb[37].mxu0 }
 0x3b0   : > { %v6509_v61 = vpop.f32.mrb[38].mxu0 }
 0x3b1   : > { %v6511_v15 = vpop.f32.mrb[39].mxu0 }
 0x3c3   : > { %v4563_v19 = vpop.f32.mrb[16].mxu1  ;;  %v6528_v49 = vpop.f32.mrb[40].mxu0 }
 0x3c4   : > { %v3631_v37 = vadd.f32 %v4563_v19, %v6516_v23  ;;  %v3622_v35 = vpop.f32.mrb[17].mxu1  ;;  %v6531_v3 = vpop.f32.mrb[41].mxu0 }
 0x3c5   : > { %v3623_v33 = vadd.f32 %v6516_v23, %v3622_v35  ;;  %v4564_v40 = vpop.f32.mrb[18].mxu1  ;;  %v6534_v4 = vpop.f32.mrb[42].mxu0 }
 0x3c6   : > { %v3784_v17 = vmul.f32 0.1, %v3631_v37  ;;  %v3634_v2 = vadd.f32 %v4564_v40, %v6516_v23  ;;  %v3625_v24 = vpop.f32.mrb[19].mxu1  ;;  %v6539_v39 = vpop.f32.mrb[43].mxu0 }
 0x3c7   : > { %v3782_v30 = vmul.f32 0.1, %v3623_v33  ;;  %v3626_v10 = vadd.f32 %v6516_v23, %v3625_v24 }
 0x3c8   : > { %v3785_v43 = vmul.f32 0.1, %v3634_v2  ;;  %v3988_v31 = vadd.f32 %v6406_v57, %v3784_v17 }
 0x3c9   : > { %v3783_v21 = vmul.f32 0.1, %v3626_v10  ;;  %v3980_v59 = vadd.f32 %v6413_v8, %v3782_v30 }
 0x3ca   : > { %4108 = vst.msk [vmem:[%s6526_s7 + $0x10] sm:$0xff] %vm1609_vm9, %v3988_v31  ;;  %v3991_v62 = vadd.f32 %v6416_v46, %v3785_v43 }
 0x3cb   : > { %4106 = vst.msk [vmem:[%s6526_s7] sm:$0xff] %vm1609_vm9, %v3980_v59  ;;  %v3983_v12 = vadd.f32 %v6418_v63, %v3783_v21 }
 0x3cc   : > { %4109 = vst.msk [vmem:[%s6526_s7 + $0x18] sm:$0xff] %vm1609_vm9, %v3991_v62 }
 0x3cd   : > { %4107 = vst.msk [vmem:[%s6526_s7 + $0x8] sm:$0xff] %vm1609_vm9, %v3983_v12 }
 0x3d9   : > { %v6548_v57 = vpop.f32.mrb[44].mxu0 }
 0x3da   : > { %v6550_v32 = vpop.f32.mrb[45].mxu0 }
 0x3db   : > { %v6552_v8 = vpop.f32.mrb[46].mxu0 }
 0x3dc   : > { %v6554_v14 = vpop.f32.mrb[47].mxu0 }
 0x3f3   : > { %v4567_v46 = vpop.f32.mrb[20].mxu1 }
 0x3f4   : > { %v3647_v41 = vadd.f32 %v4567_v46, %v6516_v23  ;;  %v3638_v42 = vpop.f32.mrb[21].mxu1 }
 0x3f5   : > { %v3639_v63 = vadd.f32 %v6516_v23, %v3638_v42  ;;  %v4568_v55 = vpop.f32.mrb[22].mxu1 }
 0x3f6   : > { %v3788_v13 = vmul.f32 0.1, %v3647_v41  ;;  %v3650_v51 = vadd.f32 %v4568_v55, %v6516_v23  ;;  %v3641_v1 = vpop.f32.mrb[23].mxu1 }
 0x3f7   : > { %v3786_v5 = vmul.f32 0.1, %v3639_v63  ;;  %v3642_v53 = vadd.f32 %v6516_v23, %v3641_v1 }
 0x3f8   : > { %v3789_v26 = vmul.f32 0.1, %v3650_v51  ;;  %v4004_v52 = vadd.f32 %v6455_v11, %v3788_v13 }
 0x3f9   : > { %v3787_v16 = vmul.f32 0.1, %v3642_v53  ;;  %v3996_v56 = vadd.f32 %v6458_v9, %v3786_v5 }
 0x3fa   : > { %4112 = vst.msk [vmem:[%s6526_s7 + $0x30] sm:$0xff] %vm1609_vm9, %v4004_v52  ;;  %v4007_v27 = vadd.f32 %v6460_v0, %v3789_v26 }
 0x3fb   : > { %4110 = vst.msk [vmem:[%s6526_s7 + $0x20] sm:$0xff] %vm1609_vm9, %v3996_v56  ;;  %v3999_v50 = vadd.f32 %v6463_v38, %v3787_v16 }
 0x3fc   : > { %4113 = vst.msk [vmem:[%s6526_s7 + $0x38] sm:$0xff] %vm1609_vm9, %v4007_v27 }
 0x3fd   : > { %4111 = vst.msk [vmem:[%s6526_s7 + $0x28] sm:$0xff] %vm1609_vm9, %v3999_v50 }
 0x417   : > { %v4571_v20 = vpop.f32.mrb[24].mxu1 }
 0x418   : > { %v3663_v11 = vadd.f32 %v4571_v20, %v6516_v23  ;;  %v3654_v36 = vpop.f32.mrb[25].mxu1 }
 0x419   : > { %v3655_v9 = vadd.f32 %v6516_v23, %v3654_v36  ;;  %v4572_v28 = vpop.f32.mrb[26].mxu1 }
 0x41a   : > { %v3792_v19 = vmul.f32 0.1, %v3663_v11  ;;  %v3666_v0 = vadd.f32 %v4572_v28, %v6516_v23  ;;  %v3657_v37 = vpop.f32.mrb[27].mxu1 }
 0x41b   : > { %v3790_v38 = vmul.f32 0.1, %v3655_v9  ;;  %v3658_v35 = vadd.f32 %v6516_v23, %v3657_v37 }
 0x41c   : > { %v3793_v33 = vmul.f32 0.1, %v3666_v0  ;;  %v4020_v40 = vadd.f32 %v6481_v54, %v3792_v19 }
 0x41d   : > { %v3791_v17 = vmul.f32 0.1, %v3658_v35  ;;  %v4012_v2 = vadd.f32 %v6483_v34, %v3790_v38 }
 0x41e   : > { %4116 = vst.msk [vmem:[%s6526_s7 + $0x50] sm:$0xff] %vm1609_vm9, %v4020_v40  ;;  %v4023_v24 = vadd.f32 %v6485_v48, %v3793_v33 }
 0x41f   : > { %4114 = vst.msk [vmem:[%s6526_s7 + $0x40] sm:$0xff] %vm1609_vm9, %v4012_v2  ;;  %v4015_v30 = vadd.f32 %v6487_v45, %v3791_v17  ;;  %v4575_v10 = vpop.f32.mrb[28].mxu1 }
 0x420   : > { %4117 = vst.msk [vmem:[%s6526_s7 + $0x58] sm:$0xff] %vm1609_vm9, %v4023_v24  ;;  %v3679_v43 = vadd.f32 %v4575_v10, %v6516_v23  ;;  %v3670_v31 = vpop.f32.mrb[29].mxu1 }
 0x421   : > { %4115 = vst.msk [vmem:[%s6526_s7 + $0x48] sm:$0xff] %vm1609_vm9, %v4015_v30  ;;  %v3671_v54 = vadd.f32 %v6516_v23, %v3670_v31  ;;  %v4576_v34 = vpop.f32.mrb[30].mxu1 }
 0x422   : > { %v3796_v21 = vmul.f32 0.1, %v3679_v43  ;;  %v3682_v48 = vadd.f32 %v4576_v34, %v6516_v23  ;;  %v3673_v59 = vpop.f32.mrb[31].mxu1 }
 0x423   : > { %v3794_v45 = vmul.f32 0.1, %v3671_v54  ;;  %v3674_v62 = vadd.f32 %v6516_v23, %v3673_v59 }
 0x424   : > { %v3797_v12 = vmul.f32 0.1, %v3682_v48  ;;  %v4036_v46 = vadd.f32 %v6489_v58, %v3796_v21 }
 0x425   : > { %v3795_v41 = vmul.f32 0.1, %v3674_v62  ;;  %v4028_v42 = vadd.f32 %v6491_v44, %v3794_v45 }
 0x426   : > { %4120 = vst.msk [vmem:[%s6526_s7 + $0x70] sm:$0xff] %vm1609_vm9, %v4036_v46  ;;  %v4039_v63 = vadd.f32 %v6493_v7, %v3797_v12 }
 0x427   : > { %4118 = vst.msk [vmem:[%s6526_s7 + $0x60] sm:$0xff] %vm1609_vm9, %v4028_v42  ;;  %v4031_v55 = vadd.f32 %v6495_v47, %v3795_v41  ;;  %v4579_v13 = vpop.f32.mrb[32].mxu1 }
 0x428   : > { %4121 = vst.msk [vmem:[%s6526_s7 + $0x78] sm:$0xff] %vm1609_vm9, %v4039_v63  ;;  %v3695_v51 = vadd.f32 %v4579_v13, %v6516_v23  ;;  %v3686_v1 = vpop.f32.mrb[33].mxu1 }
 0x429   : > { %4119 = vst.msk [vmem:[%s6526_s7 + $0x68] sm:$0xff] %vm1609_vm9, %v4031_v55  ;;  %v3687_v58 = vadd.f32 %v6516_v23, %v3686_v1  ;;  %v4580_v44 = vpop.f32.mrb[34].mxu1 }
 0x42a   : > { %v3800_v5 = vmul.f32 0.1, %v3695_v51  ;;  %v3698_v7 = vadd.f32 %v4580_v44, %v6516_v23  ;;  %v3689_v53 = vpop.f32.mrb[35].mxu1 }
 0x42b   : > { %v3798_v47 = vmul.f32 0.1, %v3687_v58  ;;  %v3690_v26 = vadd.f32 %v6516_v23, %v3689_v53 }
 0x42c   : > { %v3801_v52 = vmul.f32 0.1, %v3698_v7  ;;  %v4052_v16 = vadd.f32 %v6497_v22, %v3800_v5 }
 0x42d   : > { %v3799_v56 = vmul.f32 0.1, %v3690_v26  ;;  %v4044_v27 = vadd.f32 %v6499_v18, %v3798_v47 }
 0x42e   : > { %4124 = vst.msk [vmem:[%s6526_s7 + $0x90] sm:$0xff] %vm1609_vm9, %v4052_v16  ;;  %v4055_v50 = vadd.f32 %v6501_v6, %v3801_v52 }
 0x42f   : > { %4122 = vst.msk [vmem:[%s6526_s7 + $0x80] sm:$0xff] %vm1609_vm9, %v4044_v27  ;;  %v4047_v20 = vadd.f32 %v6503_v60, %v3799_v56  ;;  %v4583_v11 = vpop.f32.mrb[36].mxu1 }
 0x430   : > { %4125 = vst.msk [vmem:[%s6526_s7 + $0x98] sm:$0xff] %vm1609_vm9, %v4055_v50  ;;  %v3711_v36 = vadd.f32 %v4583_v11, %v6516_v23  ;;  %v3702_v9 = vpop.f32.mrb[37].mxu1 }
 0x431   : > { %4123 = vst.msk [vmem:[%s6526_s7 + $0x88] sm:$0xff] %vm1609_vm9, %v4047_v20  ;;  %v3703_v22 = vadd.f32 %v6516_v23, %v3702_v9  ;;  %v4584_v18 = vpop.f32.mrb[38].mxu1 }
 0x432   : > { %v3804_v6 = vmul.f32 0.1, %v3711_v36  ;;  %v3714_v28 = vadd.f32 %v4584_v18, %v6516_v23  ;;  %v3705_v19 = vpop.f32.mrb[39].mxu1 }
 0x433   : > { %v3802_v60 = vmul.f32 0.1, %v3703_v22  ;;  %v3706_v0 = vadd.f32 %v6516_v23, %v3705_v19 }
 0x434   : > { %v3805_v37 = vmul.f32 0.1, %v3714_v28  ;;  %v4068_v38 = vadd.f32 %v6505_v29, %v3804_v6 }
 0x435   : > { %v3803_v35 = vmul.f32 0.1, %v3706_v0  ;;  %v4060_v33 = vadd.f32 %v6507_v25, %v3802_v60 }
 0x436   : > { %4128 = vst.msk [vmem:[%s6526_s7 + $0xb0] sm:$0xff] %vm1609_vm9, %v4068_v38  ;;  %v4071_v40 = vadd.f32 %v6509_v61, %v3805_v37 }
 0x437   : > { %4126 = vst.msk [vmem:[%s6526_s7 + $0xa0] sm:$0xff] %vm1609_vm9, %v4060_v33  ;;  %v4063_v17 = vadd.f32 %v6511_v15, %v3803_v35 }
 0x438   : > { %4129 = vst.msk [vmem:[%s6526_s7 + $0xb8] sm:$0xff] %vm1609_vm9, %v4071_v40 }
 0x439   : > { %4127 = vst.msk [vmem:[%s6526_s7 + $0xa8] sm:$0xff] %vm1609_vm9, %v4063_v17 }
 0x441   : > { %v4587_v2 = vpop.f32.mrb[40].mxu1 }
 0x442   : > { %v3727_v29 = vadd.f32 %v4587_v2, %v6516_v23  ;;  %v3718_v24 = vpop.f32.mrb[41].mxu1 }
 0x443   : > { %v3719_v25 = vadd.f32 %v6516_v23, %v3718_v24  ;;  %v4588_v30 = vpop.f32.mrb[42].mxu1 }
 0x444   : > { %v3808_v61 = vmul.f32 0.1, %v3727_v29  ;;  %v3730_v10 = vadd.f32 %v4588_v30, %v6516_v23  ;;  %v3721_v43 = vpop.f32.mrb[43].mxu1 }
 0x445   : > { %v3806_v15 = vmul.f32 0.1, %v3719_v25  ;;  %v3722_v31 = vadd.f32 %v6516_v23, %v3721_v43 }
 0x446   : > { %v3809_v54 = vmul.f32 0.1, %v3730_v10  ;;  %v4084_v34 = vadd.f32 %v6528_v49, %v3808_v61 }
 0x447   : > { %v3807_v21 = vmul.f32 0.1, %v3722_v31  ;;  %v4076_v48 = vadd.f32 %v6531_v3, %v3806_v15 }
 0x448   : > { %4132 = vst.msk [vmem:[%s6526_s7 + $0xd0] sm:$0xff] %vm1609_vm9, %v4084_v34  ;;  %v4087_v59 = vadd.f32 %v6534_v4, %v3809_v54 }
 0x449   : > { %4130 = vst.msk [vmem:[%s6526_s7 + $0xc0] sm:$0xff] %vm1609_vm9, %v4076_v48  ;;  %v4079_v45 = vadd.f32 %v6539_v39, %v3807_v21 }
 0x44a   : > { %4133 = vst.msk [vmem:[%s6526_s7 + $0xd8] sm:$0xff] %vm1609_vm9, %v4087_v59 }
 0x44b   : > { %4131 = vst.msk [vmem:[%s6526_s7 + $0xc8] sm:$0xff] %vm1609_vm9, %v4079_v45 }
 0x464   : > { %v4591_v62 = vpop.f32.mrb[44].mxu1 }
 0x465   : > { %v3743_v49 = vadd.f32 %v4591_v62, %v6516_v23  ;;  %v3734_v12 = vpop.f32.mrb[45].mxu1 }
 0x466   : > { %v3735_v3 = vadd.f32 %v6516_v23, %v3734_v12  ;;  %v4592_v46 = vpop.f32.mrb[46].mxu1 }
 0x467   : > { %v3812_v4 = vmul.f32 0.1, %v3743_v49  ;;  %v3746_v41 = vadd.f32 %v4592_v46, %v6516_v23  ;;  %v3737_v42 = vpop.f32.mrb[47].mxu1 }
 0x468   : > { %v3810_v39 = vmul.f32 0.1, %v3735_v3  ;;  %v3738_v63 = vadd.f32 %v6516_v23, %v3737_v42 }
 0x469   : > { %v4100_v55 = vadd.f32 %v6548_v57, %v3812_v4  ;;  %v3813_v13 = vmul.f32 0.1, %v3746_v41 }
 0x46a   : > { %v4092_v51 = vadd.f32 %v6550_v32, %v3810_v39  ;;  %v3811_v1 = vmul.f32 0.1, %v3738_v63 }
 0x46b   : > { %4136 = vst.msk [vmem:[%s6526_s7 + $0xf0] sm:$0xff] %vm1609_vm9, %v4100_v55  ;;  %v4103_v58 = vadd.f32 %v6552_v8, %v3813_v13 }
 0x46c   : > { %4134 = vst.msk [vmem:[%s6526_s7 + $0xe0] sm:$0xff] %vm1609_vm9, %v4092_v51  ;;  %v4095_v44 = vadd.f32 %v6554_v14, %v3811_v1 }
 0x46d   : > { %4137 = vst.msk [vmem:[%s6526_s7 + $0xf8] sm:$0xff] %vm1609_vm9, %v4103_v58 }
 0x46e   : > { %4135 = vst.msk [vmem:[%s6526_s7 + $0xe8] sm:$0xff] %vm1609_vm9, %v4095_v44 }
 0x46f PF: > { %s16_s21 = sadd.s32 1, %s4765_s21  }
 0x470   : > { %p13_p4 = scmp.ge.s32.totalorder %s16_s21, 4  }
 0x472   :  { %15 = sbr.rel (!%p13_p4) target bundleno = 1 (0x1), region = 78 }

</bundles_post_ra>
